<compile_context>
chip_gen: v7x
topology: tpu7x:2x2x1
jax: 0.10.0
libtpu: 0.0.40
codegen_flags: <defaults>
</compile_context>

<pallas_src>
import jax
import jax.numpy as jnp
from jax.experimental import pallas as pl
from jax.experimental.pallas import tpu as pltpu

LANE = 128


def basic_block_kernel(xpad_ref, w1_ref, w2_ref, s1_ref, b1_ref, s2_ref, b2_ref,
                       o_ref, midpad_ref):
    # xpad_ref : (1, H+2, W+2, C)  bf16   (spatial halo + channel pad done in wrapper)
    # w1/w2    : (9*C, C)          bf16   (HWIO reshaped for im2col)
    # s/b      : (1, C)            f32    (folded BN scale / bias)
    # o_ref    : (1, H, W, C)      f32
    # midpad   : (H+2, W+2, C)     bf16   scratch for the conv2 input halo
    _, Hp, Wp, C = xpad_ref.shape
    H, W = Hp - 2, Wp - 2

    # Zero only the 1-pixel halo ring of the mid scratch every step (correct on
    # every chip / megacore split; interior is fully overwritten below).
    zrow = jnp.zeros((1, Wp, C), midpad_ref.dtype)
    zcol = jnp.zeros((Hp, 1, C), midpad_ref.dtype)
    midpad_ref[0:1, :, :] = zrow
    midpad_ref[Hp - 1:Hp, :, :] = zrow
    midpad_ref[:, 0:1, :] = zcol
    midpad_ref[:, Wp - 1:Wp, :] = zcol

    xpad = xpad_ref[0]                                   # (H+2, W+2, C) bf16

    def conv3x3_im2col(padded, w_ref):
        # padded: (H+2, W+2, C) bf16 ; w_ref: (9*C, C) bf16 -> (H*W, C) f32
        taps = [padded[dy:dy + H, dx:dx + W, :]
                for dy in range(3) for dx in range(3)]
        patch = jnp.concatenate(taps, axis=-1).reshape(H * W, 9 * C)
        return jnp.dot(patch, w_ref[...], preferred_element_type=jnp.float32)

    # ---- conv1 -> bn1 -> relu (epilogue in f32) ----
    out = conv3x3_im2col(xpad, w1_ref)                   # (H*W, C) f32
    out = jnp.maximum(out * s1_ref[...] + b1_ref[...], 0.0)

    # stash bf16 mid activation in the padded scratch interior
    midpad_ref[1:H + 1, 1:W + 1, :] = out.reshape(H, W, C).astype(midpad_ref.dtype)

    # ---- conv2 -> bn2 -> +residual -> relu ----
    out2 = conv3x3_im2col(midpad_ref[...], w2_ref)       # (H*W, C) f32
    resid = xpad[1:H + 1, 1:W + 1, :].astype(jnp.float32).reshape(H * W, C)
    out2 = jnp.maximum(out2 * s2_ref[...] + b2_ref[...] + resid, 0.0)

    o_ref[...] = out2.reshape(1, H, W, C).astype(o_ref.dtype)


def _fold_bn(bn, eps):
    gamma, beta, mean, var = bn
    s = gamma / jnp.sqrt(var + eps)
    b = beta - mean * s
    return s.astype(jnp.float32), b.astype(jnp.float32)


def basic_block_pallas(x_nchw, w1_hwio, w2_hwio, bn1, bn2, eps=1e-5):
    s1, b1 = _fold_bn(bn1, eps)
    s2, b2 = _fold_bn(bn2, eps)

    N, C, H, W = x_nchw.shape
    Cp = ((C + LANE - 1) // LANE) * LANE                 # lane-dense channel pad

    # NCHW -> NHWC, pad 1-px spatial halo + channel pad, bf16 matmul operands.
    x = jnp.transpose(x_nchw, (0, 2, 3, 1)).astype(jnp.float32)
    xpad = jnp.pad(x, ((0, 0), (1, 1), (1, 1), (0, Cp - C))).astype(jnp.bfloat16)

    def prep_w(w):
        wp = jnp.pad(w.astype(jnp.float32),
                     ((0, 0), (0, 0), (0, Cp - C), (0, Cp - C)))
        return wp.reshape(9 * Cp, Cp).astype(jnp.bfloat16)   # im2col weight layout

    def prep_sb(v):
        return jnp.pad(v, (0, Cp - C)).reshape(1, Cp)

    w1p, w2p = prep_w(w1_hwio), prep_w(w2_hwio)
    s1p, b1p, s2p, b2p = map(prep_sb, (s1, b1, s2, b2))

    out = pl.pallas_call(
        basic_block_kernel,
        out_shape=jax.ShapeDtypeStruct((N, H, W, Cp), jnp.float32),
        grid_spec=pltpu.PrefetchScalarGridSpec(
            num_scalar_prefetch=0,
            grid=(N,),
            in_specs=[
                pl.BlockSpec((1, H + 2, W + 2, Cp), lambda n: (n, 0, 0, 0)),
                pl.BlockSpec((9 * Cp, Cp), lambda n: (0, 0)),   # resident weights
                pl.BlockSpec((9 * Cp, Cp), lambda n: (0, 0)),
                pl.BlockSpec((1, Cp), lambda n: (0, 0)),
                pl.BlockSpec((1, Cp), lambda n: (0, 0)),
                pl.BlockSpec((1, Cp), lambda n: (0, 0)),
                pl.BlockSpec((1, Cp), lambda n: (0, 0)),
            ],
            out_specs=pl.BlockSpec((1, H, W, Cp), lambda n: (n, 0, 0, 0)),
            scratch_shapes=[pltpu.VMEM((H + 2, W + 2, Cp), jnp.bfloat16)],
        ),
        compiler_params=pltpu.CompilerParams(
            dimension_semantics=("parallel",),
            vmem_limit_bytes=32 * 1024 * 1024,
        ),
    )(xpad, w1p, w2p, s1p, b1p, s2p, b2p)

    out = out[..., :C]                                   # drop channel padding
    return jnp.transpose(out, (0, 3, 1, 2))              # NHWC -> NCHW


def basic_block_ref(x_nchw, w1_hwio, w2_hwio, bn1, bn2, eps=1e-5):
    """Pure-JAX reference with the same precision policy (bf16 matmul operands,
    f32 accumulation / epilogue, eval-mode BN)."""
    s1, b1 = _fold_bn(bn1, eps)
    s2, b2 = _fold_bn(bn2, eps)

    x = jnp.transpose(x_nchw, (0, 2, 3, 1)).astype(jnp.float32)
    xb = x.astype(jnp.bfloat16)
    dn = ('NHWC', 'HWIO', 'NHWC')

    out = jax.lax.conv_general_dilated(
        xb, w1_hwio.astype(jnp.bfloat16), (1, 1), 'SAME',
        dimension_numbers=dn, preferred_element_type=jnp.float32)
    out = jnp.maximum(out * s1 + b1, 0.0)

    out = jax.lax.conv_general_dilated(
        out.astype(jnp.bfloat16), w2_hwio.astype(jnp.bfloat16), (1, 1), 'SAME',
        dimension_numbers=dn, preferred_element_type=jnp.float32)
    out = jnp.maximum(out * s2 + b2 + xb.astype(jnp.float32), 0.0)
    return jnp.transpose(out, (0, 3, 1, 2))


if __name__ == "__main__":
    N, C, H, W = 2, 8, 16, 16   # inplanes == planes (no downsample, stride=1)

    key = jax.random.PRNGKey(0)
    k_x, k_w1, k_w2 = jax.random.split(key, 3)

    x = jax.random.normal(k_x, (N, C, H, W), jnp.float32)
    # conv weights in HWIO layout (3, 3, Cin, Cout)
    w1 = 0.1 * jax.random.normal(k_w1, (3, 3, C, C), jnp.float32)
    w2 = 0.1 * jax.random.normal(k_w2, (3, 3, C, C), jnp.float32)

    # Deterministic BN params (gamma, beta, running_mean, running_var)
    bn1 = (1.0 + 0.05 * jnp.arange(C, dtype=jnp.float32),
           0.01 * jnp.arange(C, dtype=jnp.float32),
           0.02 * jnp.arange(C, dtype=jnp.float32),
           1.0 + 0.10 * jnp.arange(C, dtype=jnp.float32))
    bn2 = (1.0 - 0.02 * jnp.arange(C, dtype=jnp.float32),
           -0.01 * jnp.arange(C, dtype=jnp.float32),
           0.03 * jnp.arange(C, dtype=jnp.float32),
           1.0 + 0.05 * jnp.arange(C, dtype=jnp.float32))

    out = jax.block_until_ready(basic_block_pallas(x, w1, w2, bn1, bn2))
    ref = jax.block_until_ready(basic_block_ref(x, w1, w2, bn1, bn2))

    assert out.shape == (N, C, H, W)
    max_err = jnp.max(jnp.abs(out - ref))
    # bf16 matmul operands -> compare against the bf16-operand reference with a
    # tolerance that covers accumulation-order / bf16-rounding differences only.
    assert jnp.allclose(out, ref, atol=2e-2, rtol=2e-2), f"max abs err {max_err}"

    print("KERNEL_OK")
</pallas_src>

<mosaic_0001>
module attributes {stable_mosaic.version = 11 : i64} {
  func.func @basic_block_kernel(%arg0: i32, %arg1: memref<1x18x18x128xbf16, #tpu.memory_space<vmem>>, %arg2: memref<1152x128xbf16, #tpu.memory_space<vmem>>, %arg3: memref<1152x128xbf16, #tpu.memory_space<vmem>>, %arg4: memref<1x128xf32, #tpu.memory_space<vmem>>, %arg5: memref<1x128xf32, #tpu.memory_space<vmem>>, %arg6: memref<1x128xf32, #tpu.memory_space<vmem>>, %arg7: memref<1x128xf32, #tpu.memory_space<vmem>>, %arg8: memref<1x16x16x128xf32, #tpu.memory_space<vmem>>, %arg9: memref<18x18x128xbf16, #tpu.memory_space<vmem>>) attributes {dimension_semantics = [#tpu.dimension_semantics<parallel>], iteration_bounds = array<i64: 2>, scalar_prefetch = 0 : i64, scratch_operands = 1 : i64, tpu.core_type = #tpu.core_type<tc>, window_params = [{transform_indices = @transform_0, window_bounds = array<i64: 1, 18, 18, 128>}, {pipeline_mode = #tpu.pipeline_mode<synchronous>, transform_indices = @transform_1, window_bounds = array<i64: 1152, 128>}, {pipeline_mode = #tpu.pipeline_mode<synchronous>, transform_indices = @transform_2, window_bounds = array<i64: 1152, 128>}, {pipeline_mode = #tpu.pipeline_mode<synchronous>, transform_indices = @transform_3, window_bounds = array<i64: 1, 128>}, {pipeline_mode = #tpu.pipeline_mode<synchronous>, transform_indices = @transform_4, window_bounds = array<i64: 1, 128>}, {pipeline_mode = #tpu.pipeline_mode<synchronous>, transform_indices = @transform_5, window_bounds = array<i64: 1, 128>}, {pipeline_mode = #tpu.pipeline_mode<synchronous>, transform_indices = @transform_6, window_bounds = array<i64: 1, 128>}, {transform_indices = @transform_7, window_bounds = array<i64: 1, 16, 16, 128>}]} {
    %cst = arith.constant 0.000000e+00 : bf16
    %0 = vector.broadcast %cst : bf16 to vector<1x18x128xbf16>
    %cst_0 = arith.constant 0.000000e+00 : bf16
    %1 = vector.broadcast %cst_0 : bf16 to vector<18x1x128xbf16>
    %c0 = arith.constant 0 : index
    %c0_1 = arith.constant 0 : index
    %c0_2 = arith.constant 0 : index
    %2 = vector.load %arg9[%c0, %c0_1, %c0_2] : memref<18x18x128xbf16, #tpu.memory_space<vmem>>, vector<1x18x128xbf16>
    tpu.vector_store %arg9[%c0, %c0_1, %c0_2], %0 {strides = array<i32>} : memref<18x18x128xbf16, #tpu.memory_space<vmem>>, vector<1x18x128xbf16>,
    %c17 = arith.constant 17 : index
    %c0_3 = arith.constant 0 : index
    %c0_4 = arith.constant 0 : index
    %3 = vector.load %arg9[%c17, %c0_3, %c0_4] : memref<18x18x128xbf16, #tpu.memory_space<vmem>>, vector<1x18x128xbf16>
    tpu.vector_store %arg9[%c17, %c0_3, %c0_4], %0 {strides = array<i32>} : memref<18x18x128xbf16, #tpu.memory_space<vmem>>, vector<1x18x128xbf16>,
    %c0_5 = arith.constant 0 : index
    %c0_6 = arith.constant 0 : index
    %c0_7 = arith.constant 0 : index
    %4 = vector.load %arg9[%c0_5, %c0_6, %c0_7] : memref<18x18x128xbf16, #tpu.memory_space<vmem>>, vector<18x1x128xbf16>
    tpu.vector_store %arg9[%c0_5, %c0_6, %c0_7], %1 {strides = array<i32>} : memref<18x18x128xbf16, #tpu.memory_space<vmem>>, vector<18x1x128xbf16>,
    %c0_8 = arith.constant 0 : index
    %c17_9 = arith.constant 17 : index
    %c0_10 = arith.constant 0 : index
    %5 = vector.load %arg9[%c0_8, %c17_9, %c0_10] : memref<18x18x128xbf16, #tpu.memory_space<vmem>>, vector<18x1x128xbf16>
    tpu.vector_store %arg9[%c0_8, %c17_9, %c0_10], %1 {strides = array<i32>} : memref<18x18x128xbf16, #tpu.memory_space<vmem>>, vector<18x1x128xbf16>,
    %c0_11 = arith.constant 0 : index
    %c0_12 = arith.constant 0 : index
    %c0_13 = arith.constant 0 : index
    %c0_14 = arith.constant 0 : index
    %6 = vector.load %arg1[%c0_11, %c0_12, %c0_13, %c0_14] : memref<1x18x18x128xbf16, #tpu.memory_space<vmem>>, vector<1x18x18x128xbf16>
    %7 = vector.shape_cast %6 : vector<1x18x18x128xbf16> to vector<18x18x128xbf16>
    %8 = vector.extract_strided_slice %7 {offsets = [0, 0, 0], sizes = [16, 16, 128], strides = [1, 1, 1]} : vector<18x18x128xbf16> to vector<16x16x128xbf16>
    %9 = vector.extract_strided_slice %7 {offsets = [0, 1, 0], sizes = [16, 16, 128], strides = [1, 1, 1]} : vector<18x18x128xbf16> to vector<16x16x128xbf16>
    %10 = vector.extract_strided_slice %7 {offsets = [0, 2, 0], sizes = [16, 16, 128], strides = [1, 1, 1]} : vector<18x18x128xbf16> to vector<16x16x128xbf16>
    %11 = vector.extract_strided_slice %7 {offsets = [1, 0, 0], sizes = [16, 16, 128], strides = [1, 1, 1]} : vector<18x18x128xbf16> to vector<16x16x128xbf16>
    %12 = vector.extract_strided_slice %7 {offsets = [1, 1, 0], sizes = [16, 16, 128], strides = [1, 1, 1]} : vector<18x18x128xbf16> to vector<16x16x128xbf16>
    %13 = vector.extract_strided_slice %7 {offsets = [1, 2, 0], sizes = [16, 16, 128], strides = [1, 1, 1]} : vector<18x18x128xbf16> to vector<16x16x128xbf16>
    %14 = vector.extract_strided_slice %7 {offsets = [2, 0, 0], sizes = [16, 16, 128], strides = [1, 1, 1]} : vector<18x18x128xbf16> to vector<16x16x128xbf16>
    %15 = vector.extract_strided_slice %7 {offsets = [2, 1, 0], sizes = [16, 16, 128], strides = [1, 1, 1]} : vector<18x18x128xbf16> to vector<16x16x128xbf16>
    %16 = vector.extract_strided_slice %7 {offsets = [2, 2, 0], sizes = [16, 16, 128], strides = [1, 1, 1]} : vector<18x18x128xbf16> to vector<16x16x128xbf16>
    %17 = tpu.concatenate %8, %9, %10, %11, %12, %13, %14, %15, %16 in 2 : vector<16x16x128xbf16>, vector<16x16x128xbf16>, vector<16x16x128xbf16>, vector<16x16x128xbf16>, vector<16x16x128xbf16>, vector<16x16x128xbf16>, vector<16x16x128xbf16>, vector<16x16x128xbf16>, vector<16x16x128xbf16> -> vector<16x16x1152xbf16>
    %18 = vector.shape_cast %17 : vector<16x16x1152xbf16> to vector<256x1152xbf16>
    %c0_15 = arith.constant 0 : index
    %c0_16 = arith.constant 0 : index
    %19 = vector.load %arg2[%c0_15, %c0_16] : memref<1152x128xbf16, #tpu.memory_space<vmem>>, vector<1152x128xbf16>
    %cst_17 = arith.constant dense<0.000000e+00> : vector<256x128xf32>
    %20 = tpu.matmul %18, %19, %cst_17 {dimension_numbers = #tpu.dot_dimension_numbers<[1], [0], [0], [1], [0, 0, 1, 1], [], []>} : vector<256x1152xbf16>, vector<1152x128xbf16>, vector<256x128xf32> -> vector<256x128xf32>
    %c0_18 = arith.constant 0 : index
    %c0_19 = arith.constant 0 : index
    %21 = vector.load %arg4[%c0_18, %c0_19] : memref<1x128xf32, #tpu.memory_space<vmem>>, vector<1x128xf32>
    %22 = vector.broadcast %21 : vector<1x128xf32> to vector<256x128xf32>
    %23 = arith.mulf %20, %22 : vector<256x128xf32>
    %c0_20 = arith.constant 0 : index
    %c0_21 = arith.constant 0 : index
    %24 = vector.load %arg5[%c0_20, %c0_21] : memref<1x128xf32, #tpu.memory_space<vmem>>, vector<1x128xf32>
    %25 = vector.broadcast %24 : vector<1x128xf32> to vector<256x128xf32>
    %26 = arith.addf %23, %25 : vector<256x128xf32>
    %cst_22 = arith.constant 0.000000e+00 : f32
    %27 = vector.broadcast %cst_22 : f32 to vector<256x128xf32>
    %28 = arith.maximumf %26, %27 : vector<256x128xf32>
    %29 = vector.shape_cast %28 : vector<256x128xf32> to vector<16x16x128xf32>
    %30 = arith.truncf %29 : vector<16x16x128xf32> to vector<16x16x128xbf16>
    %c1 = arith.constant 1 : index
    %c1_23 = arith.constant 1 : index
    %c0_24 = arith.constant 0 : index
    %31 = vector.load %arg9[%c1, %c1_23, %c0_24] : memref<18x18x128xbf16, #tpu.memory_space<vmem>>, vector<16x16x128xbf16>
    tpu.vector_store %arg9[%c1, %c1_23, %c0_24], %30 {strides = array<i32>} : memref<18x18x128xbf16, #tpu.memory_space<vmem>>, vector<16x16x128xbf16>,
    %c0_25 = arith.constant 0 : index
    %c0_26 = arith.constant 0 : index
    %c0_27 = arith.constant 0 : index
    %32 = vector.load %arg9[%c0_25, %c0_26, %c0_27] : memref<18x18x128xbf16, #tpu.memory_space<vmem>>, vector<18x18x128xbf16>
    %33 = vector.extract_strided_slice %32 {offsets = [0, 0, 0], sizes = [16, 16, 128], strides = [1, 1, 1]} : vector<18x18x128xbf16> to vector<16x16x128xbf16>
    %34 = vector.extract_strided_slice %32 {offsets = [0, 1, 0], sizes = [16, 16, 128], strides = [1, 1, 1]} : vector<18x18x128xbf16> to vector<16x16x128xbf16>
    %35 = vector.extract_strided_slice %32 {offsets = [0, 2, 0], sizes = [16, 16, 128], strides = [1, 1, 1]} : vector<18x18x128xbf16> to vector<16x16x128xbf16>
    %36 = vector.extract_strided_slice %32 {offsets = [1, 0, 0], sizes = [16, 16, 128], strides = [1, 1, 1]} : vector<18x18x128xbf16> to vector<16x16x128xbf16>
    %37 = vector.extract_strided_slice %32 {offsets = [1, 1, 0], sizes = [16, 16, 128], strides = [1, 1, 1]} : vector<18x18x128xbf16> to vector<16x16x128xbf16>
    %38 = vector.extract_strided_slice %32 {offsets = [1, 2, 0], sizes = [16, 16, 128], strides = [1, 1, 1]} : vector<18x18x128xbf16> to vector<16x16x128xbf16>
    %39 = vector.extract_strided_slice %32 {offsets = [2, 0, 0], sizes = [16, 16, 128], strides = [1, 1, 1]} : vector<18x18x128xbf16> to vector<16x16x128xbf16>
    %40 = vector.extract_strided_slice %32 {offsets = [2, 1, 0], sizes = [16, 16, 128], strides = [1, 1, 1]} : vector<18x18x128xbf16> to vector<16x16x128xbf16>
    %41 = vector.extract_strided_slice %32 {offsets = [2, 2, 0], sizes = [16, 16, 128], strides = [1, 1, 1]} : vector<18x18x128xbf16> to vector<16x16x128xbf16>
    %42 = tpu.concatenate %33, %34, %35, %36, %37, %38, %39, %40, %41 in 2 : vector<16x16x128xbf16>, vector<16x16x128xbf16>, vector<16x16x128xbf16>, vector<16x16x128xbf16>, vector<16x16x128xbf16>, vector<16x16x128xbf16>, vector<16x16x128xbf16>, vector<16x16x128xbf16>, vector<16x16x128xbf16> -> vector<16x16x1152xbf16>
    %43 = vector.shape_cast %42 : vector<16x16x1152xbf16> to vector<256x1152xbf16>
    %c0_28 = arith.constant 0 : index
    %c0_29 = arith.constant 0 : index
    %44 = vector.load %arg3[%c0_28, %c0_29] : memref<1152x128xbf16, #tpu.memory_space<vmem>>, vector<1152x128xbf16>
    %cst_30 = arith.constant dense<0.000000e+00> : vector<256x128xf32>
    %45 = tpu.matmul %43, %44, %cst_30 {dimension_numbers = #tpu.dot_dimension_numbers<[1], [0], [0], [1], [0, 0, 1, 1], [], []>} : vector<256x1152xbf16>, vector<1152x128xbf16>, vector<256x128xf32> -> vector<256x128xf32>
    %46 = vector.extract_strided_slice %7 {offsets = [1, 1, 0], sizes = [16, 16, 128], strides = [1, 1, 1]} : vector<18x18x128xbf16> to vector<16x16x128xbf16>
    %47 = arith.extf %46 : vector<16x16x128xbf16> to vector<16x16x128xf32>
    %48 = vector.shape_cast %47 : vector<16x16x128xf32> to vector<256x128xf32>
    %c0_31 = arith.constant 0 : index
    %c0_32 = arith.constant 0 : index
    %49 = vector.load %arg6[%c0_31, %c0_32] : memref<1x128xf32, #tpu.memory_space<vmem>>, vector<1x128xf32>
    %50 = vector.broadcast %49 : vector<1x128xf32> to vector<256x128xf32>
    %51 = arith.mulf %45, %50 : vector<256x128xf32>
    %c0_33 = arith.constant 0 : index
    %c0_34 = arith.constant 0 : index
    %52 = vector.load %arg7[%c0_33, %c0_34] : memref<1x128xf32, #tpu.memory_space<vmem>>, vector<1x128xf32>
    %53 = vector.broadcast %52 : vector<1x128xf32> to vector<256x128xf32>
    %54 = arith.addf %51, %53 : vector<256x128xf32>
    %55 = arith.addf %54, %48 : vector<256x128xf32>
    %cst_35 = arith.constant 0.000000e+00 : f32
    %56 = vector.broadcast %cst_35 : f32 to vector<256x128xf32>
    %57 = arith.maximumf %55, %56 : vector<256x128xf32>
    %58 = vector.shape_cast %57 : vector<256x128xf32> to vector<1x16x16x128xf32>
    %c0_36 = arith.constant 0 : index
    %c0_37 = arith.constant 0 : index
    %c0_38 = arith.constant 0 : index
    %c0_39 = arith.constant 0 : index
    %59 = vector.load %arg8[%c0_36, %c0_37, %c0_38, %c0_39] : memref<1x16x16x128xf32, #tpu.memory_space<vmem>>, vector<1x16x16x128xf32>
    tpu.vector_store %arg8[%c0_36, %c0_37, %c0_38, %c0_39], %58 {strides = array<i32>} : memref<1x16x16x128xf32, #tpu.memory_space<vmem>>, vector<1x16x16x128xf32>,
    return
  }
  func.func @transform_0(%arg0: i32) -> (i32, i32, i32, i32) {
    %c0_i32 = arith.constant 0 : i32
    %c0_i32_0 = arith.constant 0 : i32
    %c0_i32_1 = arith.constant 0 : i32
    %c0_i32_2 = arith.constant 0 : i32
    return %arg0, %c0_i32, %c0_i32_0, %c0_i32_1 : i32, i32, i32, i32
  }
  func.func @transform_1(%arg0: i32) -> (i32, i32) {
    %c0_i32 = arith.constant 0 : i32
    %c0_i32_0 = arith.constant 0 : i32
    %c0_i32_1 = arith.constant 0 : i32
    return %c0_i32, %c0_i32_0 : i32, i32
  }
  func.func @transform_2(%arg0: i32) -> (i32, i32) {
    %c0_i32 = arith.constant 0 : i32
    %c0_i32_0 = arith.constant 0 : i32
    %c0_i32_1 = arith.constant 0 : i32
    return %c0_i32, %c0_i32_0 : i32, i32
  }
  func.func @transform_3(%arg0: i32) -> (i32, i32) {
    %c0_i32 = arith.constant 0 : i32
    %c0_i32_0 = arith.constant 0 : i32
    %c0_i32_1 = arith.constant 0 : i32
    return %c0_i32, %c0_i32_0 : i32, i32
  }
  func.func @transform_4(%arg0: i32) -> (i32, i32) {
    %c0_i32 = arith.constant 0 : i32
    %c0_i32_0 = arith.constant 0 : i32
    %c0_i32_1 = arith.constant 0 : i32
    return %c0_i32, %c0_i32_0 : i32, i32
  }
  func.func @transform_5(%arg0: i32) -> (i32, i32) {
    %c0_i32 = arith.constant 0 : i32
    %c0_i32_0 = arith.constant 0 : i32
    %c0_i32_1 = arith.constant 0 : i32
    return %c0_i32, %c0_i32_0 : i32, i32
  }
  func.func @transform_6(%arg0: i32) -> (i32, i32) {
    %c0_i32 = arith.constant 0 : i32
    %c0_i32_0 = arith.constant 0 : i32
    %c0_i32_1 = arith.constant 0 : i32
    return %c0_i32, %c0_i32_0 : i32, i32
  }
  func.func @transform_7(%arg0: i32) -> (i32, i32, i32, i32) {
    %c0_i32 = arith.constant 0 : i32
    %c0_i32_0 = arith.constant 0 : i32
    %c0_i32_1 = arith.constant 0 : i32
    %c0_i32_2 = arith.constant 0 : i32
    return %arg0, %c0_i32, %c0_i32_0, %c0_i32_1 : i32, i32, i32, i32
  }
}

</mosaic_0001>

<bundles_post_ra>
// kernel: tpu_custom_call.1
= control target key start
LH: loop header
LB: loop body
LE: loop exit
PB: predicated region body
PF: predicated region fallthrough
CT: control target
= control target key end

     0   :  { %12 = vsyncpa [#allocation4], 0  ;;  %s9330_s0 = inlined_call_operand.vmem [shape: bf16[2,18,18,128], index: 0, kind: input, shape index: {}]   ;;  %s9331_s1 = inlined_call_operand.vmem [shape: bf16[1152,128], index: 1, kind: input, shape index: {}]   ;;  %s9332_s2 = inlined_call_operand.hbm [shape: bf16[1152,128], index: 2, kind: input, shape index: {}]   ;;  %s9333_s3 = inlined_call_operand.vmem [shape: f32[1,128], index: 3, kind: input, shape index: {}]   ;;  %s9334_s4 = inlined_call_operand.vmem [shape: f32[1,128], index: 4, kind: input, shape index: {}]   ;;  %s9335_s5 = inlined_call_operand.vmem [shape: f32[1,128], index: 5, kind: input, shape index: {}]   ;;  %s9336_s6 = inlined_call_operand.vmem [shape: f32[1,128], index: 6, kind: input, shape index: {}]   ;;  %s9337_s7 = inlined_call_operand.hbm [shape: f32[2,16,16,128], index: 7, kind: output, shape index: {}]  }
   0x1   :  { %13 = vsyncpa [#allocation5], 0 }
   0x2   :  { %15 = vsyncpa [#allocation5 + $0x1], 0  ;;  %s7139_s24 = smov 0   ;;  %s7141_s25 = smov 0  }
   0x3   :  { %s7143_s26 = smov 0   ;;  %s7145_s27 = smov 0  }
   0x4 LB: > { %s7160_s28 = sadd.s32 4294967295, %s7090_s27   ;;  %s5335_s29 = sadd.s32 4294967294, %s7090_s27   ;;  %s7090_s27 = sphi %s7145_s27, %s9387_s27   ;;  %s7086_s26 = sphi %s7143_s26, %s9386_s26   ;;  %s7082_s25 = sphi %s7141_s25, %s9385_s25   ;;  %s7078_s24 = sphi %s7139_s24, %s9384_s24  }
   0x5   : > { %s7164_s30 = sadd.s32 1, %s7090_s27   ;;  %s180_s8 = sadd.s32 1, %s7086_s26 }
   0x6   : > { %s177_s9 = ssub.s32 %s7090_s27, %s7164_s30  ;;  %p190_p0 = scmp.ne.s32.totalorder %s7086_s26, %s7082_s25 }
   0x7   : > { %p178_p1 = scmp.eq.s32.totalorder %s177_s9, 0  ;;  %p191_p2 = scmp.eq.s32.totalorder %s7160_s28, 1 }
   0x8   : > { %p196_p3 = scmp.ne.s32.totalorder %s7082_s25, %s7078_s24  ;;  %p197_p4 = scmp.eq.s32.totalorder %s5335_s29, 1 }
   0x9   : > { %s7175_s10 = scalar_select %p178_p1, %s7086_s26, %s180_s8  }
   0xa   : > { %p7177_p5 = por %p191_p2, %p190_p0  ;;  %p7181_p6 = por %p197_p4, %p196_p3 }
   0xb   : > { %p5336_p7 = scmp.ge.s32.totalorder %s7090_s27, 1  ;;  %p204_p8 = scmp.lt.s32.totalorder %s7090_s27, 3 }
   0xc   : > { %s9341_s11 = scalar_select %p7177_p5, 1, 0 }
   0xd   : > { %s9342_s12 = scalar_select %p7181_p6, 1, 0 }
   0xe   : > { %p9338_p9 = scmp.eq.s32.totalorder %s7160_s28, 0  ;;  %p7188_p10 = pnand %p5336_p7, %p204_p8 }
   0xf   : > { %s7092_s14 = smov [#allocation3]   ;;  %s6996_s19 = scalar_lea.hbm %s9332_s2, 9216 }
  0x10   : > { %s9343_s13 = scalar_select %p7188_p10, 1, 0 }
  0x11   : > { %s219_s15 = sshll.u32 %s7092_s14, 4  ;;  %p6680_p11 = pneg %p7188_p10  ;;  %s220_s15 = int_to_ptr.vmem [resolvable:$true] %s219_s15 }
  0x12   : > { %p6997_p13 = scmp.ne.s32.totalorder %s9332_s2, %s6996_s19  ;;  %p7003_p3 = scmp.lt.u32.totalorder %s6996_s19, %s9332_s2 }
  0x13   : > { %p7196_p12 = pnand %p9338_p9, %p6680_p11 }
  0x15   : > { %p6998_p0 = pneg %p7196_p12 }
  0x17   : > { %p6999_p1 = pnand %p6998_p0, %p6997_p13 }
  0x19   : > { %p7000_p2 = pneg %p6999_p1 }
  0x1b   : > { %p7005_p4 = pnand %p7003_p3, %p7000_p2 }
  0x1d   : > { %7008 = shalt.err (!%p7005_p4)
}
  0x1e   : > { %s7009_s29 = scalar_lea.vmem %s220_s15, 9216  ;;  %p7017_p9 = scmp.lt.s32.totalorder %s220_s15, %s220_s15 }
  0x1f   : > { %p7010_p7 = scmp.ne.s32.totalorder %s220_s15, %s7009_s29  ;;  %p7018_p6 = scmp.lt.s32.totalorder %s7009_s29, %s7009_s29 }
  0x21   : > { %p7012_p8 = pnand %p7010_p7, %p6998_p0  ;;  %p7019_p5 = por %p7018_p6, %p7017_p9 }
  0x23   : > { %p7013_p11 = pneg %p7012_p8 }
  0x25   : > { %p7020_p10 = pnand %p7019_p5, %p7013_p11 }
  0x27   : > { %7023 = shalt.err (!%p7020_p10)
}
  0x28   : > { %s7093_s8 = smov 64   ;;  %s7094_s9 = smov 4  }
  0x29   : > { %6683 = dma.hbm_to_vmem [thread:$0]  (!%p7196_p12), %s9332_s2, 9216, %s220_s15, [#allocation4], %s7093_s8, %s7093_s8, %s7094_s9  }
  0x2a   : > { %p9345_p13 = scmp.ne.s32.totalorder %s9343_s13, 0 }
  0x2c   : > { %255 = sbr.rel (%p9345_p13) target bundleno = 1176 (0x498), region = 48 }
  0x33   : > { %p9346_p1 = scmp.eq.s32.totalorder %s7160_s28, 0 }
  0x35   : > { %7069 = dma.done.wait (%p9346_p1), [#allocation4], 9216   ;;  %p9347_p0 = pmov %p9346_p1 }
  0x36   : > { %v6729_v0 = vld [vmem:[%s9331_s1 + $0x40] sm:$0xff]   ;;  %v6733_v4 = vld [vmem:[%s9331_s1 + $0x48] sm:$0xff]   ;;  %v6737_v8 = vld [vmem:[%s9331_s1 + $0x50] sm:$0xff]   ;;  %p287_p5 = scmp.lt.s32.totalorder %s7160_s28, 1  ;;  %vm611_vm0 = vsmask.f32 7424 }
  0x37   : > { %7071 = vsyncadd (%p9347_p0), [#allocation4], 4294958080  ;;  %v6730_v1 = vld [vmem:[%s9331_s1 + $0xc0] sm:$0xff]   ;;  %5633 = vmatprep.subr.bf16.mxu0 %v6729_v0  ;;  %v6734_v5 = vld [vmem:[%s9331_s1 + $0xc8] sm:$0xff]   ;;  %vm820_vm1 = vcmask 1046528   ;;  %vm300_vm2 = vcmask 1040384  }
  0x38   : > { %v6731_v2 = vld [vmem:[%s9331_s1] sm:$0xff]   ;;  %5745 = vmatprep.subr.bf16.mxu1 %v6730_v1  ;;  %v6735_v6 = vld [vmem:[%s9331_s1 + $0x8] sm:$0xff]   ;;  %v6738_v9 = vld [vmem:[%s9331_s1 + $0xd0] sm:$0xff]   ;;  %s288_s16 = scalar_select %p287_p5, %s7160_s28, 1  ;;  %vm301_vm3 = vsmask.f32 256 }
  0x39   : > { %v6732_v3 = vld [vmem:[%s9331_s1 + $0x80] sm:$0xff]   ;;  %5634 = vmatpush3.bf16.msra.mxu0 %v6731_v2  ;;  %v6736_v7 = vld [vmem:[%s9331_s1 + $0x88] sm:$0xff]   ;;  %v6739_v10 = vld [vmem:[%s9331_s1 + $0x10] sm:$0xff]   ;;  %vm357_vm5 = vsmask.f32 7938  ;;  %vm2847_vm7 = vcmask 1043456  }
  0x3a   : > { %5746 = vmatpush3.bf16.msra.mxu1 %v6732_v3  ;;  %5635 = vmatprep.subr.bf16.mxu0 %v6733_v4  ;;  %v6740_v11 = vld [vmem:[%s9331_s1 + $0x90] sm:$0xff]   ;;  %v6741_v12 = vld [vmem:[%s9331_s1 + $0x58] sm:$0xff]   ;;  %v6745_v16 = vld [vmem:[%s9331_s1 + $0x60] sm:$0xff]   ;;  %s6673_s17 = smul.u32 216, %s288_s16  ;;  %vm2524_vm8 = vsmask.f32 4368 }
  0x3b   : > { %5747 = vmatprep.subr.bf16.mxu1 %v6734_v5  ;;  %v6742_v13 = vld [vmem:[%s9331_s1 + $0xd8] sm:$0xff]   ;;  %v6746_v17 = vld [vmem:[%s9331_s1 + $0xe0] sm:$0xff]   ;;  %v6749_v20 = vld [vmem:[%s9331_s1 + $0x68] sm:$0xff]   ;;  %s284_s14 = sand.u32 1, %s7082_s25   ;;  %p9382_p9 = scmp.ne.s32.totalorder %s9341_s11, 0 }
  0x3c   : > { %v6743_v14 = vld [vmem:[%s9331_s1 + $0x18] sm:$0xff]   ;;  %v6747_v18 = vld [vmem:[%s9331_s1 + $0x20] sm:$0xff]   ;;  %v6750_v21 = vld [vmem:[%s9331_s1 + $0xe8] sm:$0xff]   ;;  %s7320_s8 = scalar_lea.vmem %s9330_s0, %s6673_s17  ;;  %s5341_s19 = sshll.u32 %s284_s14, 8 }
  0x3d   : > { %5636 = vmatpush3.bf16.msra.mxu0 %v6735_v6  ;;  %v6744_v15 = vld [vmem:[%s9331_s1 + $0x98] sm:$0xff]   ;;  %v6748_v19 = vld [vmem:[%s9331_s1 + $0xa0] sm:$0xff]   ;;  %v6751_v22 = vld [vmem:[%s9331_s1 + $0x28] sm:$0xff]   ;;  %s9106_s20 = scalar_lea.vmem [#allocation6], %s5341_s19  ;;  %s7096_s16 = smov [#allocation6]  }
  0x3e   : > { %5748 = vmatpush3.bf16.msra.mxu1 %v6736_v7  ;;  %5637 = vmatprep.subr.bf16.mxu0 %v6737_v8  ;;  %v6752_v23 = vld [vmem:[%s9331_s1 + $0xa8] sm:$0xff]   ;;  %v6753_v24 = vld [vmem:[%s9331_s1 + $0x70] sm:$0xff]   ;;  %v6757_v28 = vld [vmem:[%s9331_s1 + $0x78] sm:$0xff]   ;;  %s5261_s21 = sshll.u32 %s9106_s20, 4  ;;  %s7028_s29 = sshll.u32 %s7096_s16, 4  ;;  %s9282_s21 = int_to_ptr.vmem [resolvable:$true] %s5261_s21  ;;  %s7029_s29 = int_to_ptr.vmem [resolvable:$false] %s7028_s29 }
  0x3f   : > { %5749 = vmatprep.subr.bf16.mxu1 %v6738_v9  ;;  %v6754_v25 = vld [vmem:[%s9331_s1 + $0xf0] sm:$0xff]   ;;  %v6758_v29 = vld [vmem:[%s9331_s1 + $0xf8] sm:$0xff]   ;;  %v6761_v32 = vld [vmem:[%s7320_s8] sm:$0xff]   ;;  %s7024_s23 = scalar_lea.vmem %s9282_s21, 4096  ;;  %s7030_s9 = scalar_lea.vmem %s7029_s29, 8192 }
  0x40   : > { %v6755_v26 = vld [vmem:[%s9331_s1 + $0x30] sm:$0xff]   ;;  %v6759_v30 = vld [vmem:[%s9331_s1 + $0x38] sm:$0xff]   ;;  %v6762_v33 = vld [vmem:[%s7320_s8 + $0x8] ss:$0 sps:$4 sm:$0x11]   ;;  %v613_v36 = vshrl.u32 %v6761_v32, 16  ;;  %p7025_p6 = scmp.ne.s32.totalorder %s9282_s21, %s7024_s23  ;;  %p7031_p2 = scmp.lt.s32.totalorder %s9282_s21, %s7029_s29 }
  0x41   : > { %5638 = vmatpush3.bf16.msra.mxu0 %v6739_v10  ;;  %v6756_v27 = vld [vmem:[%s9331_s1 + $0xb0] sm:$0xff]   ;;  %v6760_v31 = vld [vmem:[%s9331_s1 + $0xb8] sm:$0xff]   ;;  %v6764_v35 = vld [vmem:[%s9331_s1 + $0x140] sm:$0xff]   ;;  %v615_v37 = vshll.u32 %v6761_v32, 16  ;;  %v620_v38 = vshll.u32 %v6762_v33, 16  ;;  %v821_v39 = vrot.slane %v6761_v32, 1  ;;  %p7032_p3 = scmp.lt.s32.totalorder %s7030_s9, %s7024_s23 }
  0x42   : > { %5750 = vmatpush3.bf16.msra.mxu1 %v6740_v11  ;;  %5639 = vmatprep.subr.bf16.mxu0 %v6741_v12  ;;  %v7328_v34 = vld [vmem:[%s7320_s8 + $0xc] sm:$0xff]   ;;  %v822_v40 = vrot.slane %v6762_v33, 1  ;;  %v418_v41 = vld [vmem:[%s7320_s8 + $0x14] sm:$0x1]  ;;  %v7336_v45 = vld [vmem:[%s7320_s8 + $0x18] sm:$0xff]   ;;  %p7026_p10 = pnand %p7025_p6, %p9382_p9 }
  0x43   : > { %5751 = vmatprep.subr.bf16.mxu1 %v6742_v13  ;;  %1706 = vmatprep.mubr.bf16.mxu1 %v7328_v34  ;;  %v617_v42 = vrot.slane %v615_v37, 1  ;;  %v622_v43 = vrot.slane %v620_v38, 1  ;;  %v5360_v44 = vcombine.low %v418_v41, %v418_v41  ;;  %v421_v46 = vld [vmem:[%s7320_s8 + $0x20] sm:$0x1]  ;;  %v625_v48 = vshrl.u32 %v7328_v34, 16  ;;  %v7343_v52 = vld [vmem:[%s7320_s8 + $0x24] sm:$0xff]   ;;  %vm8002_vm4 = vmand %vm300_vm2, %vm301_vm3  ;;  %p7033_p4 = por %p7032_p3, %p7031_p2 }
  0x44   : > { %v823_v47 = vsel %vm820_vm1, %v821_v39, %v822_v40  ;;  %v627_v49 = vshll.u32 %v7328_v34, 16  ;;  %v6765_v53 = vld [vmem:[%s9331_s1 + $0x100] sm:$0xff]   ;;  %v824_v55 = vrot.slane %v7328_v34, 1  ;;  %v5361_v57 = vcombine.low %v421_v46, %v421_v46  ;;  %v6770_v62 = vld [vmem:[%s9331_s1 + $0x148] sm:$0xff]   ;;  %v6776_v10 = vld [vmem:[%s9331_s1 + $0x150] sm:$0xff]   ;;  %p7027_p12 = pneg %p7026_p10 }
  0x45   : > { %5640 = vmatpush3.bf16.msra.mxu0 %v6743_v14  ;;  %v618_v50 = vor.u32 %v617_v42, %v613_v36  ;;  %v632_v51 = vshll.u32 %v5360_v44, 16  ;;  %v825_v56 = vrot.slane %v5360_v44, 1  ;;  %v637_v60 = vshrl.u32 %v7336_v45, 16  ;;  %v424_v1 = vld [vmem:[%s7320_s8 + $0x2c] sm:$0x1]  ;;  %v7372_v11 = vld [vmem:[%s7320_s8 + $0x30] sm:$0xff]   ;;  %vm8014_vm6 = vmand %vm300_vm2, %vm357_vm5 }
  0x46   : > { %5752 = vmatpush3.bf16.msra.mxu1 %v6744_v15  ;;  %5641 = vmatprep.subr.bf16.mxu0 %v6745_v16  ;;  %v629_v54 = vrot.slane %v627_v49, 1  ;;  %v639_v61 = vshll.u32 %v7336_v45, 16  ;;  %v644_v0 = vshll.u32 %v5361_v57, 16  ;;  %v6771_v5 = vld [vmem:[%s9331_s1 + $0x108] sm:$0xff]   ;;  %v5362_v8 = vcombine.low %v424_v1, %v424_v1  ;;  %v6777_v15 = vld [vmem:[%s9331_s1 + $0x110] sm:$0xff]   ;;  %v6789_v33 = vld [vmem:[%s9331_s1 + $0x120] sm:$0xff]   ;;  %p7034_p7 = pnand %p7033_p4, %p7027_p12 }
  0x47   : > { %5753 = vmatprep.subr.bf16.mxu1 %v6746_v17  ;;  %v623_v58 = vsel %vm611_vm0, %v618_v50, %v622_v43  ;;  %v634_v59 = vrot.slane %v632_v51, 1  ;;  %v7361_v4 = vsel %vm820_vm1, %v824_v55, %v825_v56  ;;  %v651_v9 = vshll.u32 %v7343_v52, 16  ;;  %v6794_v38 = vld [vmem:[%s9331_s1 + $0x168] sm:$0xff]   ;;  %v433_v41 = vld [vmem:[%s7320_s8 + $0x50] sm:$0x1]  ;;  %v7433_v43 = vld [vmem:[%s7320_s8 + $0x54] sm:$0xff]  }
  0x48   : > { %1545 = vmatprep.mubr.bf16.mxu0 %v623_v58  ;;  %v630_v63 = vor.u32 %v629_v54, %v625_v48  ;;  %v641_v2 = vrot.slane %v639_v61, 1  ;;  %v646_v7 = vrot.slane %v644_v0, 1  ;;  %v827_v12 = vrot.slane %v7336_v45, 1  ;;  %v436_v44 = vld [vmem:[%s7320_s8 + $0x5c] sm:$0x1]  ;;  %v6795_v46 = vld [vmem:[%s9331_s1 + $0x128] sm:$0xff]   ;;  %vm8215_vm9 = vmand %vm2847_vm7, %vm357_vm5 }
  0x49   : > { %5642 = vmatpush3.bf16.msra.mxu0 %v6747_v18  ;;  %v828_v13 = vrot.slane %v5361_v57, 1  ;;  %v649_v14 = vshrl.u32 %v7343_v52, 16  ;;  %v653_v17 = vrot.slane %v651_v9, 1  ;;  %v656_v18 = vshll.u32 %v5362_v8, 16  ;;  %v6800_v49 = vld [vmem:[%s9331_s1 + $0x170] sm:$0xff]   ;;  %v7446_v54 = vld [vmem:[%s7320_s8 + $0x60] sm:$0xff]   ;;  %vm8222_vm10 = vmor %vm301_vm3, %vm2524_vm8 }
  0x4a   : > { %5754 = vmatpush3.bf16.msra.mxu1 %v6748_v19  ;;  %5643 = vmatprep.subr.bf16.mxu0 %v6749_v20  ;;  %v7358_v3 = vsel %vm611_vm0, %v630_v63, %v634_v59  ;;  %v642_v6 = vor.u32 %v641_v2, %v637_v60  ;;  %v6782_v19 = vld [vmem:[%s9331_s1 + $0x158] sm:$0xff]   ;;  %v833_v50 = vrot.slane %v7372_v11, 1  ;;  %v7449_v56 = vcombine.low %v433_v41, %v433_v41  ;;  %v6802_v57 = vld [vmem:[%s9331_s1 + $0x1c0] sm:$0xff]   ;;  %v6801_v60 = vld [vmem:[%s9331_s1 + $0x130] sm:$0xff]  }
  0x4b   : > { %5755 = vmatprep.subr.bf16.mxu1 %v6750_v21  ;;  %v427_v20 = vld [vmem:[%s7320_s8 + $0x38] sm:$0x1]  ;;  %v7390_v21 = vld [vmem:[%s7320_s8 + $0x3c] sm:$0xff]   ;;  %v7466_v63 = vcombine.low %v436_v44, %v436_v44  ;;  %v439_v0 = vld [vmem:[%s7320_s8 + $0x68] sm:$0x1] }
  0x4c   : > { %v7382_v16 = vsel %vm611_vm0, %v642_v6, %v646_v7  ;;  %v675_v40 = vshll.u32 %v7390_v21, 16  ;;  %v673_v51 = vshrl.u32 %v7390_v21, 16  ;;  %v6803_v61 = vld [vmem:[%s9331_s1 + $0x180] sm:$0xff]   ;;  %v6804_v1 = vld [vmem:[%s9331_s1 + $0x1c8] sm:$0xff]   ;;  %v836_v2 = vrot.slane %v7390_v21, 1 }
  0x4d   : > { %5644 = vmatpush3.bf16.msra.mxu0 %v6751_v22  ;;  %v7394_v22 = vsel %vm820_vm1, %v827_v12, %v828_v13  ;;  %v7475_v6 = vld [vmem:[%s7320_s8 + $0x6c] sm:$0xff]   ;;  %v442_v7 = vld [vmem:[%s7320_s8 + $0x74] sm:$0x1]  ;;  %v692_v12 = vshll.u32 %v7449_v56, 16 }
  0x4e   : > { %5756 = vmatpush3.bf16.msra.mxu1 %v6752_v23  ;;  %5645 = vmatprep.subr.bf16.mxu0 %v6753_v24  ;;  %v6783_v23 = vld [vmem:[%s9331_s1 + $0x118] sm:$0xff]   ;;  %v654_v24 = vor.u32 %v653_v17, %v649_v14  ;;  %v677_v55 = vrot.slane %v675_v40, 1  ;;  %v6807_v13 = vld [vmem:[%s9331_s1 + $0x188] sm:$0xff]  }
  0x4f   : > { %5757 = vmatprep.subr.bf16.mxu1 %v6754_v25  ;;  %v658_v25 = vrot.slane %v656_v18, 1  ;;  %v7489_v18 = vcombine.low %v439_v0, %v439_v0 }
  0x51   : > { %5646 = vmatpush3.bf16.msra.mxu0 %v6755_v26  ;;  %v7399_v26 = vcombine.low %v427_v20, %v427_v20  ;;  %v840_v20 = vrot.slane %v7449_v56, 1  ;;  %v716_v40 = vshll.u32 %v7489_v18, 16  ;;  %v846_v0 = vrot.slane %v7489_v18, 1 }
  0x52   : > { %5758 = vmatpush3.bf16.msra.mxu1 %v6756_v27  ;;  %5647 = vmatprep.subr.bf16.mxu0 %v6757_v28  ;;  %v663_v27 = vshll.u32 %v7372_v11, 16  ;;  %v6788_v28 = vld [vmem:[%s9331_s1 + $0x160] sm:$0xff]  }
  0x53   : > { %5759 = vmatprep.subr.bf16.mxu1 %v6758_v29  ;;  %v830_v29 = vrot.slane %v7343_v52, 1  ;;  %v668_v37 = vshll.u32 %v7399_v26, 16  ;;  %v834_v58 = vrot.slane %v7399_v26, 1  ;;  %v6808_v26 = vld [vmem:[%s9331_s1 + $0x1d0] sm:$0xff]  }
  0x54   : > { %v665_v36 = vrot.slane %v663_v27, 1  ;;  %v711_v27 = vshll.u32 %v7446_v54, 16 }
  0x55   : > { %5648 = vmatpush3.bf16.msra.mxu0 %v6759_v30  ;;  %v430_v30 = vld [vmem:[%s7320_s8 + $0x44] sm:$0x1]  ;;  %v670_v48 = vrot.slane %v668_v37, 1  ;;  %v7486_v14 = vsel %vm820_vm1, %v833_v50, %v834_v58  ;;  %v697_v37 = vshrl.u32 %v7433_v43, 16  ;;  %v845_v50 = vrot.slane %v7446_v54, 1 }
  0x56   : > { %5760 = vmatpush3.bf16.msra.mxu1 %v6760_v31  ;;  %5857 = vmatprep.subr.bf16.mxu0 %v6764_v35  ;;  %v7409_v31 = vld [vmem:[%s7320_s8 + $0x48] sm:$0xff]   ;;  %v661_v35 = vshrl.u32 %v7372_v11, 16  ;;  %v7423_v39 = vcombine.low %v430_v30, %v430_v30  ;;  %v694_v30 = vrot.slane %v692_v12, 1 }
  0x57   : > { %v687_v59 = vshll.u32 %v7409_v31, 16  ;;  %5969 = vmatprep.subr.bf16.mxu1 %v6802_v57  ;;  %v839_v17 = vrot.slane %v7409_v31, 1 }
  0x58   : > { %1546 = vmatmul.mubr.bf16.vlgmr.msra.gmra.mrb[0].mxu0 %v6761_v32  ;;  %v831_v32 = vrot.slane %v5362_v8, 1  ;;  %v678_v8 = vor.u32 %v677_v55, %v673_v51  ;;  %v6814_v55 = vld [vmem:[%s9331_s1 + $0x178] sm:$0xff]  }
  0x59   : > { %1707 = vmatmul.mubr.bf16.vlgmr.msra.gmra.mrb[0].mxu1 %v823_v47  ;;  %5858 = vmatpush3.bf16.msra.mxu0 %v6765_v53  ;;  %v666_v47 = vor.u32 %v665_v36, %v661_v35  ;;  %v680_v53 = vshll.u32 %v7423_v39, 16  ;;  %v448_v35 = vld [vmem:[%s7320_s8 + $0x8c] sm:$0x1]  ;;  %v6810_v36 = vld [vmem:[%s9331_s1 + $0x1d8] sm:$0xff]  }
  0x5a   : > { %1714 = vmatprep.mubr.bf16.mxu1 %v7336_v45  ;;  %1553 = vmatprep.mubr.bf16.mxu0 %v7358_v3  ;;  %v7430_v42 = vsel %vm820_vm1, %v830_v29, %v831_v32  ;;  %v7509_v32 = vcombine.low %v442_v7, %v442_v7  ;;  %v7560_v7 = vld [vmem:[%s7320_s8 + $0x9c] sm:$0xff]  }
  0x5b   : > { %5859 = vmatprep.subr.bf16.mxu0 %v6770_v62  ;;  %v7464_v62 = vsel %vm611_vm0, %v666_v47, %v670_v48  ;;  %5970 = vmatpush3.bf16.msra.mxu1 %v6803_v61  ;;  %v682_v9 = vrot.slane %v680_v53, 1  ;;  %v7529_v47 = vld [vmem:[%s7320_s8 + $0x90] sm:$0xff]   ;;  %v451_v48 = vld [vmem:[%s7320_s8 + $0x98] sm:$0x1]  ;;  %v7550_v61 = vrot.slane %v716_v40, 1  ;;  %v7590_v40 = vld [vmem:[%s7320_s8 + $0xa8] sm:$0xff]  }
  0x5c   : > { %5971 = vmatprep.subr.bf16.mxu1 %v6804_v1  ;;  %v6813_v53 = vld [vmem:[%s9331_s1 + $0x198] sm:$0xff]   ;;  %v7553_v1 = vcombine.low %v448_v35, %v448_v35 }
  0x5d   : > { %5860 = vmatpush3.bf16.msra.mxu0 %v6771_v5  ;;  %v837_v5 = vrot.slane %v7423_v39, 1  ;;  %v7507_v29 = vsel %vm611_vm0, %v678_v8, %v682_v9  ;;  %v843_v39 = vrot.slane %v7466_v63, 1  ;;  %v6816_v8 = vld [vmem:[%s9331_s1 + $0x1e0] sm:$0xff]   ;;  %v721_v9 = vshrl.u32 %v7475_v6, 16 }
  0x5e   : > { %5861 = vmatprep.subr.bf16.mxu0 %v6776_v10  ;;  %v685_v10 = vshrl.u32 %v7409_v31, 16 }
  0x5f   : > { %5972 = vmatpush3.bf16.msra.mxu1 %v6807_v13  ;;  %v7545_v57 = vsel %vm820_vm1, %v836_v2, %v837_v5  ;;  %v6815_v2 = vld [vmem:[%s9331_s1 + $0x138] sm:$0xff]   ;;  %v7568_v13 = vcombine.low %v451_v48, %v451_v48 }
  0x60   : > { %1554 = vmatmul.mubr.bf16.gmra.mrb[4].mxu0 %v7328_v34  ;;  %v7416_v34 = vsel %vm611_vm0, %v654_v24, %v658_v25  ;;  %v704_v24 = vshll.u32 %v7466_v63, 16  ;;  %v445_v25 = vld [vmem:[%s7320_s8 + $0x80] sm:$0x1]  ;;  %5973 = vmatprep.subr.bf16.mxu1 %v6808_v26 }
  0x61   : > { %1715 = vmatmul.mubr.bf16.gmra.mrb[4].mxu1 %v7361_v4  ;;  %1561 = vmatprep.mubr.bf16.mxu0 %v7382_v16  ;;  %v7535_v51 = vcombine.low %v445_v25, %v445_v25  ;;  %v858_v56 = vrot.slane %v7568_v13, 1 }
  0x62   : > { %1722 = vmatprep.mubr.bf16.mxu1 %v7343_v52  ;;  %5862 = vmatpush3.bf16.msra.mxu0 %v6777_v15  ;;  %v689_v15 = vrot.slane %v687_v59, 1  ;;  %v7525_v44 = vrot.slane %v704_v24, 1  ;;  %v723_v59 = vshll.u32 %v7475_v6, 16 }
  0x63   : > { %5863 = vmatprep.subr.bf16.mxu0 %v6782_v19  ;;  %v7492_v19 = vld [vmem:[%s7320_s8 + $0x78] sm:$0xff]   ;;  %v740_v12 = vshll.u32 %v7535_v51, 16 }
  0x64   : > { %v690_v58 = vor.u32 %v689_v15, %v685_v10  ;;  %v735_v5 = vshll.u32 %v7492_v19, 16  ;;  %v454_v15 = vld [vmem:[%s7320_s8 + $0xa4] sm:$0x1]  ;;  %v7575_v24 = vrot.slane %v723_v59, 1  ;;  %v759_v59 = vshll.u32 %v7529_v47, 16 }
  0x65   : > { %v7608_v48 = vcombine.low %v454_v15, %v454_v15 }
  0x66   : > { %5864 = vmatpush3.bf16.msra.mxu0 %v6783_v23  ;;  %v699_v23 = vshll.u32 %v7433_v43, 16 }
  0x67   : > { %5865 = vmatprep.subr.bf16.mxu0 %v6788_v28  ;;  %v6809_v28 = vld [vmem:[%s9331_s1 + $0x190] sm:$0xff]   ;;  %v861_v10 = vrot.slane %v7608_v48, 1 }
  0x68   : > { %1562 = vmatmul.mubr.bf16.gmra.mrb[8].mxu0 %v7336_v45  ;;  %v7523_v41 = vrot.slane %v699_v23, 1  ;;  %5974 = vmatpush3.bf16.msra.mxu1 %v6809_v28  ;;  %v6817_v23 = vld [vmem:[%s9331_s1 + $0x1a0] sm:$0xff]   ;;  %v7584_v28 = vsel %vm611_vm0, %v690_v58, %v694_v30  ;;  %v764_v58 = vshll.u32 %v7568_v13, 16  ;;  %v7628_v30 = vrot.slane %v759_v59, 1 }
  0x69   : > { %1723 = vmatmul.mubr.bf16.gmra.mrb[8].mxu1 %v7394_v22  ;;  %1569 = vmatprep.mubr.bf16.mxu0 %v7416_v34 }
  0x6a   : > { %1730 = vmatprep.mubr.bf16.mxu1 %v7372_v11  ;;  %5866 = vmatpush3.bf16.msra.mxu0 %v6789_v33  ;;  %v7512_v33 = vld [vmem:[%s7320_s8 + $0x84] sm:$0xff]   ;;  %v702_v15 = vor.u32 %v7523_v41, %v697_v37  ;;  %v7631_v26 = vrot.slane %v764_v58, 1  ;;  %v776_v37 = vshll.u32 %v7608_v48, 16  ;;  %v6824_v41 = vld [vmem:[%s9331_s1 + $0x1f8] sm:$0xff]  }
  0x6b   : > { %5867 = vmatprep.subr.bf16.mxu0 %v6794_v38  ;;  %v842_v38 = vrot.slane %v7433_v43, 1  ;;  %5975 = vmatprep.subr.bf16.mxu1 %v6810_v36  ;;  %v747_v35 = vshll.u32 %v7512_v33, 16  ;;  %v752_v36 = vshll.u32 %v7553_v1, 16 }
  0x6c   : > { %5976 = vmatpush3.bf16.msra.mxu1 %v6813_v53  ;;  %v7593_v53 = vrot.slane %v735_v5, 1  ;;  %v7620_v5 = vsel %vm820_vm1, %v839_v17, %v840_v20  ;;  %v771_v17 = vshll.u32 %v7560_v7, 16  ;;  %v6823_v20 = vld [vmem:[%s9331_s1 + $0x1b0] sm:$0xff]   ;;  %v7650_v58 = vsel %vm611_vm0, %v702_v15, %v7525_v44 }
  0x6d   : > { %5977 = vmatprep.subr.bf16.mxu1 %v6816_v8  ;;  %v749_v8 = vrot.slane %v747_v35, 1  ;;  %v7660_v35 = vld [vmem:[%s9331_s1 + $0x200] sm:$0xff]   ;;  %v7669_v44 = vsel %vm820_vm1, %v842_v38, %v843_v39  ;;  %v781_v15 = vshrl.u32 %v7590_v40, 16  ;;  %v7691_v38 = vsel %vm820_vm1, %v845_v50, %v846_v0 }
  0x6e   : > { %5868 = vmatpush3.bf16.msra.mxu0 %v6795_v46  ;;  %v709_v46 = vshrl.u32 %v7446_v54, 16  ;;  %v726_v39 = vor.u32 %v7575_v24, %v721_v9  ;;  %v9348_v50 = vrot.slane %v7509_v32, 1  ;;  %v9350_v9 = vshrl.u32 %v7492_v19, 16 }
  0x6f   : > { %5869 = vmatprep.subr.bf16.mxu0 %v6800_v49  ;;  %v7532_v49 = vrot.slane %v711_v27, 1  ;;  %v6818_v27 = vld [vmem:[%s9331_s1 + $0x1e8] sm:$0xff]  }
  0x70   : > { %1570 = vmatmul.mubr.bf16.gmra.mrb[12].mxu0 %v7343_v52  ;;  %5978 = vmatpush3.bf16.msra.mxu1 %v6817_v23  ;;  %v6822_v23 = vld [vmem:[%s9331_s1 + $0x1f0] sm:$0xff]   ;;  %v738_v24 = vor.u32 %v7593_v53, %v9350_v9  ;;  %v460_v9 = vld [vmem:[%s7320_s8 + $0xbc] sm:$0x1] }
  0x71   : > { %1731 = vmatmul.mubr.bf16.gmra.mrb[12].mxu1 %v7430_v42  ;;  %1577 = vmatprep.mubr.bf16.mxu0 %v7464_v62 }
  0x72   : > { %1738 = vmatprep.mubr.bf16.mxu1 %v7390_v21  ;;  %5870 = vmatpush3.bf16.msra.mxu0 %v6801_v60  ;;  %v728_v60 = vshll.u32 %v7509_v32, 16  ;;  %v9351_v32 = vrot.slane %v7535_v51, 1 }
  0x73   : > { %5871 = vmatprep.subr.bf16.mxu0 %v6814_v55  ;;  %5979 = vmatprep.subr.bf16.mxu1 %v6818_v27  ;;  %v7625_v55 = vrot.slane %v752_v36, 1  ;;  %v757_v27 = vshrl.u32 %v7529_v47, 16  ;;  %v778_v36 = vrot.slane %v776_v37, 1 }
  0x74   : > { %v7577_v25 = vrot.slane %v728_v60, 1  ;;  %v7597_v60 = vrot.slane %v740_v12, 1  ;;  %v457_v12 = vld [vmem:[%s7320_s8 + $0xb0] sm:$0x1] }
  0x75   : > { %v7646_v59 = vcombine.low %v457_v12, %v457_v12  ;;  %v773_v12 = vrot.slane %v771_v17, 1  ;;  %v714_v17 = vor.u32 %v7532_v49, %v709_v46 }
  0x76   : > { %5872 = vmatpush3.bf16.msra.mxu0 %v6815_v2  ;;  %v6821_v2 = vld [vmem:[%s9331_s1 + $0x1a8] sm:$0xff]   ;;  %v7700_v46 = vsel %vm611_vm0, %v726_v39, %v7577_v25  ;;  %v7719_v25 = vsel %vm611_vm0, %v738_v24, %v7597_v60  ;;  %v9354_v39 = vrot.slane %v7553_v1, 1  ;;  %v9356_v1 = vrot.slane %v7529_v47, 1 }
  0x77   : > { %5980 = vmatpush3.bf16.msra.mxu1 %v6821_v2  ;;  %v783_v2 = vshll.u32 %v7590_v40, 16  ;;  %6577 = vmatprep.subr.bf16.mxu0 %v7660_v35  ;;  %v7682_v63 = vsel %vm611_vm0, %v714_v17, %v7550_v61  ;;  %v864_v49 = vrot.slane %v7646_v59, 1  ;;  %v9349_v61 = vrot.slane %v7475_v6, 1 }
  0x78   : > { %1578 = vmatmul.mubr.bf16.gmra.mrb[16].mxu0 %v7372_v11  ;;  %5981 = vmatprep.subr.bf16.mxu1 %v6822_v23  ;;  %v6825_v23 = vld [vmem:[%s9331_s1 + $0x1b8] sm:$0xff]  }
  0x79   : > { %1739 = vmatmul.mubr.bf16.gmra.mrb[16].mxu1 %v7486_v14  ;;  %1585 = vmatprep.mubr.bf16.mxu0 %v7507_v29  ;;  %v785_v37 = vrot.slane %v783_v2, 1  ;;  %v7710_v0 = vsel %vm820_vm1, %v9349_v61, %v9348_v50  ;;  %v9352_v2 = vrot.slane %v7492_v19, 1 }
  0x7a   : > { %1746 = vmatprep.mubr.bf16.mxu1 %v7409_v31 }
  0x7b   : > { %5982 = vmatpush3.bf16.msra.mxu1 %v6823_v20  ;;  %v788_v20 = vshll.u32 %v7646_v59, 16  ;;  %v7722_v59 = vld [vmem:[%s7320_s8 + $0xb4] sm:$0xff]   ;;  %v7731_v53 = vsel %vm820_vm1, %v9352_v2, %v9351_v32 }
  0x7c   : > { %5983 = vmatprep.subr.bf16.mxu1 %v6824_v41  ;;  %v863_v41 = vrot.slane %v7590_v40, 1  ;;  %v793_v51 = vshrl.u32 %v7722_v59, 16  ;;  %v795_v17 = vshll.u32 %v7722_v59, 16 }
  0x7d   : > { %v790_v18 = vrot.slane %v788_v20, 1 }
  0x7e   : > { %v797_v2 = vrot.slane %v795_v17, 1  ;;  %v7798_v48 = vsel %vm820_vm1, %v863_v41, %v864_v49  ;;  %v6827_v41 = vld [vmem:[%s9331_s1 + $0x208] sm:$0xff]   ;;  %v6828_v49 = vld [vmem:[%s9331_s1 + $0x210] sm:$0xff]  }
  0x7f   : > { %5984 = vmatpush3.bf16.msra.mxu1 %v6825_v23  ;;  %v9353_v23 = vshrl.u32 %v7512_v33, 16 }
  0x80   : > { %1586 = vmatmul.mubr.bf16.gmra.mrb[20].mxu0 %v7390_v21  ;;  %v798_v17 = vor.u32 %v797_v2, %v793_v51 }
  0x81   : > { %1747 = vmatmul.mubr.bf16.gmra.mrb[20].mxu1 %v7545_v57  ;;  %1593 = vmatprep.mubr.bf16.mxu0 %v7584_v28  ;;  %v750_v20 = vor.u32 %v749_v8, %v9353_v23  ;;  %v9355_v8 = vrot.slane %v7512_v33, 1  ;;  %v786_v23 = vor.u32 %v785_v37, %v781_v15  ;;  %v866_v15 = vrot.slane %v7722_v59, 1 }
  0x82   : > { %1754 = vmatprep.mubr.bf16.mxu1 %v7433_v43 }
  0x83   : > { %v7739_v60 = vsel %vm611_vm0, %v750_v20, %v7625_v55  ;;  %v7750_v50 = vsel %vm820_vm1, %v9355_v8, %v9354_v39  ;;  %v762_v55 = vor.u32 %v7628_v30, %v757_v27  ;;  %v7769_v30 = vsel %vm820_vm1, %v9356_v1, %v858_v56  ;;  %v7789_v20 = vld [vmem:[%s7320_s8 + $0xc0] sm:$0xff]  }
  0x84   : > { %v9357_v27 = vshrl.u32 %v7560_v7, 16  ;;  %v9358_v56 = vrot.slane %v7560_v7, 1 }
  0x85   : > { %v7759_v61 = vsel %vm611_vm0, %v762_v55, %v7631_v26  ;;  %v5374_v26 = vcombine.low %v460_v9, %v460_v9  ;;  %v895_v55 = vshrl.u32 %v7789_v20, 16 }
  0x86   : > { %v774_v24 = vor.u32 %v773_v12, %v9357_v27  ;;  %v7785_v12 = vsel %vm820_vm1, %v9358_v56, %v861_v10  ;;  %v7896_v27 = vld [vmem:[%s7320_s8 + $0xcc] sm:$0xff]  }
  0x87   : > { %v800_v13 = vshll.u32 %v5374_v26, 16  ;;  %v867_v37 = vrot.slane %v5374_v26, 1 }
  0x88   : > { %1594 = vmatmul.mubr.bf16.gmra.mrb[24].mxu0 %v7409_v31  ;;  %v7776_v32 = vsel %vm611_vm0, %v774_v24, %v778_v36  ;;  %v7793_v36 = vsel %vm611_vm0, %v786_v23, %v790_v18 }
  0x89   : > { %1755 = vmatmul.mubr.bf16.gmra.mrb[24].mxu1 %v7620_v5  ;;  %1601 = vmatprep.mubr.bf16.mxu0 %v7650_v58  ;;  %v802_v10 = vrot.slane %v800_v13, 1  ;;  %v7809_v18 = vsel %vm820_vm1, %v866_v15, %v867_v37  ;;  %v923_v15 = vshll.u32 %v7896_v27, 16 }
  0x8a   : > { %1762 = vmatprep.mubr.bf16.mxu1 %v7446_v54 }
  0x8b   : > { %v7804_v39 = vsel %vm611_vm0, %v798_v17, %v802_v10  ;;  %v7901_v10 = vld [vmem:[%s7320_s8 + $0xd4] ss:$0 sps:$4 sm:$0x11]  }
  0x90   : > { %1602 = vmatmul.mubr.bf16.gmra.mrb[28].mxu0 %v7433_v43 }
  0x91   : > { %1763 = vmatmul.mubr.bf16.gmra.mrb[28].mxu1 %v7669_v44  ;;  %1609 = vmatprep.mubr.bf16.mxu0 %v7682_v63 }
  0x92   : > { %1770 = vmatprep.mubr.bf16.mxu1 %v7475_v6 }
  0x98   : > { %1610 = vmatmul.mubr.bf16.gmra.mrb[32].mxu0 %v7446_v54 }
  0x99   : > { %1771 = vmatmul.mubr.bf16.gmra.mrb[32].mxu1 %v7691_v38  ;;  %1617 = vmatprep.mubr.bf16.mxu0 %v7700_v46 }
  0x9a   : > { %1778 = vmatprep.mubr.bf16.mxu1 %v7492_v19 }
  0xa0   : > { %1618 = vmatmul.mubr.bf16.gmra.mrb[36].mxu0 %v7475_v6 }
  0xa1   : > { %1779 = vmatmul.mubr.bf16.gmra.mrb[36].mxu1 %v7710_v0  ;;  %1625 = vmatprep.mubr.bf16.mxu0 %v7719_v25 }
  0xa2   : > { %1786 = vmatprep.mubr.bf16.mxu1 %v7512_v33 }
  0xa8   : > { %1626 = vmatmul.mubr.bf16.gmra.mrb[40].mxu0 %v7492_v19 }
  0xa9   : > { %1787 = vmatmul.mubr.bf16.gmra.mrb[40].mxu1 %v7731_v53  ;;  %1633 = vmatprep.mubr.bf16.mxu0 %v7739_v60 }
  0xaa   : > { %1794 = vmatprep.mubr.bf16.mxu1 %v7529_v47 }
  0xb0   : > { %1634 = vmatmul.mubr.bf16.gmra.mrb[44].mxu0 %v7512_v33 }
  0xb1   : > { %1795 = vmatmul.mubr.bf16.gmra.mrb[44].mxu1 %v7750_v50  ;;  %1641 = vmatprep.mubr.bf16.mxu0 %v7759_v61 }
  0xb2   : > { %1802 = vmatprep.mubr.bf16.mxu1 %v7560_v7 }
  0xb8   : > { %1642 = vmatmul.mubr.bf16.gmra.mrb[48].mxu0 %v7529_v47 }
  0xb9   : > { %1803 = vmatmul.mubr.bf16.gmra.mrb[48].mxu1 %v7769_v30  ;;  %1649 = vmatprep.mubr.bf16.mxu0 %v7776_v32 }
  0xba   : > { %1810 = vmatprep.mubr.bf16.mxu1 %v7590_v40 }
  0xc0   : > { %1650 = vmatmul.mubr.bf16.gmra.mrb[52].mxu0 %v7560_v7 }
  0xc1   : > { %1811 = vmatmul.mubr.bf16.gmra.mrb[52].mxu1 %v7785_v12  ;;  %1657 = vmatprep.mubr.bf16.mxu0 %v7793_v36 }
  0xc2   : > { %1818 = vmatprep.mubr.bf16.mxu1 %v7722_v59 }
  0xc8   : > { %1658 = vmatmul.mubr.bf16.gmra.mrb[56].mxu0 %v7590_v40 }
  0xc9   : > { %1819 = vmatmul.mubr.bf16.gmra.mrb[56].mxu1 %v7798_v48  ;;  %1665 = vmatprep.mubr.bf16.mxu0 %v7804_v39 }
  0xca   : > { %1826 = vmatprep.mubr.bf16.mxu1 %v7789_v20 }
  0xd0   : > { %1666 = vmatmul.mubr.bf16.gmra.mrb[60].mxu0 %v7722_v59 }
  0xd1   : > { %1827 = vmatmul.mubr.bf16.gmra.mrb[60].mxu1 %v7809_v18  ;;  %1867 = vmatprep.mubr.bf16.mxu0 %v7361_v4  ;;  %v6832_v4 = vld [vmem:[%s9331_s1 + $0x230] sm:$0xff]  }
  0xd2   : > { %2028 = vmatprep.mubr.bf16.mxu1 %v7382_v16 }
  0xd8   : > { %1868 = vmatmul.mubr.bf16.vlgmr.msra.gmra.mrb[64].mxu0 %v7358_v3  ;;  %v6830_v3 = vld [vmem:[%s9331_s1 + $0x220] sm:$0xff]  }
  0xd9   : > { %2029 = vmatmul.mubr.bf16.vlgmr.msra.gmra.mrb[64].mxu1 %v7336_v45  ;;  %6578 = vmatpush3.bf16.msra.mxu0 %v7660_v35  ;;  %v6829_v45 = vld [vmem:[%s9331_s1 + $0x218] sm:$0xff]   ;;  %v897_v35 = vshll.u32 %v7789_v20, 16 }
  0xda   : > { %2036 = vmatprep.mubr.bf16.mxu1 %v7416_v34  ;;  %1875 = vmatprep.mubr.bf16.mxu0 %v7394_v22 }
  0xdb   : > { %6579 = vmatprep.subr.bf16.mxu0 %v6827_v41  ;;  %v899_v9 = vrot.slane %v897_v35, 1 }
  0xdd   : > { %6580 = vmatpush3.bf16.msra.mxu0 %v6827_v41  ;;  %v900_v23 = vor.u32 %v899_v9, %v895_v55 }
  0xde   : > { %6581 = vmatprep.subr.bf16.mxu0 %v6828_v49 }
  0xe0   : > { %1876 = vmatmul.mubr.bf16.gmra.mrb[68].mxu0 %v7382_v16 }
  0xe1   : > { %2037 = vmatmul.mubr.bf16.gmra.mrb[68].mxu1 %v7343_v52  ;;  %1883 = vmatprep.mubr.bf16.mxu0 %v7430_v42  ;;  %v6831_v52 = vld [vmem:[%s9331_s1 + $0x228] sm:$0xff]  }
  0xe2   : > { %2044 = vmatprep.mubr.bf16.mxu1 %v7464_v62  ;;  %6582 = vmatpush3.bf16.msra.mxu0 %v6828_v49 }
  0xe3   : > { %6583 = vmatprep.subr.bf16.mxu0 %v6829_v45 }
  0xe6   : > { %6584 = vmatpush3.bf16.msra.mxu0 %v6829_v45 }
  0xe7   : > { %6585 = vmatprep.subr.bf16.mxu0 %v6830_v3 }
  0xe8   : > { %1884 = vmatmul.mubr.bf16.gmra.mrb[72].mxu0 %v7416_v34 }
  0xe9   : > { %2045 = vmatmul.mubr.bf16.gmra.mrb[72].mxu1 %v7372_v11  ;;  %1891 = vmatprep.mubr.bf16.mxu0 %v7486_v14  ;;  %v6833_v11 = vld [vmem:[%s9331_s1 + $0x238] sm:$0xff]  }
  0xea   : > { %2052 = vmatprep.mubr.bf16.mxu1 %v7507_v29  ;;  %6586 = vmatpush3.bf16.msra.mxu0 %v6830_v3 }
  0xeb   : > { %6587 = vmatprep.subr.bf16.mxu0 %v6831_v52 }
  0xee   : > { %6588 = vmatpush3.bf16.msra.mxu0 %v6831_v52 }
  0xef   : > { %6589 = vmatprep.subr.bf16.mxu0 %v6832_v4 }
  0xf0   : > { %1892 = vmatmul.mubr.bf16.gmra.mrb[76].mxu0 %v7464_v62 }
  0xf1   : > { %2053 = vmatmul.mubr.bf16.gmra.mrb[76].mxu1 %v7390_v21  ;;  %1899 = vmatprep.mubr.bf16.mxu0 %v7545_v57 }
  0xf2   : > { %2060 = vmatprep.mubr.bf16.mxu1 %v7584_v28  ;;  %6590 = vmatpush3.bf16.msra.mxu0 %v6832_v4 }
  0xf3   : > { %6591 = vmatprep.subr.bf16.mxu0 %v6833_v11 }
  0xf6   : > { %6592 = vmatpush3.bf16.msra.mxu0 %v6833_v11 }
  0xf8   : > { %1900 = vmatmul.mubr.bf16.gmra.mrb[80].mxu0 %v7507_v29 }
  0xf9   : > { %2061 = vmatmul.mubr.bf16.gmra.mrb[80].mxu1 %v7409_v31  ;;  %1907 = vmatprep.mubr.bf16.mxu0 %v7620_v5 }
  0xfa   : > { %2068 = vmatprep.mubr.bf16.mxu1 %v7650_v58 }
 0x100   : > { %1908 = vmatmul.mubr.bf16.gmra.mrb[84].mxu0 %v7584_v28 }
 0x101   : > { %2069 = vmatmul.mubr.bf16.gmra.mrb[84].mxu1 %v7433_v43  ;;  %1915 = vmatprep.mubr.bf16.mxu0 %v7669_v44 }
 0x102   : > { %2076 = vmatprep.mubr.bf16.mxu1 %v7682_v63 }
 0x108   : > { %1916 = vmatmul.mubr.bf16.gmra.mrb[88].mxu0 %v7650_v58 }
 0x109   : > { %2077 = vmatmul.mubr.bf16.gmra.mrb[88].mxu1 %v7446_v54  ;;  %1923 = vmatprep.mubr.bf16.mxu0 %v7691_v38 }
 0x10a   : > { %2084 = vmatprep.mubr.bf16.mxu1 %v7700_v46 }
 0x110   : > { %1924 = vmatmul.mubr.bf16.gmra.mrb[92].mxu0 %v7682_v63 }
 0x111   : > { %2085 = vmatmul.mubr.bf16.gmra.mrb[92].mxu1 %v7475_v6  ;;  %1931 = vmatprep.mubr.bf16.mxu0 %v7710_v0  ;;  %v463_v6 = vld [vmem:[%s7320_s8 + $0xc8] sm:$0x1] }
 0x112   : > { %2092 = vmatprep.mubr.bf16.mxu1 %v7719_v25  ;;  %v7884_v28 = vcombine.low %v463_v6, %v463_v6 }
 0x114   : > { %v902_v1 = vshll.u32 %v7884_v28, 16 }
 0x116   : > { %v904_v17 = vrot.slane %v902_v1, 1 }
 0x118   : > { %1932 = vmatmul.mubr.bf16.gmra.mrb[96].mxu0 %v7700_v46  ;;  %v905_v11 = vsel %vm611_vm0, %v900_v23, %v904_v17 }
 0x119   : > { %2093 = vmatmul.mubr.bf16.gmra.mrb[96].mxu1 %v7492_v19  ;;  %1939 = vmatprep.mubr.bf16.mxu0 %v7731_v53 }
 0x11a   : > { %2100 = vmatprep.mubr.bf16.mxu1 %v7739_v60 }
 0x120   : > { %1940 = vmatmul.mubr.bf16.gmra.mrb[100].mxu0 %v7719_v25 }
 0x121   : > { %2101 = vmatmul.mubr.bf16.gmra.mrb[100].mxu1 %v7512_v33  ;;  %1947 = vmatprep.mubr.bf16.mxu0 %v7750_v50 }
 0x122   : > { %2108 = vmatprep.mubr.bf16.mxu1 %v7759_v61 }
 0x128   : > { %1948 = vmatmul.mubr.bf16.gmra.mrb[104].mxu0 %v7739_v60 }
 0x129   : > { %2109 = vmatmul.mubr.bf16.gmra.mrb[104].mxu1 %v7529_v47  ;;  %1955 = vmatprep.mubr.bf16.mxu0 %v7769_v30 }
 0x12a   : > { %2116 = vmatprep.mubr.bf16.mxu1 %v7776_v32 }
 0x12b   : > { %v5649_v54 = vpop.f32.mrb[0].mxu0 }
 0x12c   : > { %v5761_v16 = vpop.f32.mrb[0].mxu1  ;;  %v5650_v19 = vpop.f32.mrb[1].mxu0 }
 0x12d   : > { %v5762_v21 = vpop.f32.mrb[1].mxu1  ;;  %v5651_v29 = vadd.f32 %v5650_v19, %v5649_v54  ;;  %v5652_v33 = vpop.f32.mrb[2].mxu0 }
 0x12e   : > { %v5763_v31 = vadd.f32 %v5762_v21, %v5761_v16  ;;  %v5764_v34 = vpop.f32.mrb[2].mxu1  ;;  %v5653_v47 = vpop.f32.mrb[3].mxu0  ;;  %v921_v16 = vshrl.u32 %v7896_v27, 16  ;;  %v925_v21 = vrot.slane %v923_v15, 1 }
 0x12f   : > { %v5765_v43 = vpop.f32.mrb[3].mxu1  ;;  %v5654_v58 = vadd.f32 %v5653_v47, %v5652_v33 }
 0x130   : > { %v5766_v62 = vadd.f32 %v5765_v43, %v5764_v34  ;;  %v7887_v46 = vadd.f32 %v5763_v31, %v5651_v29  ;;  %1956 = vmatmul.mubr.bf16.gmra.mrb[108].mxu0 %v7759_v61  ;;  %v928_v31 = vshll.u32 %v7901_v10, 16  ;;  %v926_v19 = vor.u32 %v925_v21, %v921_v16 }
 0x131   : > { %2117 = vmatmul.mubr.bf16.gmra.mrb[108].mxu1 %v7560_v7  ;;  %1963 = vmatprep.mubr.bf16.mxu0 %v7785_v12 }
 0x132   : > { %2124 = vmatprep.mubr.bf16.mxu1 %v7793_v36  ;;  %v7891_v7 = vadd.f32 %v5766_v62, %v5654_v58  ;;  %v930_v29 = vrot.slane %v928_v31, 1 }
 0x133   : > { %v5655_v24 = vpop.f32.mrb[4].mxu0 }
 0x134   : > { %v5767_v63 = vpop.f32.mrb[4].mxu1  ;;  %v5656_v2 = vpop.f32.mrb[5].mxu0  ;;  %v931_v55 = vsel %vm611_vm0, %v926_v19, %v930_v29 }
 0x135   : > { %v5768_v25 = vpop.f32.mrb[5].mxu1  ;;  %v5657_v61 = vadd.f32 %v5656_v2, %v5655_v24  ;;  %v5658_v13 = vpop.f32.mrb[6].mxu0 }
 0x136   : > { %v5769_v60 = vadd.f32 %v5768_v25, %v5767_v63  ;;  %v5770_v51 = vpop.f32.mrb[6].mxu1  ;;  %v5659_v56 = vpop.f32.mrb[7].mxu0 }
 0x137   : > { %v5771_v8 = vpop.f32.mrb[7].mxu1  ;;  %v5660_v37 = vadd.f32 %v5659_v56, %v5658_v13 }
 0x138   : > { %v5772_v26 = vadd.f32 %v5771_v8, %v5770_v51  ;;  %v7904_v49 = vadd.f32 %v5769_v60, %v5657_v61  ;;  %1964 = vmatmul.mubr.bf16.gmra.mrb[112].mxu0 %v7776_v32  ;;  %v907_v51 = vrot.slane %v7789_v20, 1  ;;  %v908_v8 = vrot.slane %v7884_v28, 1 }
 0x139   : > { %2125 = vmatmul.mubr.bf16.gmra.mrb[112].mxu1 %v7590_v40  ;;  %1971 = vmatprep.mubr.bf16.mxu0 %v7798_v48 }
 0x13a   : > { %2132 = vmatprep.mubr.bf16.mxu1 %v7804_v39  ;;  %v7908_v52 = vadd.f32 %v5772_v26, %v5660_v37  ;;  %v7925_v61 = vsel %vm820_vm1, %v907_v51, %v908_v8 }
 0x13b   : > { %v5661_v34 = vpop.f32.mrb[8].mxu0 }
 0x13c   : > { %v5773_v41 = vpop.f32.mrb[8].mxu1  ;;  %v5662_v54 = vpop.f32.mrb[9].mxu0 }
 0x13d   : > { %v5774_v45 = vpop.f32.mrb[9].mxu1  ;;  %v5663_v32 = vadd.f32 %v5662_v54, %v5661_v34  ;;  %v5664_v62 = vpop.f32.mrb[10].mxu0 }
 0x13e   : > { %v5775_v3 = vadd.f32 %v5774_v45, %v5773_v41  ;;  %v5776_v40 = vpop.f32.mrb[10].mxu1  ;;  %v5665_v6 = vpop.f32.mrb[11].mxu0 }
 0x13f   : > { %v5777_v4 = vpop.f32.mrb[11].mxu1  ;;  %v5666_v33 = vadd.f32 %v5665_v6, %v5664_v62 }
 0x140   : > { %v5778_v43 = vadd.f32 %v5777_v4, %v5776_v40  ;;  %v7914_v35 = vadd.f32 %v5775_v3, %v5663_v32  ;;  %1972 = vmatmul.mubr.bf16.gmra.mrb[116].mxu0 %v7793_v36  ;;  %v6838_v40 = vld [vmem:[#allocation3] sm:$0xff]  }
 0x141   : > { %2133 = vmatmul.mubr.bf16.gmra.mrb[116].mxu1 %v7722_v59  ;;  %1979 = vmatprep.mubr.bf16.mxu0 %v7809_v18 }
 0x142   : > { %2140 = vmatprep.mubr.bf16.mxu1 %v905_v11  ;;  %v7918_v60 = vadd.f32 %v5778_v43, %v5666_v33 }
 0x143   : > { %v5667_v9 = vpop.f32.mrb[12].mxu0 }
 0x144   : > { %v5779_v47 = vpop.f32.mrb[12].mxu1  ;;  %v5668_v24 = vpop.f32.mrb[13].mxu0 }
 0x145   : > { %v5780_v58 = vpop.f32.mrb[13].mxu1  ;;  %v5669_v36 = vadd.f32 %v5668_v24, %v5667_v9  ;;  %v5670_v26 = vpop.f32.mrb[14].mxu0 }
 0x146   : > { %v5781_v63 = vadd.f32 %v5780_v58, %v5779_v47  ;;  %v5782_v25 = vpop.f32.mrb[14].mxu1  ;;  %v5671_v2 = vpop.f32.mrb[15].mxu0 }
 0x147   : > { %v5783_v59 = vpop.f32.mrb[15].mxu1  ;;  %v5672_v13 = vadd.f32 %v5671_v2, %v5670_v26  ;;  %v6840_v2 = vld [vmem:[#allocation3 + $0x8] sm:$0xff]  }
 0x148   : > { %v5784_v1 = vadd.f32 %v5783_v59, %v5782_v25  ;;  %v7927_v23 = vadd.f32 %v5781_v63, %v5669_v36  ;;  %1980 = vmatmul.mubr.bf16.gmra.mrb[120].mxu0 %v7804_v39 }
 0x149   : > { %2141 = vmatmul.mubr.bf16.gmra.mrb[120].mxu1 %v7789_v20  ;;  %1987 = vmatprep.mubr.bf16.mxu0 %v7925_v61  ;;  %v6837_v20 = vld [vmem:[#allocation3 + $0x40] sm:$0xff]  }
 0x14a   : > { %2148 = vmatprep.mubr.bf16.mxu1 %v931_v55  ;;  %v7931_v37 = vadd.f32 %v5784_v1, %v5672_v13  ;;  %6105 = vmatprep.subr.bf16.mxu1 %v6837_v20  ;;  %v6839_v1 = vld [vmem:[#allocation3 + $0x48] sm:$0xff]  }
 0x14b   : > { %v5673_v45 = vpop.f32.mrb[16].mxu0  ;;  %6106 = vmatpush3.bf16.msra.mxu1 %v6838_v40 }
 0x14c   : > { %v5785_v56 = vpop.f32.mrb[16].mxu1  ;;  %v5674_v4 = vpop.f32.mrb[17].mxu0  ;;  %6107 = vmatprep.subr.bf16.mxu1 %v6839_v1 }
 0x14d   : > { %v5786_v28 = vpop.f32.mrb[17].mxu1  ;;  %v5675_v16 = vadd.f32 %v5674_v4, %v5673_v45  ;;  %v5676_v21 = vpop.f32.mrb[18].mxu0 }
 0x14e   : > { %v5787_v17 = vadd.f32 %v5786_v28, %v5785_v56  ;;  %v5788_v15 = vpop.f32.mrb[18].mxu1  ;;  %v5677_v39 = vpop.f32.mrb[19].mxu0 }
 0x14f   : > { %v5789_v41 = vpop.f32.mrb[19].mxu1  ;;  %v5678_v31 = vadd.f32 %v5677_v39, %v5676_v21  ;;  %6108 = vmatpush3.bf16.msra.mxu1 %v6840_v2 }
 0x150   : > { %v5790_v3 = vadd.f32 %v5789_v41, %v5788_v15  ;;  %v7934_v43 = vadd.f32 %v5787_v17, %v5675_v16  ;;  %1988 = vmatmul.mubr.bf16.gmra.mrb[124].mxu0 %v905_v11 }
 0x151   : > { %2149 = vmatmul.mubr.bf16.gmra.mrb[124].mxu1 %v7896_v27  ;;  %6593 = vmatprep.mubr.bf16.mxu0 %v7394_v22 }
 0x152   : > { %v7937_v6 = vadd.f32 %v5790_v3, %v5678_v31 }
 0x153   : > { %v5679_v29 = vpop.f32.mrb[20].mxu0 }
 0x154   : > { %v5791_v34 = vpop.f32.mrb[20].mxu1  ;;  %v5680_v47 = vpop.f32.mrb[21].mxu0 }
 0x155   : > { %v5792_v54 = vpop.f32.mrb[21].mxu1  ;;  %v5681_v58 = vadd.f32 %v5680_v47, %v5679_v29  ;;  %v5682_v63 = vpop.f32.mrb[22].mxu0 }
 0x156   : > { %v5793_v32 = vadd.f32 %v5792_v54, %v5791_v34  ;;  %v5794_v62 = vpop.f32.mrb[22].mxu1  ;;  %v5683_v25 = vpop.f32.mrb[23].mxu0 }
 0x157   : > { %v5795_v19 = vpop.f32.mrb[23].mxu1  ;;  %v5684_v59 = vadd.f32 %v5683_v25, %v5682_v63  ;;  %v6842_v25 = vld [vmem:[#allocation3 + $0x10] sm:$0xff]  }
 0x158   : > { %v5796_v33 = vadd.f32 %v5795_v19, %v5794_v62  ;;  %v7939_v8 = vadd.f32 %v5793_v32, %v5681_v58  ;;  %6594 = vmatmul.mubr.bf16.vlgmr.msra.gmra.mrb[128].mxu0 %v7430_v42 }
 0x159   : > { %6597 = vmatprep.mubr.bf16.mxu0 %v7486_v14 }
 0x15a   : > { %v7943_v22 = vadd.f32 %v5796_v33, %v5684_v59  ;;  %v6841_v33 = vld [vmem:[#allocation3 + $0x50] sm:$0xff]  }
 0x15b   : > { %v5685_v36 = vpop.f32.mrb[24].mxu0  ;;  %6109 = vmatprep.subr.bf16.mxu1 %v6841_v33 }
 0x15c   : > { %v5797_v51 = vpop.f32.mrb[24].mxu1  ;;  %v5686_v13 = vpop.f32.mrb[25].mxu0  ;;  %6110 = vmatpush3.bf16.msra.mxu1 %v6842_v25 }
 0x15d   : > { %v5798_v11 = vpop.f32.mrb[25].mxu1  ;;  %v5687_v56 = vadd.f32 %v5686_v13, %v5685_v36  ;;  %v5688_v28 = vpop.f32.mrb[26].mxu0 }
 0x15e   : > { %v5799_v55 = vadd.f32 %v5798_v11, %v5797_v51  ;;  %v5800_v9 = vpop.f32.mrb[26].mxu1  ;;  %v5689_v17 = vpop.f32.mrb[27].mxu0 }
 0x15f   : > { %v5801_v24 = vpop.f32.mrb[27].mxu1  ;;  %v5690_v15 = vadd.f32 %v5689_v17, %v5688_v28 }
 0x160   : > { %v5802_v26 = vadd.f32 %v5801_v24, %v5800_v9  ;;  %v7945_v20 = vadd.f32 %v5799_v55, %v5687_v56  ;;  %6598 = vmatmul.mubr.bf16.gmra.mrb[132].mxu0 %v7545_v57 }
 0x161   : > { %6601 = vmatprep.mubr.bf16.mxu0 %v7620_v5 }
 0x162   : > { %v7949_v3 = vadd.f32 %v5802_v26, %v5690_v15 }
 0x163   : > { %v5691_v4 = vpop.f32.mrb[28].mxu0 }
 0x164   : > { %v5803_v42 = vpop.f32.mrb[28].mxu1  ;;  %v5692_v21 = vpop.f32.mrb[29].mxu0 }
 0x165   : > { %v5804_v14 = vpop.f32.mrb[29].mxu1  ;;  %v5693_v39 = vadd.f32 %v5692_v21, %v5691_v4  ;;  %v5694_v31 = vpop.f32.mrb[30].mxu0 }
 0x166   : > { %v5805_v41 = vadd.f32 %v5804_v14, %v5803_v42  ;;  %v5806_v45 = vpop.f32.mrb[30].mxu1  ;;  %v5695_v34 = vpop.f32.mrb[31].mxu0 }
 0x167   : > { %v5807_v40 = vpop.f32.mrb[31].mxu1  ;;  %v5696_v54 = vadd.f32 %v5695_v34, %v5694_v31  ;;  %v6844_v34 = vld [vmem:[#allocation3 + $0x18] sm:$0xff]  }
 0x168   : > { %v5808_v16 = vadd.f32 %v5807_v40, %v5806_v45  ;;  %v7951_v62 = vadd.f32 %v5805_v41, %v5693_v39  ;;  %6602 = vmatmul.mubr.bf16.gmra.mrb[136].mxu0 %v7669_v44 }
 0x169   : > { %6605 = vmatprep.mubr.bf16.mxu0 %v7691_v38 }
 0x16a   : > { %v7955_v5 = vadd.f32 %v5808_v16, %v5696_v54 }
 0x16b   : > { %v5697_v58 = vpop.f32.mrb[32].mxu0 }
 0x16c   : > { %v5809_v32 = vpop.f32.mrb[32].mxu1  ;;  %v5698_v59 = vpop.f32.mrb[33].mxu0 }
 0x16d   : > { %v5810_v57 = vpop.f32.mrb[33].mxu1  ;;  %v5699_v51 = vadd.f32 %v5698_v59, %v5697_v58  ;;  %v5700_v11 = vpop.f32.mrb[34].mxu0 }
 0x16e   : > { %v5811_v19 = vadd.f32 %v5810_v57, %v5809_v32  ;;  %v5812_v29 = vpop.f32.mrb[34].mxu1  ;;  %v5701_v55 = vpop.f32.mrb[35].mxu0 }
 0x16f   : > { %v5813_v47 = vpop.f32.mrb[35].mxu1  ;;  %v5702_v44 = vadd.f32 %v5701_v55, %v5700_v11 }
 0x170   : > { %v5814_v63 = vadd.f32 %v5813_v47, %v5812_v29  ;;  %v7957_v9 = vadd.f32 %v5811_v19, %v5699_v51  ;;  %6606 = vmatmul.mubr.bf16.gmra.mrb[140].mxu0 %v7710_v0 }
 0x171   : > { %6609 = vmatprep.mubr.bf16.mxu0 %v7731_v53  ;;  %v6843_v53 = vld [vmem:[#allocation3 + $0x58] sm:$0xff]  }
 0x172   : > { %v7960_v24 = vadd.f32 %v5814_v63, %v5702_v44  ;;  %6111 = vmatprep.subr.bf16.mxu1 %v6843_v53 }
 0x173   : > { %v5703_v13 = vpop.f32.mrb[36].mxu0  ;;  %6112 = vmatpush3.bf16.msra.mxu1 %v6844_v34 }
 0x174   : > { %v5815_v1 = vpop.f32.mrb[36].mxu1  ;;  %v5704_v28 = vpop.f32.mrb[37].mxu0 }
 0x175   : > { %v5816_v38 = vpop.f32.mrb[37].mxu1  ;;  %v5705_v17 = vadd.f32 %v5704_v28, %v5703_v13  ;;  %v5706_v15 = vpop.f32.mrb[38].mxu0  ;;  %v934_v28 = vrot.slane %v7901_v10, 1 }
 0x176   : > { %v5817_v36 = vadd.f32 %v5816_v38, %v5815_v1  ;;  %v5818_v26 = vpop.f32.mrb[38].mxu1  ;;  %v5707_v42 = vpop.f32.mrb[39].mxu0 }
 0x177   : > { %v5819_v2 = vpop.f32.mrb[39].mxu1  ;;  %v5708_v41 = vadd.f32 %v5707_v42, %v5706_v15 }
 0x178   : > { %v5820_v56 = vadd.f32 %v5819_v2, %v5818_v26  ;;  %v7963_v14 = vadd.f32 %v5817_v36, %v5705_v17  ;;  %6610 = vmatmul.mubr.bf16.gmra.mrb[144].mxu0 %v7750_v50  ;;  %v6845_v17 = vld [vmem:[#allocation3 + $0x60] sm:$0xff]  }
 0x179   : > { %6613 = vmatprep.mubr.bf16.mxu0 %v7769_v30  ;;  %6113 = vmatprep.subr.bf16.mxu1 %v6845_v17 }
 0x17a   : > { %v7966_v40 = vadd.f32 %v5820_v56, %v5708_v41 }
 0x17b   : > { %v5709_v39 = vpop.f32.mrb[40].mxu0 }
 0x17c   : > { %v5821_v45 = vpop.f32.mrb[40].mxu1  ;;  %v5710_v54 = vpop.f32.mrb[41].mxu0 }
 0x17d   : > { %v5822_v0 = vpop.f32.mrb[41].mxu1  ;;  %v5711_v32 = vadd.f32 %v5710_v54, %v5709_v39  ;;  %v5712_v57 = vpop.f32.mrb[42].mxu0 }
 0x17e   : > { %v5823_v4 = vadd.f32 %v5822_v0, %v5821_v45  ;;  %v5824_v16 = vpop.f32.mrb[42].mxu1  ;;  %v5713_v19 = vpop.f32.mrb[43].mxu0  ;;  %v6846_v45 = vld [vmem:[#allocation3 + $0x20] sm:$0xff]  }
 0x17f   : > { %v5825_v21 = vpop.f32.mrb[43].mxu1  ;;  %v5714_v50 = vadd.f32 %v5713_v19, %v5712_v57  ;;  %6114 = vmatpush3.bf16.msra.mxu1 %v6846_v45 }
 0x180   : > { %v5826_v31 = vadd.f32 %v5825_v21, %v5824_v16  ;;  %v7969_v29 = vadd.f32 %v5823_v4, %v5711_v32  ;;  %6614 = vmatmul.mubr.bf16.gmra.mrb[148].mxu0 %v7785_v12 }
 0x181   : > { %6617 = vmatprep.mubr.bf16.mxu0 %v7798_v48  ;;  %v933_v48 = vrot.slane %v7896_v27, 1 }
 0x182   : > { %v7972_v58 = vadd.f32 %v5826_v31, %v5714_v50 }
 0x183   : > { %v5715_v59 = vpop.f32.mrb[44].mxu0  ;;  %v935_v16 = vsel %vm820_vm1, %v933_v48, %v934_v28 }
 0x184   : > { %v5827_v33 = vpop.f32.mrb[44].mxu1  ;;  %v5716_v11 = vpop.f32.mrb[45].mxu0 }
 0x185   : > { %v5828_v47 = vpop.f32.mrb[45].mxu1  ;;  %v5717_v55 = vadd.f32 %v5716_v11, %v5715_v59  ;;  %v5718_v44 = vpop.f32.mrb[46].mxu0 }
 0x186   : > { %v5829_v30 = vadd.f32 %v5828_v47, %v5827_v33  ;;  %v5830_v63 = vpop.f32.mrb[46].mxu1  ;;  %v5719_v1 = vpop.f32.mrb[47].mxu0 }
 0x187   : > { %v5831_v25 = vpop.f32.mrb[47].mxu1  ;;  %v5720_v36 = vadd.f32 %v5719_v1, %v5718_v44  ;;  %v6847_v44 = vld [vmem:[#allocation3 + $0x68] sm:$0xff]  }
 0x188   : > { %v5832_v51 = vadd.f32 %v5831_v25, %v5830_v63  ;;  %v7975_v38 = vadd.f32 %v5829_v30, %v5717_v55  ;;  %6618 = vmatmul.mubr.bf16.gmra.mrb[152].mxu0 %v7809_v18  ;;  %6115 = vmatprep.subr.bf16.mxu1 %v6847_v44 }
 0x189   : > { %6621 = vmatprep.mubr.bf16.mxu0 %v7925_v61 }
 0x18a   : > { %v7978_v2 = vadd.f32 %v5832_v51, %v5720_v36 }
 0x18b   : > { %v5721_v42 = vpop.f32.mrb[48].mxu0 }
 0x18c   : > { %v5833_v26 = vpop.f32.mrb[48].mxu1  ;;  %v5722_v0 = vpop.f32.mrb[49].mxu0 }
 0x18d   : > { %v5834_v12 = vpop.f32.mrb[49].mxu1  ;;  %v5723_v4 = vadd.f32 %v5722_v0, %v5721_v42  ;;  %v5724_v18 = vpop.f32.mrb[50].mxu0 }
 0x18e   : > { %v5835_v13 = vadd.f32 %v5834_v12, %v5833_v26  ;;  %v5836_v56 = vpop.f32.mrb[50].mxu1  ;;  %v5725_v53 = vpop.f32.mrb[51].mxu0  ;;  %v6848_v12 = vld [vmem:[#allocation3 + $0x28] sm:$0xff]  }
 0x18f   : > { %v5837_v15 = vpop.f32.mrb[51].mxu1  ;;  %v5726_v61 = vadd.f32 %v5725_v53, %v5724_v18  ;;  %6116 = vmatpush3.bf16.msra.mxu1 %v6848_v12  ;;  %v6853_v12 = vld [vmem:[#allocation3 + $0xc8] sm:$0xff]  }
 0x190   : > { %v5838_v41 = vadd.f32 %v5837_v15, %v5836_v56  ;;  %v7984_v21 = vadd.f32 %v5835_v13, %v5723_v4  ;;  %6622 = vmatmul.mubr.bf16.gmra.mrb[156].mxu0 %v935_v16 }
 0x192   : > { %v7986_v10 = vadd.f32 %v5838_v41, %v5726_v61 }
 0x193   : > { %v5727_v32 = vpop.f32.mrb[52].mxu0 }
 0x194   : > { %v5839_v39 = vpop.f32.mrb[52].mxu1  ;;  %v5728_v19 = vpop.f32.mrb[53].mxu0 }
 0x195   : > { %v5840_v27 = vpop.f32.mrb[53].mxu1  ;;  %v5729_v50 = vadd.f32 %v5728_v19, %v5727_v32  ;;  %v5730_v33 = vpop.f32.mrb[54].mxu0  ;;  %v6851_v19 = vld [vmem:[#allocation3 + $0xc0] sm:$0xff]  }
 0x196   : > { %v5841_v31 = vadd.f32 %v5840_v27, %v5839_v39  ;;  %v5842_v34 = vpop.f32.mrb[54].mxu1  ;;  %v5731_v47 = vpop.f32.mrb[55].mxu0  ;;  %6217 = vmatprep.subr.bf16.mxu0 %v6851_v19 }
 0x197   : > { %v5843_v54 = vpop.f32.mrb[55].mxu1  ;;  %v5732_v63 = vadd.f32 %v5731_v47, %v5730_v33 }
 0x198   : > { %v5844_v57 = vadd.f32 %v5843_v54, %v5842_v34  ;;  %v7988_v30 = vadd.f32 %v5841_v31, %v5729_v50 }
 0x19a   : > { %v7990_v51 = vadd.f32 %v5844_v57, %v5732_v63  ;;  %v6849_v63 = vld [vmem:[#allocation3 + $0x70] sm:$0xff]  }
 0x19b   : > { %v5733_v36 = vpop.f32.mrb[56].mxu0  ;;  %6117 = vmatprep.subr.bf16.mxu1 %v6849_v63 }
 0x19c   : > { %v5845_v25 = vpop.f32.mrb[56].mxu1  ;;  %v5734_v13 = vpop.f32.mrb[57].mxu0 }
 0x19d   : > { %v5846_v59 = vpop.f32.mrb[57].mxu1  ;;  %v5735_v56 = vadd.f32 %v5734_v13, %v5733_v36  ;;  %v5736_v48 = vpop.f32.mrb[58].mxu0 }
 0x19e   : > { %v5847_v11 = vadd.f32 %v5846_v59, %v5845_v25  ;;  %v5848_v55 = vpop.f32.mrb[58].mxu1  ;;  %v5737_v28 = vpop.f32.mrb[59].mxu0  ;;  %v6852_v25 = vld [vmem:[#allocation3 + $0x80] sm:$0xff]  }
 0x19f   : > { %v5849_v1 = vpop.f32.mrb[59].mxu1  ;;  %v5738_v15 = vadd.f32 %v5737_v28, %v5736_v48  ;;  %6218 = vmatpush3.bf16.msra.mxu0 %v6852_v25  ;;  %v6854_v48 = vld [vmem:[#allocation3 + $0x88] sm:$0xff]  }
 0x1a0   : > { %v5850_v26 = vadd.f32 %v5849_v1, %v5848_v55  ;;  %v7992_v17 = vadd.f32 %v5847_v11, %v5735_v56  ;;  %v309_v55 = vld [vmem:[#allocation2 + $0x18] sm:$0x1]  ;;  %6219 = vmatprep.subr.bf16.mxu0 %v6853_v12  ;;  %v6937_v11 = vld [vmem:[#allocation3 + $0x218] sm:$0xff]  }
 0x1a1   : > { %v310_v36 = vsel %vm8002_vm4, 0, %v309_v55 }
 0x1a2   : > { %v7994_v45 = vadd.f32 %v5850_v26, %v5738_v15  ;;  %311 = vst [vmem:[#allocation2 + $0x18] sm:$0x1] %v310_v36 }
 0x1a3   : > { %v5739_v16 = vpop.f32.mrb[60].mxu0  ;;  %6220 = vmatpush3.bf16.msra.mxu0 %v6854_v48 }
 0x1a4   : > { %v5851_v42 = vpop.f32.mrb[60].mxu1  ;;  %v5740_v61 = vpop.f32.mrb[61].mxu0 }
 0x1a5   : > { %v5852_v41 = vpop.f32.mrb[61].mxu1  ;;  %v5741_v39 = vadd.f32 %v5740_v61, %v5739_v16  ;;  %v5742_v27 = vpop.f32.mrb[62].mxu0 }
 0x1a6   : > { %v5853_v0 = vadd.f32 %v5852_v41, %v5851_v42  ;;  %v5854_v4 = vpop.f32.mrb[62].mxu1  ;;  %v5743_v31 = vpop.f32.mrb[63].mxu0 }
 0x1a7   : > { %v5855_v18 = vpop.f32.mrb[63].mxu1  ;;  %v5744_v54 = vadd.f32 %v5743_v31, %v5742_v27  ;;  %v6938_v31 = vld [vmem:[#allocation3 + $0x220] sm:$0xff]  }
 0x1a8   : > { %v5856_v53 = vadd.f32 %v5855_v18, %v5854_v4  ;;  %v7996_v34 = vadd.f32 %v5853_v0, %v5741_v39  ;;  %v6855_v4 = vld [vmem:[#allocation3 + $0xd0] sm:$0xff]  }
 0x1a9   : > { %v6856_v39 = vld [vmem:[#allocation3 + $0x90] sm:$0xff]   ;;  %6221 = vmatprep.subr.bf16.mxu0 %v6855_v4 }
 0x1aa   : > { %v7998_v50 = vadd.f32 %v5856_v53, %v5744_v54  ;;  %6222 = vmatpush3.bf16.msra.mxu0 %v6856_v39 }
 0x1ab   : > { %v5873_v44 = vpop.f32.mrb[64].mxu0 }
 0x1ac   : > { %v5985_v32 = vpop.f32.mrb[64].mxu1  ;;  %v5874_v26 = vpop.f32.mrb[65].mxu0 }
 0x1ad   : > { %v5986_v57 = vpop.f32.mrb[65].mxu1  ;;  %v5875_v13 = vadd.f32 %v5874_v26, %v5873_v44  ;;  %v5876_v56 = vpop.f32.mrb[66].mxu0 }
 0x1ae   : > { %v5987_v33 = vadd.f32 %v5986_v57, %v5985_v32  ;;  %v5988_v47 = vpop.f32.mrb[66].mxu1  ;;  %v5877_v28 = vpop.f32.mrb[67].mxu0  ;;  %v306_v32 = vld [vmem:[#allocation2 + $0xc] sm:$0x1] }
 0x1af   : > { %v5989_v59 = vpop.f32.mrb[67].mxu1  ;;  %v1870_v15 = vadd.f32 %v5875_v13, %v7887_v46  ;;  %v5878_v42 = vadd.f32 %v5877_v28, %v5876_v56  ;;  %v307_v19 = vsel %vm8002_vm4, 0, %v306_v32 }
 0x1b0   : > { %v5990_v1 = vadd.f32 %v5989_v59, %v5988_v47  ;;  %308 = vst [vmem:[#allocation2 + $0xc] sm:$0x1] %v307_v19  ;;  %v362_v59 = vld [vmem:[#allocation2 + $0x14] sm:$0x1] }
 0x1b1   : > { %v1873_v18 = vadd.f32 %v5878_v42, %v7891_v7  ;;  %v8010_v61 = vadd.f32 %v5987_v33, %v1870_v15  ;;  %v365_v33 = vld [vmem:[#allocation2 + $0x20] sm:$0x1]  ;;  %v363_v44 = vsel %vm8014_vm6, 0, %v362_v59  ;;  %v315_v42 = vld [vmem:[#allocation2 + $0x30] sm:$0x1] }
 0x1b2   : > { %v366_v25 = vsel %vm8014_vm6, 0, %v365_v33  ;;  %364 = vst [vmem:[#allocation2 + $0x14] sm:$0x1] %v363_v44  ;;  %v6857_v19 = vld [vmem:[#allocation3 + $0xd8] sm:$0xff]  }
 0x1b3   : > { %v5879_v46 = vpop.f32.mrb[68].mxu0  ;;  %v8018_v57 = vadd.f32 %v5990_v1, %v1873_v18  ;;  %367 = vst [vmem:[#allocation2 + $0x20] sm:$0x1] %v366_v25  ;;  %v312_v18 = vld [vmem:[#allocation2 + $0x24] sm:$0x1]  ;;  %v6858_v25 = vld [vmem:[#allocation3 + $0x98] sm:$0xff]   ;;  %6223 = vmatprep.subr.bf16.mxu0 %v6857_v19 }
 0x1b4   : > { %v5991_v41 = vpop.f32.mrb[68].mxu1  ;;  %v5880_v7 = vpop.f32.mrb[69].mxu0  ;;  %6224 = vmatpush3.bf16.msra.mxu0 %v6858_v25 }
 0x1b5   : > { %v5992_v0 = vpop.f32.mrb[69].mxu1  ;;  %v5881_v47 = vadd.f32 %v5880_v7, %v5879_v46  ;;  %v5882_v63 = vpop.f32.mrb[70].mxu0  ;;  %v6850_v46 = vld [vmem:[#allocation3 + $0x30] sm:$0xff]   ;;  %v371_v7 = vld [vmem:[#allocation2 + $0x38] sm:$0x1] }
 0x1b6   : > { %v5993_v16 = vadd.f32 %v5992_v0, %v5991_v41  ;;  %v5994_v53 = vpop.f32.mrb[70].mxu1  ;;  %v5883_v55 = vpop.f32.mrb[71].mxu0  ;;  %v7095_v41 = vmov 0   ;;  %6118 = vmatpush3.bf16.msra.mxu1 %v6850_v46 }
 0x1b7   : > { %v5995_v27 = vpop.f32.mrb[71].mxu1  ;;  %v1878_v1 = vadd.f32 %v5881_v47, %v7904_v49  ;;  %v5884_v36 = vadd.f32 %v5883_v55, %v5882_v63  ;;  %293 = vst [vmem:[#allocation2] sm:$0xf] %v7095_v41  ;;  %294 = vst [vmem:[#allocation2 + $0x4] sm:$0xf] %v7095_v41  ;;  %v372_v63 = vsel %vm8014_vm6, 0, %v371_v7 }
 0x1b8   : > { %v5996_v54 = vadd.f32 %v5995_v27, %v5994_v53  ;;  %295 = vst [vmem:[#allocation2 + $0x8] sm:$0x1] %v7095_v41  ;;  %297 = vst [vmem:[#allocation2 + $0xcc] sm:$0xf] %v7095_v41 }
 0x1b9   : > { %v1881_v13 = vadd.f32 %v5884_v36, %v7908_v52  ;;  %v8028_v28 = vadd.f32 %v5993_v16, %v1878_v1  ;;  %298 = vst [vmem:[#allocation2 + $0xd0] sm:$0xf] %v7095_v41  ;;  %299 = vst [vmem:[#allocation2 + $0xd4] sm:$0x1] %v7095_v41  ;;  %v316_v52 = vsel %vm8002_vm4, 0, %v315_v42  ;;  %v313_v16 = vsel %vm8002_vm4, 0, %v312_v18 }
 0x1ba   : > { %317 = vst [vmem:[#allocation2 + $0x30] sm:$0x1] %v316_v52  ;;  %314 = vst [vmem:[#allocation2 + $0x24] sm:$0x1] %v313_v16  ;;  %v6862_v41 = vld [vmem:[#allocation3 + $0xa0] sm:$0xff]   ;;  %v6863_v16 = vld [vmem:[#allocation3 + $0xe8] sm:$0xff]  }
 0x1bb   : > { %v5885_v49 = vpop.f32.mrb[72].mxu0  ;;  %v8030_v4 = vadd.f32 %v5996_v54, %v1881_v13  ;;  %373 = vst [vmem:[#allocation2 + $0x38] sm:$0x1] %v372_v63 }
 0x1bc   : > { %v5997_v26 = vpop.f32.mrb[72].mxu1  ;;  %v5886_v53 = vpop.f32.mrb[73].mxu0 }
 0x1bd   : > { %v5998_v12 = vpop.f32.mrb[73].mxu1  ;;  %v5887_v39 = vadd.f32 %v5886_v53, %v5885_v49  ;;  %v5888_v27 = vpop.f32.mrb[74].mxu0 }
 0x1be   : > { %v5999_v56 = vadd.f32 %v5998_v12, %v5997_v26  ;;  %v6000_v48 = vpop.f32.mrb[74].mxu1  ;;  %v5889_v32 = vpop.f32.mrb[75].mxu0  ;;  %v303_v26 = vld [vmem:[#allocation2] sm:$0x1] }
 0x1bf   : > { %v6001_v15 = vpop.f32.mrb[75].mxu1  ;;  %v1886_v33 = vadd.f32 %v5887_v39, %v7914_v35  ;;  %v5890_v54 = vadd.f32 %v5889_v32, %v5888_v27  ;;  %v6861_v35 = vld [vmem:[#allocation3 + $0xe0] sm:$0xff]   ;;  %v304_v13 = vsel %vm8002_vm4, 0, %v303_v26  ;;  %v359_v49 = vld [vmem:[#allocation2 + $0x8] sm:$0x1]  ;;  %v6864_v32 = vld [vmem:[#allocation3 + $0xa8] sm:$0xff]  }
 0x1c0   : > { %v6002_v0 = vadd.f32 %v6001_v15, %v6000_v48  ;;  %305 = vst [vmem:[#allocation2] sm:$0x1] %v304_v13  ;;  %6225 = vmatprep.subr.bf16.mxu0 %v6861_v35  ;;  %v6866_v35 = vld [vmem:[#allocation3 + $0xb0] sm:$0xff]  }
 0x1c1   : > { %v1889_v55 = vadd.f32 %v5890_v54, %v7918_v60  ;;  %v8040_v36 = vadd.f32 %v5999_v56, %v1886_v33  ;;  %v360_v60 = vsel %vm8014_vm6, 0, %v359_v49  ;;  %6226 = vmatpush3.bf16.msra.mxu0 %v6862_v41 }
 0x1c2   : > { %361 = vst [vmem:[#allocation2 + $0x8] sm:$0x1] %v360_v60  ;;  %6227 = vmatprep.subr.bf16.mxu0 %v6863_v16 }
 0x1c3   : > { %v5891_v48 = vpop.f32.mrb[76].mxu0  ;;  %v8044_v42 = vadd.f32 %v6002_v0, %v1889_v55  ;;  %v368_v0 = vld [vmem:[#allocation2 + $0x2c] sm:$0x1] }
 0x1c4   : > { %v6003_v47 = vpop.f32.mrb[76].mxu1  ;;  %v5892_v52 = vpop.f32.mrb[77].mxu0  ;;  %v369_v19 = vsel %vm8014_vm6, 0, %v368_v0 }
 0x1c5   : > { %v6004_v59 = vpop.f32.mrb[77].mxu1  ;;  %v5893_v56 = vadd.f32 %v5892_v52, %v5891_v48  ;;  %v5894_v18 = vpop.f32.mrb[78].mxu0  ;;  %370 = vst [vmem:[#allocation2 + $0x2c] sm:$0x1] %v369_v19  ;;  %6228 = vmatpush3.bf16.msra.mxu0 %v6864_v32  ;;  %v318_v52 = vld [vmem:[#allocation2 + $0x3c] sm:$0x1] }
 0x1c6   : > { %v6005_v44 = vadd.f32 %v6004_v59, %v6003_v47  ;;  %v6006_v1 = vpop.f32.mrb[78].mxu1  ;;  %v5895_v53 = vpop.f32.mrb[79].mxu0  ;;  %v6859_v59 = vld [vmem:[#allocation3 + $0x78] sm:$0xff]  }
 0x1c7   : > { %v6007_v12 = vpop.f32.mrb[79].mxu1  ;;  %v1894_v39 = vadd.f32 %v5893_v56, %v7927_v23  ;;  %v5896_v27 = vadd.f32 %v5895_v53, %v5894_v18  ;;  %v6865_v23 = vld [vmem:[#allocation3 + $0xf0] sm:$0xff]   ;;  %v8056_v13 = vld [vmem:[#allocation2] sm:$0xff]   ;;  %6119 = vmatprep.subr.bf16.mxu1 %v6859_v59  ;;  %v319_v56 = vsel %vm8002_vm4, 0, %v318_v52  ;;  %v377_v18 = vld [vmem:[#allocation2 + $0x50] sm:$0x1] }
 0x1c8   : > { %v6008_v15 = vadd.f32 %v6007_v12, %v6006_v1  ;;  %v6860_v12 = vld [vmem:[#allocation3 + $0x38] sm:$0xff]   ;;  %6229 = vmatprep.subr.bf16.mxu0 %v6865_v23  ;;  %v3162_v60 = vshll.u32 %v8056_v13, 16  ;;  %320 = vst [vmem:[#allocation2 + $0x3c] sm:$0x1] %v319_v56 }
 0x1c9   : > { %v1897_v33 = vadd.f32 %v5896_v27, %v7931_v37  ;;  %v8052_v63 = vadd.f32 %v6005_v44, %v1894_v39  ;;  %v321_v37 = vld [vmem:[#allocation2 + $0x48] sm:$0x1]  ;;  %6120 = vmatpush3.bf16.msra.mxu1 %v6860_v12  ;;  %6230 = vmatpush3.bf16.msra.mxu0 %v6866_v35  ;;  %v378_v27 = vsel %vm8014_vm6, 0, %v377_v18 }
 0x1ca   : > { %v322_v49 = vsel %vm8002_vm4, 0, %v321_v37  ;;  %379 = vst [vmem:[#allocation2 + $0x50] sm:$0x1] %v378_v27  ;;  %v3164_v59 = vrot.slane %v3162_v60, 1 }
 0x1cb   : > { %v5897_v55 = vpop.f32.mrb[80].mxu0  ;;  %v8054_v26 = vadd.f32 %v6008_v15, %v1897_v33  ;;  %323 = vst [vmem:[#allocation2 + $0x48] sm:$0x1] %v322_v49  ;;  %v327_v49 = vld [vmem:[#allocation2 + $0x60] sm:$0x1] }
 0x1cc   : > { %v6009_v46 = vpop.f32.mrb[80].mxu1  ;;  %v5898_v48 = vpop.f32.mrb[81].mxu0 }
 0x1cd   : > { %v6010_v7 = vpop.f32.mrb[81].mxu1  ;;  %v5899_v41 = vadd.f32 %v5898_v48, %v5897_v55  ;;  %v5900_v44 = vpop.f32.mrb[82].mxu0  ;;  %v6869_v55 = vld [vmem:[#allocation3 + $0xf8] sm:$0xff]  }
 0x1ce   : > { %v6011_v54 = vadd.f32 %v6010_v7, %v6009_v46  ;;  %v6012_v47 = vpop.f32.mrb[82].mxu1  ;;  %v5901_v15 = vpop.f32.mrb[83].mxu0  ;;  %v374_v46 = vld [vmem:[#allocation2 + $0x44] sm:$0x1]  ;;  %v3160_v7 = vshrl.u32 %v8056_v13, 16  ;;  %6231 = vmatprep.subr.bf16.mxu0 %v6869_v55 }
 0x1cf   : > { %v6013_v25 = vpop.f32.mrb[83].mxu1  ;;  %v1902_v53 = vadd.f32 %v5899_v41, %v7934_v43  ;;  %v5902_v16 = vadd.f32 %v5901_v15, %v5900_v44  ;;  %v375_v32 = vsel %vm8014_vm6, 0, %v374_v46  ;;  %v6868_v43 = vld [vmem:[#allocation2 + $0x8] ss:$0 sps:$4 sm:$0x11]   ;;  %v6870_v41 = vld [vmem:[#allocation3 + $0xb8] sm:$0xff]  }
 0x1d0   : > { %v6014_v1 = vadd.f32 %v6013_v25, %v6012_v47  ;;  %376 = vst [vmem:[#allocation2 + $0x44] sm:$0x1] %v375_v32  ;;  %v3167_v37 = vshll.u32 %v6868_v43, 16  ;;  %v324_v15 = vld [vmem:[#allocation2 + $0x54] sm:$0x1]  ;;  %v3165_v56 = vor.u32 %v3164_v59, %v3160_v7  ;;  %6232 = vmatpush3.bf16.msra.mxu0 %v6870_v41  ;;  %v3367_v32 = vrot.slane %v8056_v13, 1 }
 0x1d1   : > { %v1905_v19 = vadd.f32 %v5902_v16, %v7937_v6  ;;  %v8070_v25 = vadd.f32 %v6011_v54, %v1902_v53  ;;  %v328_v54 = vsel %vm8002_vm4, 0, %v327_v49  ;;  %v325_v18 = vsel %vm8002_vm4, 0, %v324_v15  ;;  %v380_v49 = vld [vmem:[#allocation2 + $0x5c] sm:$0x1] }
 0x1d2   : > { %329 = vst [vmem:[#allocation2 + $0x60] sm:$0x1] %v328_v54  ;;  %326 = vst [vmem:[#allocation2 + $0x54] sm:$0x1] %v325_v18  ;;  %v3169_v46 = vrot.slane %v3167_v37, 1  ;;  %v3368_v7 = vrot.slane %v6868_v43, 1 }
 0x1d3   : > { %v5903_v12 = vpop.f32.mrb[84].mxu0  ;;  %v8072_v48 = vadd.f32 %v6014_v1, %v1905_v19  ;;  %v383_v1 = vld [vmem:[#allocation2 + $0x68] sm:$0x1]  ;;  %v333_v18 = vld [vmem:[#allocation2 + $0x78] sm:$0x1] }
 0x1d4   : > { %v6015_v39 = vpop.f32.mrb[84].mxu1  ;;  %v5904_v44 = vpop.f32.mrb[85].mxu0  ;;  %v384_v27 = vsel %vm8014_vm6, 0, %v383_v1 }
 0x1d5   : > { %v6016_v0 = vpop.f32.mrb[85].mxu1  ;;  %v5905_v52 = vadd.f32 %v5904_v44, %v5903_v12  ;;  %v5906_v6 = vpop.f32.mrb[86].mxu0  ;;  %385 = vst [vmem:[#allocation2 + $0x68] sm:$0x1] %v384_v27  ;;  %v8087_v12 = vsel %vm820_vm1, %v3367_v32, %v3368_v7 }
 0x1d6   : > { %v6017_v33 = vadd.f32 %v6016_v0, %v6015_v39  ;;  %v6018_v47 = vpop.f32.mrb[86].mxu1  ;;  %v5907_v60 = vpop.f32.mrb[87].mxu0 }
 0x1d7   : > { %v6019_v23 = vpop.f32.mrb[87].mxu1  ;;  %v1910_v53 = vadd.f32 %v5905_v52, %v7939_v8  ;;  %v5908_v16 = vadd.f32 %v5907_v60, %v5906_v6  ;;  %v3170_v8 = vsel %vm611_vm0, %v3165_v56, %v3169_v46 }
 0x1d8   : > { %v6020_v35 = vadd.f32 %v6019_v23, %v6018_v47  ;;  %4091 = vmatprep.mubr.bf16.mxu1 %v3170_v8 }
 0x1d9   : > { %v1913_v19 = vadd.f32 %v5908_v16, %v7943_v22  ;;  %v8083_v23 = vadd.f32 %v6017_v33, %v1910_v53  ;;  %4092 = vmatmul.mubr.bf16.vlgmr.msra.gmra.mrb[128].mxu1 %v8056_v13  ;;  %v381_v22 = vsel %vm8014_vm6, 0, %v380_v49  ;;  %v334_v13 = vsel %vm8002_vm4, 0, %v333_v18  ;;  %v6872_v49 = vld [vmem:[#allocation3 + $0x140] sm:$0xff]  }
 0x1da   : > { %382 = vst [vmem:[#allocation2 + $0x5c] sm:$0x1] %v381_v22  ;;  %335 = vst [vmem:[#allocation2 + $0x78] sm:$0x1] %v334_v13  ;;  %6329 = vmatprep.subr.bf16.mxu1 %v6872_v49 }
 0x1db   : > { %v5909_v41 = vpop.f32.mrb[88].mxu0  ;;  %v8089_v44 = vadd.f32 %v6020_v35, %v1913_v19  ;;  %v386_v19 = vld [vmem:[#allocation2 + $0x74] sm:$0x1] }
 0x1dc   : > { %v6021_v39 = vpop.f32.mrb[88].mxu1  ;;  %v5910_v43 = vpop.f32.mrb[89].mxu0 }
 0x1dd   : > { %v6022_v0 = vpop.f32.mrb[89].mxu1  ;;  %v5911_v33 = vadd.f32 %v5910_v43, %v5909_v41  ;;  %v5912_v52 = vpop.f32.mrb[90].mxu0 }
 0x1de   : > { %v6023_v47 = vadd.f32 %v6022_v0, %v6021_v39  ;;  %v6024_v59 = vpop.f32.mrb[90].mxu1  ;;  %v5913_v6 = vpop.f32.mrb[91].mxu0  ;;  %v330_v39 = vld [vmem:[#allocation2 + $0x6c] sm:$0x1] }
 0x1df   : > { %v6025_v55 = vpop.f32.mrb[91].mxu1  ;;  %v1918_v54 = vadd.f32 %v5911_v33, %v7945_v20  ;;  %v5914_v15 = vadd.f32 %v5913_v6, %v5912_v52  ;;  %v331_v46 = vsel %vm8002_vm4, 0, %v330_v39  ;;  %v389_v20 = vld [vmem:[#allocation2 + $0x80] sm:$0x1]  ;;  %v6873_v52 = vld [vmem:[#allocation3 + $0x100] sm:$0xff]  }
 0x1e0   : > { %v6026_v37 = vadd.f32 %v6025_v55, %v6024_v59  ;;  %332 = vst [vmem:[#allocation2 + $0x6c] sm:$0x1] %v331_v46  ;;  %v387_v59 = vsel %vm8014_vm6, 0, %v386_v19  ;;  %6330 = vmatpush3.bf16.msra.mxu1 %v6873_v52 }
 0x1e1   : > { %v1921_v35 = vadd.f32 %v5914_v15, %v7949_v3  ;;  %v8096_v16 = vadd.f32 %v6023_v47, %v1918_v54  ;;  %v390_v3 = vsel %vm8014_vm6, 0, %v389_v20  ;;  %388 = vst [vmem:[#allocation2 + $0x74] sm:$0x1] %v387_v59 }
 0x1e2   : > { %391 = vst [vmem:[#allocation2 + $0x80] sm:$0x1] %v390_v3 }
 0x1e3   : > { %v5915_v0 = vpop.f32.mrb[92].mxu0  ;;  %v8102_v7 = vadd.f32 %v6026_v37, %v1921_v35 }
 0x1e4   : > { %v6027_v56 = vpop.f32.mrb[92].mxu1  ;;  %v5916_v47 = vpop.f32.mrb[93].mxu0 }
 0x1e5   : > { %v6028_v60 = vpop.f32.mrb[93].mxu1  ;;  %v5917_v8 = vadd.f32 %v5916_v47, %v5915_v0  ;;  %v5918_v55 = vpop.f32.mrb[94].mxu0 }
 0x1e6   : > { %v6029_v1 = vadd.f32 %v6028_v60, %v6027_v56  ;;  %v6030_v53 = vpop.f32.mrb[94].mxu1  ;;  %v5919_v41 = vpop.f32.mrb[95].mxu0 }
 0x1e7   : > { %v6031_v27 = vpop.f32.mrb[95].mxu1  ;;  %v1926_v43 = vadd.f32 %v5917_v8, %v7951_v62  ;;  %v5920_v22 = vadd.f32 %v5919_v41, %v5918_v55 }
 0x1e8   : > { %v6032_v32 = vadd.f32 %v6031_v27, %v6030_v53 }
 0x1e9   : > { %v1929_v6 = vadd.f32 %v5920_v22, %v7955_v5  ;;  %v8110_v56 = vadd.f32 %v6029_v1, %v1926_v43  ;;  %v339_v5 = vld [vmem:[#allocation2 + $0x90] sm:$0x1] }
 0x1eb   : > { %v5921_v18 = vpop.f32.mrb[96].mxu0  ;;  %v8112_v53 = vadd.f32 %v6032_v32, %v1929_v6  ;;  %v340_v32 = vsel %vm8002_vm4, 0, %v339_v5 }
 0x1ec   : > { %v6033_v37 = vpop.f32.mrb[96].mxu1  ;;  %v5922_v13 = vpop.f32.mrb[97].mxu0  ;;  %341 = vst [vmem:[#allocation2 + $0x90] sm:$0x1] %v340_v32 }
 0x1ed   : > { %v6034_v33 = vpop.f32.mrb[97].mxu1  ;;  %v5923_v39 = vadd.f32 %v5922_v13, %v5921_v18  ;;  %v5924_v62 = vpop.f32.mrb[98].mxu0  ;;  %v336_v13 = vld [vmem:[#allocation2 + $0x84] sm:$0x1] }
 0x1ee   : > { %v6035_v54 = vadd.f32 %v6034_v33, %v6033_v37  ;;  %v6036_v15 = vpop.f32.mrb[98].mxu1  ;;  %v5925_v27 = vpop.f32.mrb[99].mxu0 }
 0x1ef   : > { %v6037_v60 = vpop.f32.mrb[99].mxu1  ;;  %v1934_v46 = vadd.f32 %v5923_v39, %v7957_v9  ;;  %v5926_v20 = vadd.f32 %v5925_v27, %v5924_v62 }
 0x1f0   : > { %v6038_v35 = vadd.f32 %v6037_v60, %v6036_v15 }
 0x1f1   : > { %v1937_v19 = vadd.f32 %v5926_v20, %v7960_v24  ;;  %v8116_v59 = vadd.f32 %v6035_v54, %v1934_v46 }
 0x1f3   : > { %v5927_v55 = vpop.f32.mrb[100].mxu0  ;;  %v8120_v49 = vadd.f32 %v6038_v35, %v1937_v19  ;;  %v337_v35 = vsel %vm8002_vm4, 0, %v336_v13 }
 0x1f4   : > { %v6039_v0 = vpop.f32.mrb[100].mxu1  ;;  %v5928_v9 = vpop.f32.mrb[101].mxu0  ;;  %338 = vst [vmem:[#allocation2 + $0x84] sm:$0x1] %v337_v35 }
 0x1f5   : > { %v6040_v3 = vpop.f32.mrb[101].mxu1  ;;  %v5929_v43 = vadd.f32 %v5928_v9, %v5927_v55  ;;  %v5930_v22 = vpop.f32.mrb[102].mxu0  ;;  %v6878_v55 = vld [vmem:[#allocation3 + $0x148] sm:$0xff]  }
 0x1f6   : > { %v6041_v1 = vadd.f32 %v6040_v3, %v6039_v0  ;;  %v6042_v47 = vpop.f32.mrb[102].mxu1  ;;  %v5931_v37 = vpop.f32.mrb[103].mxu0  ;;  %6331 = vmatprep.subr.bf16.mxu1 %v6878_v55 }
 0x1f7   : > { %v6043_v8 = vpop.f32.mrb[103].mxu1  ;;  %v1942_v33 = vadd.f32 %v5929_v43, %v7963_v14  ;;  %v5932_v24 = vadd.f32 %v5931_v37, %v5930_v22 }
 0x1f8   : > { %v6044_v41 = vadd.f32 %v6043_v8, %v6042_v47  ;;  %v392_v8 = vld [vmem:[#allocation2 + $0x8c] sm:$0x1] }
 0x1f9   : > { %v1945_v54 = vadd.f32 %v5932_v24, %v7966_v40  ;;  %v8124_v18 = vadd.f32 %v6041_v1, %v1942_v33  ;;  %v395_v1 = vld [vmem:[#allocation2 + $0x98] sm:$0x1]  ;;  %v393_v37 = vsel %vm8014_vm6, 0, %v392_v8 }
 0x1fa   : > { %v396_v32 = vsel %vm8014_vm6, 0, %v395_v1  ;;  %394 = vst [vmem:[#allocation2 + $0x8c] sm:$0x1] %v393_v37  ;;  %v401_v37 = vld [vmem:[#allocation2 + $0xb0] sm:$0x1] }
 0x1fb   : > { %v5933_v62 = vpop.f32.mrb[104].mxu0  ;;  %v8128_v46 = vadd.f32 %v6044_v41, %v1945_v54  ;;  %397 = vst [vmem:[#allocation2 + $0x98] sm:$0x1] %v396_v32 }
 0x1fc   : > { %v6045_v52 = vpop.f32.mrb[104].mxu1  ;;  %v5934_v14 = vpop.f32.mrb[105].mxu0 }
 0x1fd   : > { %v6046_v6 = vpop.f32.mrb[105].mxu1  ;;  %v5935_v20 = vadd.f32 %v5934_v14, %v5933_v62  ;;  %v5936_v0 = vpop.f32.mrb[106].mxu0 }
 0x1fe   : > { %v6047_v15 = vadd.f32 %v6046_v6, %v6045_v52  ;;  %v6048_v60 = vpop.f32.mrb[106].mxu1  ;;  %v5937_v3 = vpop.f32.mrb[107].mxu0 }
 0x1ff   : > { %v6049_v39 = vpop.f32.mrb[107].mxu1  ;;  %v1950_v40 = vadd.f32 %v5935_v20, %v7969_v29  ;;  %v5938_v5 = vadd.f32 %v5937_v3, %v5936_v0  ;;  %v345_v29 = vld [vmem:[#allocation2 + $0xa8] sm:$0x1] }
 0x200   : > { %v6050_v27 = vadd.f32 %v6049_v39, %v6048_v60  ;;  %v346_v24 = vsel %vm8002_vm4, 0, %v345_v29  ;;  %v342_v60 = vld [vmem:[#allocation2 + $0x9c] sm:$0x1]  ;;  %v398_v29 = vld [vmem:[#allocation2 + $0xa4] sm:$0x1] }
 0x201   : > { %v1953_v9 = vadd.f32 %v5938_v5, %v7972_v58  ;;  %v8134_v22 = vadd.f32 %v6047_v15, %v1950_v40  ;;  %347 = vst [vmem:[#allocation2 + $0xa8] sm:$0x1] %v346_v24  ;;  %v6880_v58 = vld [vmem:[#allocation3 + $0x108] sm:$0xff]   ;;  %v343_v13 = vsel %vm8002_vm4, 0, %v342_v60 }
 0x202   : > { %6332 = vmatpush3.bf16.msra.mxu1 %v6880_v58  ;;  %344 = vst [vmem:[#allocation2 + $0x9c] sm:$0x1] %v343_v13  ;;  %v351_v58 = vld [vmem:[#allocation2 + $0xc0] sm:$0x1] }
 0x203   : > { %v5939_v52 = vpop.f32.mrb[108].mxu0  ;;  %v8140_v54 = vadd.f32 %v6050_v27, %v1953_v9 }
 0x204   : > { %v6051_v19 = vpop.f32.mrb[108].mxu1  ;;  %v5940_v15 = vpop.f32.mrb[109].mxu0 }
 0x205   : > { %v6052_v47 = vpop.f32.mrb[109].mxu1  ;;  %v5941_v39 = vadd.f32 %v5940_v15, %v5939_v52  ;;  %v5942_v35 = vpop.f32.mrb[110].mxu0 }
 0x206   : > { %v6053_v41 = vadd.f32 %v6052_v47, %v6051_v19  ;;  %v6054_v43 = vpop.f32.mrb[110].mxu1  ;;  %v5943_v62 = vpop.f32.mrb[111].mxu0 }
 0x207   : > { %v6055_v33 = vpop.f32.mrb[111].mxu1  ;;  %v1958_v14 = vadd.f32 %v5941_v39, %v7975_v38  ;;  %v5944_v20 = vadd.f32 %v5943_v62, %v5942_v35  ;;  %v352_v35 = vsel %vm8002_vm4, 0, %v351_v58 }
 0x208   : > { %v6056_v6 = vadd.f32 %v6055_v33, %v6054_v43  ;;  %v402_v33 = vsel %vm8014_vm6, 0, %v401_v37  ;;  %353 = vst [vmem:[#allocation2 + $0xc0] sm:$0x1] %v352_v35 }
 0x209   : > { %v1961_v27 = vadd.f32 %v5944_v20, %v7978_v2  ;;  %v8146_v19 = vadd.f32 %v6053_v41, %v1958_v14  ;;  %v399_v2 = vsel %vm8014_vm6, 0, %v398_v29  ;;  %403 = vst [vmem:[#allocation2 + $0xb0] sm:$0x1] %v402_v33  ;;  %v348_v14 = vld [vmem:[#allocation2 + $0xb4] sm:$0x1] }
 0x20a   : > { %400 = vst [vmem:[#allocation2 + $0xa4] sm:$0x1] %v399_v2 }
 0x20b   : > { %v5945_v47 = vpop.f32.mrb[112].mxu0  ;;  %v8148_v8 = vadd.f32 %v6056_v6, %v1961_v27 }
 0x20c   : > { %v6057_v0 = vpop.f32.mrb[112].mxu1  ;;  %v5946_v55 = vpop.f32.mrb[113].mxu0 }
 0x20d   : > { %v6058_v3 = vpop.f32.mrb[113].mxu1  ;;  %v5947_v9 = vadd.f32 %v5946_v55, %v5945_v47  ;;  %v5948_v43 = vpop.f32.mrb[114].mxu0 }
 0x20e   : > { %v6059_v40 = vadd.f32 %v6058_v3, %v6057_v0  ;;  %v6060_v5 = vpop.f32.mrb[114].mxu1  ;;  %v5949_v38 = vpop.f32.mrb[115].mxu0  ;;  %v349_v3 = vsel %vm8002_vm4, 0, %v348_v14 }
 0x20f   : > { %v6061_v1 = vpop.f32.mrb[115].mxu1  ;;  %v1966_v41 = vadd.f32 %v5947_v9, %v7984_v21  ;;  %v5950_v24 = vadd.f32 %v5949_v38, %v5948_v43  ;;  %350 = vst [vmem:[#allocation2 + $0xb4] sm:$0x1] %v349_v3  ;;  %v6890_v3 = vld [vmem:[#allocation3 + $0x158] sm:$0xff]  }
 0x210   : > { %v6062_v32 = vadd.f32 %v6061_v1, %v6060_v5 }
 0x211   : > { %v1969_v60 = vadd.f32 %v5950_v24, %v7986_v10  ;;  %v8156_v39 = vadd.f32 %v6059_v40, %v1966_v41 }
 0x213   : > { %v5951_v20 = vpop.f32.mrb[116].mxu0  ;;  %v8160_v0 = vadd.f32 %v6062_v32, %v1969_v60  ;;  %v407_v32 = vld [vmem:[#allocation2 + $0xc8] sm:$0x1] }
 0x214   : > { %v6063_v52 = vpop.f32.mrb[116].mxu1  ;;  %v5952_v27 = vpop.f32.mrb[117].mxu0  ;;  %v408_v2 = vsel %vm8014_vm6, 0, %v407_v32 }
 0x215   : > { %v6064_v6 = vpop.f32.mrb[117].mxu1  ;;  %v5953_v10 = vadd.f32 %v5952_v27, %v5951_v20  ;;  %v5954_v5 = vpop.f32.mrb[118].mxu0  ;;  %409 = vst [vmem:[#allocation2 + $0xc8] sm:$0x1] %v408_v2 }
 0x216   : > { %v6065_v15 = vadd.f32 %v6064_v6, %v6063_v52  ;;  %v6066_v13 = vpop.f32.mrb[118].mxu1  ;;  %v5955_v1 = vpop.f32.mrb[119].mxu0 }
 0x217   : > { %v6067_v62 = vpop.f32.mrb[119].mxu1  ;;  %v1974_v40 = vadd.f32 %v5953_v10, %v7988_v30  ;;  %v5956_v47 = vadd.f32 %v5955_v1, %v5954_v5  ;;  %v404_v30 = vld [vmem:[#allocation2 + $0xbc] sm:$0x1] }
 0x218   : > { %v6068_v21 = vadd.f32 %v6067_v62, %v6066_v13  ;;  %v405_v58 = vsel %vm8014_vm6, 0, %v404_v30  ;;  %v6886_v13 = vld [vmem:[#allocation3 + $0x110] sm:$0xff]  }
 0x219   : > { %v1977_v43 = vadd.f32 %v5956_v47, %v7990_v51  ;;  %v8166_v38 = vadd.f32 %v6065_v15, %v1974_v40  ;;  %406 = vst [vmem:[#allocation2 + $0xbc] sm:$0x1] %v405_v58  ;;  %v6884_v15 = vld [vmem:[#allocation3 + $0x150] sm:$0xff]  }
 0x21a   : > { %6333 = vmatprep.subr.bf16.mxu1 %v6884_v15  ;;  %v6896_v15 = vld [vmem:[#allocation3 + $0x1c0] sm:$0xff]  }
 0x21b   : > { %v5957_v41 = vpop.f32.mrb[120].mxu0  ;;  %v8170_v52 = vadd.f32 %v6068_v21, %v1977_v43  ;;  %6334 = vmatpush3.bf16.msra.mxu1 %v6886_v13  ;;  %6441 = vmatprep.subr.bf16.mxu0 %v6896_v15 }
 0x21c   : > { %v6069_v55 = vpop.f32.mrb[120].mxu1  ;;  %v5958_v6 = vpop.f32.mrb[121].mxu0  ;;  %6335 = vmatprep.subr.bf16.mxu1 %v6890_v3 }
 0x21d   : > { %v6070_v9 = vpop.f32.mrb[121].mxu1  ;;  %v5959_v51 = vadd.f32 %v5958_v6, %v5957_v41  ;;  %v5960_v60 = vpop.f32.mrb[122].mxu0  ;;  %v8187_v6 = vld [vmem:[%s9333_s3] ss:$0 sm:$0xff] }
 0x21e   : > { %v6071_v37 = vadd.f32 %v6070_v9, %v6069_v55  ;;  %v6072_v29 = vpop.f32.mrb[122].mxu1  ;;  %v5961_v35 = vpop.f32.mrb[123].mxu0 }
 0x21f   : > { %v6073_v33 = vpop.f32.mrb[123].mxu1  ;;  %v1982_v62 = vadd.f32 %v5959_v51, %v7992_v17  ;;  %v5962_v14 = vadd.f32 %v5961_v35, %v5960_v60  ;;  %v6892_v17 = vld [vmem:[#allocation3 + $0x118] sm:$0xff]  }
 0x220   : > { %v6074_v24 = vadd.f32 %v6073_v33, %v6072_v29  ;;  %6336 = vmatpush3.bf16.msra.mxu1 %v6892_v17 }
 0x221   : > { %v1985_v27 = vadd.f32 %v5962_v14, %v7994_v45  ;;  %v8176_v1 = vadd.f32 %v6071_v37, %v1982_v62 }
 0x223   : > { %v5963_v47 = vpop.f32.mrb[124].mxu0  ;;  %v8178_v9 = vadd.f32 %v6074_v24, %v1985_v27 }
 0x224   : > { %v6075_v20 = vpop.f32.mrb[124].mxu1  ;;  %v5964_v43 = vpop.f32.mrb[125].mxu0 }
 0x225   : > { %v6076_v21 = vpop.f32.mrb[125].mxu1  ;;  %v5965_v29 = vadd.f32 %v5964_v43, %v5963_v47  ;;  %v5966_v32 = vpop.f32.mrb[126].mxu0 }
 0x226   : > { %v6077_v10 = vadd.f32 %v6076_v21, %v6075_v20  ;;  %v6078_v5 = vpop.f32.mrb[126].mxu1  ;;  %v5967_v33 = vpop.f32.mrb[127].mxu0 }
 0x227   : > { %v6079_v40 = vpop.f32.mrb[127].mxu1  ;;  %v1990_v2 = vadd.f32 %v5965_v29, %v7996_v34  ;;  %v5968_v41 = vadd.f32 %v5967_v33, %v5966_v32  ;;  %v8195_v34 = vld [vmem:[%s9334_s4] ss:$0 sm:$0xff]  ;;  %v6900_v29 = vld [vmem:[#allocation3 + $0x120] sm:$0xff]  }
 0x228   : > { %v6080_v55 = vadd.f32 %v6079_v40, %v6078_v5 }
 0x229   : > { %v1993_v45 = vadd.f32 %v5968_v41, %v7998_v50  ;;  %v8182_v30 = vadd.f32 %v6077_v10, %v1990_v2 }
 0x22b   : > { %v6595_v37 = vpop.f32.mrb[128].mxu0  ;;  %v8189_v24 = vadd.f32 %v6080_v55, %v1993_v45 }
 0x22c   : > { %v2200_v58 = vadd.f32 %v6595_v37, %v8028_v28  ;;  %v2191_v51 = vpop.f32.mrb[129].mxu0  ;;  %v6898_v28 = vld [vmem:[#allocation3 + $0x160] sm:$0xff]  }
 0x22d   : > { %v2192_v50 = vadd.f32 %v2191_v51, %v8010_v61  ;;  %v6596_v60 = vpop.f32.mrb[130].mxu0  ;;  %6337 = vmatprep.subr.bf16.mxu1 %v6898_v28  ;;  %v2856_v28 = vld [vmem:[#allocation2 + $0x18] sm:$0xf] }
 0x22e   : > { %v2327_v13 = vmul.f32 %v8187_v6, %v2200_v58  ;;  %v2203_v35 = vadd.f32 %v6596_v60, %v8030_v4  ;;  %v2194_v62 = vpop.f32.mrb[131].mxu0  ;;  %6338 = vmatpush3.bf16.msra.mxu1 %v6900_v29 }
 0x22f   : > { %v2325_v14 = vmul.f32 %v8187_v6, %v2192_v50  ;;  %v2195_v20 = vadd.f32 %v2194_v62, %v8018_v57 }
 0x230   : > { %v2366_v3 = vadd.f32 %v8195_v34, %v2327_v13  ;;  %v2328_v21 = vmul.f32 %v8187_v6, %v2203_v35 }
 0x231   : > { %v2364_v27 = vadd.f32 %v8195_v34, %v2325_v14  ;;  %v2326_v61 = vmul.f32 %v8187_v6, %v2195_v20 }
 0x232   : > { %v2398_v10 = vmax.f32 %v2366_v3, 0.0  ;;  %v2367_v5 = vadd.f32 %v8195_v34, %v2328_v21 }
 0x233   : > { %v2396_v4 = vmax.f32 %v2364_v27, 0.0  ;;  %v2365_v40 = vadd.f32 %v8195_v34, %v2326_v61  ;;  %v6599_v47 = vpop.f32.mrb[132].mxu0 }
 0x234   : > { %v5602_v55 = vpack.c.bf16 %v2398_v10, %v2398_v10  ;;  %v2399_v57 = vmax.f32 %v2367_v5, 0.0  ;;  %v2216_v43 = vadd.f32 %v6599_v47, %v8052_v63  ;;  %v2207_v17 = vpop.f32.mrb[133].mxu0 }
 0x235   : > { %v5600_v32 = vpack.c.bf16 %v2396_v4, %v2396_v4  ;;  %v2397_v33 = vmax.f32 %v2365_v40, 0.0  ;;  %v2208_v2 = vadd.f32 %v2207_v17, %v8040_v36  ;;  %v6600_v41 = vpop.f32.mrb[134].mxu0  ;;  %v2849_v4 = vld [vmem:[#allocation2 + $0xc] sm:$0xf]  ;;  %v2860_v17 = vld [vmem:[#allocation2 + $0x20] sm:$0x1] }
 0x236   : > { %v2544_v45 = vshrl.u32 %v5602_v55, 16  ;;  %v2547_v37 = vshll.u32 %v5602_v55, 16  ;;  %v5603_v58 = vpack.c.bf16 %v2399_v57, %v2399_v57  ;;  %v2331_v51 = vmul.f32 %v8187_v6, %v2216_v43  ;;  %v2210_v50 = vpop.f32.mrb[135].mxu0 }
 0x237   : > { %v2527_v60 = vshrl.u32 %v5600_v32, 16  ;;  %v2530_v15 = vshll.u32 %v5600_v32, 16  ;;  %v5601_v13 = vpack.c.bf16 %v2397_v33, %v2397_v33  ;;  %v2329_v63 = vmul.f32 %v8187_v6, %v2208_v2 }
 0x238   : > { %v2546_v35 = vrot.slane %v2544_v45, 7  ;;  %v2552_v62 = vshrl.u32 %v5603_v58, 16  ;;  %v2555_v14 = vshll.u32 %v5603_v58, 16  ;;  %v2370_v20 = vadd.f32 %v8195_v34, %v2331_v51  ;;  %v2853_v58 = vld [vmem:[#allocation2 + $0x14] sm:$0x1] }
 0x239   : > { %v2529_v3 = vrot.slane %v2527_v60, 7  ;;  %v2535_v21 = vshrl.u32 %v5601_v13, 16  ;;  %v2538_v27 = vshll.u32 %v5601_v13, 16  ;;  %v2368_v61 = vadd.f32 %v8195_v34, %v2329_v63 }
 0x23a   : > { %v2549_v10 = vor.u32 %v2547_v37, %v2546_v35  ;;  %v2550_v5 = vrot.slane %v2546_v35, 4  ;;  %v2554_v40 = vrot.slane %v2552_v62, 7  ;;  %v2402_v47 = vmax.f32 %v2370_v20, 0.0 }
 0x23b   : > { %v2532_v55 = vor.u32 %v2530_v15, %v2529_v3  ;;  %v2533_v57 = vrot.slane %v2529_v3, 4  ;;  %v2537_v29 = vrot.slane %v2535_v21, 7  ;;  %v2400_v32 = vmax.f32 %v2368_v61, 0.0  ;;  %v6603_v33 = vpop.f32.mrb[136].mxu0 }
 0x23c   : > { %v2857_v2 = vsel %vm8215_vm9, %v2549_v10, %v2856_v28  ;;  %v2557_v45 = vor.u32 %v2555_v14, %v2554_v40  ;;  %v2559_v37 = vrot.slane %v2554_v40, 4  ;;  %v5606_v51 = vpack.c.bf16 %v2402_v47, %v2402_v47  ;;  %v2223_v60 = vpop.f32.mrb[137].mxu0  ;;  %v6906_v40 = vld [vmem:[#allocation3 + $0x168] sm:$0xff]  }
 0x23d   : > { %2858 = vst [vmem:[#allocation2 + $0x18] sm:$0xf] %v2857_v2  ;;  %v2850_v15 = vsel %vm8215_vm9, %v2532_v55, %v2849_v4  ;;  %v2540_v13 = vor.u32 %v2538_v27, %v2537_v29  ;;  %v2542_v63 = vrot.slane %v2537_v29, 4  ;;  %v5604_v35 = vpack.c.bf16 %v2400_v32, %v2400_v32  ;;  %v6604_v62 = vpop.f32.mrb[138].mxu0  ;;  %v2870_v29 = vld [vmem:[#allocation2 + $0x30] sm:$0xf]  ;;  %6339 = vmatprep.subr.bf16.mxu1 %v6906_v40 }
 0x23e   : > { %2851 = vst [vmem:[#allocation2 + $0xc] sm:$0xf] %v2850_v15  ;;  %v2558_v20 = vsel %vm8222_vm10, %v2550_v5, %v2557_v45  ;;  %v2861_v28 = vsel %vm8002_vm4, %v2559_v37, %v2860_v17  ;;  %v2578_v14 = vshrl.u32 %v5606_v51, 16  ;;  %v2581_v3 = vshll.u32 %v5606_v51, 16  ;;  %v2226_v21 = vpop.f32.mrb[139].mxu0 }
 0x23f   : > { %2859 = vst [vmem:[#allocation2 + $0x1c] sm:$0xf] %v2558_v20  ;;  %2862 = vst [vmem:[#allocation2 + $0x20] sm:$0x1] %v2861_v28  ;;  %v2541_v61 = vsel %vm8222_vm10, %v2533_v57, %v2540_v13  ;;  %v2854_v27 = vsel %vm8002_vm4, %v2542_v63, %v2853_v58  ;;  %v2561_v10 = vshrl.u32 %v5604_v35, 16  ;;  %v2564_v4 = vshll.u32 %v5604_v35, 16 }
 0x240   : > { %2852 = vst [vmem:[#allocation2 + $0x10] sm:$0xf] %v2541_v61  ;;  %2855 = vst [vmem:[#allocation2 + $0x14] sm:$0x1] %v2854_v27  ;;  %v8238_v5 = vrot.slane %v2578_v14, 7  ;;  %v2219_v47 = vadd.f32 %v6600_v41, %v8054_v26  ;;  %v2211_v55 = vadd.f32 %v2210_v50, %v8044_v42  ;;  %v2232_v17 = vadd.f32 %v6603_v33, %v8083_v23  ;;  %v6908_v63 = vld [vmem:[#allocation3 + $0x128] sm:$0xff]  }
 0x241   : > { %v8243_v32 = vrot.slane %v2561_v10, 7  ;;  %v2224_v57 = vadd.f32 %v2223_v60, %v8070_v25  ;;  %v2235_v2 = vadd.f32 %v6604_v62, %v8089_v44  ;;  %v2227_v45 = vadd.f32 %v2226_v21, %v8072_v48  ;;  %v2863_v51 = vld [vmem:[#allocation2 + $0x24] sm:$0xf]  ;;  %6340 = vmatpush3.bf16.msra.mxu1 %v6908_v63 }
 0x242   : > { %v2583_v37 = vor.u32 %v2581_v3, %v8238_v5  ;;  %v2584_v58 = vrot.slane %v8238_v5, 4  ;;  %v2332_v26 = vmul.f32 %v8187_v6, %v2219_v47  ;;  %v2330_v42 = vmul.f32 %v8187_v6, %v2211_v55 }
 0x243   : > { %v2566_v23 = vor.u32 %v2564_v4, %v8243_v32  ;;  %v2567_v41 = vrot.slane %v8243_v32, 4  ;;  %v2335_v25 = vmul.f32 %v8187_v6, %v2232_v17  ;;  %v2333_v44 = vmul.f32 %v8187_v6, %v2224_v57  ;;  %v6607_v50 = vpop.f32.mrb[140].mxu0 }
 0x244   : > { %v2871_v48 = vsel %vm8215_vm9, %v2583_v37, %v2870_v29  ;;  %v2371_v33 = vadd.f32 %v8195_v34, %v2332_v26  ;;  %v2369_v60 = vadd.f32 %v8195_v34, %v2330_v42  ;;  %v2336_v15 = vmul.f32 %v8187_v6, %v2235_v2  ;;  %v2239_v13 = vpop.f32.mrb[141].mxu0  ;;  %v6897_v29 = vld [vmem:[#allocation3 + $0x180] sm:$0xff]  }
 0x245   : > { %2872 = vst [vmem:[#allocation2 + $0x30] sm:$0xf] %v2871_v48  ;;  %v2864_v35 = vsel %vm8215_vm9, %v2566_v23, %v2863_v51  ;;  %v2374_v62 = vadd.f32 %v8195_v34, %v2335_v25  ;;  %v2372_v20 = vadd.f32 %v8195_v34, %v2333_v44  ;;  %v2334_v28 = vmul.f32 %v8187_v6, %v2227_v45  ;;  %v8266_v14 = vpop.f32.mrb[142].mxu0  ;;  %v6904_v51 = vld [vmem:[#allocation3 + $0x1c8] sm:$0xff]  }
 0x246   : > { %2865 = vst [vmem:[#allocation2 + $0x24] sm:$0xf] %v2864_v35  ;;  %v2403_v3 = vmax.f32 %v2371_v33, 0.0  ;;  %v2401_v21 = vmax.f32 %v2369_v60, 0.0  ;;  %v2375_v61 = vadd.f32 %v8195_v34, %v2336_v15  ;;  %v2248_v27 = vadd.f32 %v6607_v50, %v8110_v56  ;;  %v8270_v10 = vpop.f32.mrb[143].mxu0  ;;  %v8279_v25 = vld [vmem:[#allocation2 + $0x18] sm:$0xff]  }
 0x247   : > { %v2406_v4 = vmax.f32 %v2374_v62, 0.0  ;;  %v2404_v40 = vmax.f32 %v2372_v20, 0.0  ;;  %v2373_v47 = vadd.f32 %v8195_v34, %v2334_v28  ;;  %v2240_v55 = vadd.f32 %v2239_v13, %v8096_v16  ;;  %v8274_v17 = vld [vmem:[#allocation2 + $0xc] sm:$0xff]   ;;  %v2874_v33 = vld [vmem:[#allocation2 + $0x38] sm:$0x1]  ;;  %v6905_v20 = vld [vmem:[#allocation3 + $0x188] sm:$0xff]  }
 0x248   : > { %v5607_v57 = vpack.c.bf16 %v2403_v3, %v2403_v3  ;;  %v5605_v2 = vpack.c.bf16 %v2401_v21, %v2401_v21  ;;  %v2407_v45 = vmax.f32 %v2375_v61, 0.0  ;;  %v2339_v37 = vmul.f32 %v8187_v6, %v2248_v27  ;;  %4252 = vmatprep.mubr.bf16.mxu0 %v8274_v17  ;;  %v2867_v60 = vld [vmem:[#allocation2 + $0x2c] sm:$0x1]  ;;  %v2884_v21 = vld [vmem:[#allocation2 + $0x48] sm:$0xf] }
 0x249   : > { %v5610_v26 = vpack.c.bf16 %v2406_v4, %v2406_v4  ;;  %v5608_v56 = vpack.c.bf16 %v2404_v40, %v2404_v40  ;;  %v2405_v42 = vmax.f32 %v2373_v47, 0.0  ;;  %v2337_v23 = vmul.f32 %v8187_v6, %v2240_v55  ;;  %4253 = vmatmul.mubr.bf16.vlgmr.msra.gmra.mrb[160].mxu0 %v8087_v12 }
 0x24a   : > { %v2586_v44 = vshrl.u32 %v5607_v57, 16  ;;  %v2589_v16 = vshll.u32 %v5607_v57, 16  ;;  %v2569_v50 = vshrl.u32 %v5605_v2, 16  ;;  %v2572_v48 = vshll.u32 %v5605_v2, 16  ;;  %4260 = vmatprep.mubr.bf16.mxu0 %v8279_v25  ;;  %6442 = vmatpush3.bf16.msra.mxu0 %v6897_v29  ;;  %v6912_v2 = vld [vmem:[#allocation3 + $0x1d0] sm:$0xff]  }
 0x24b   : > { %v2612_v15 = vshrl.u32 %v5610_v26, 16  ;;  %v2615_v13 = vshll.u32 %v5610_v26, 16  ;;  %v2595_v63 = vshrl.u32 %v5608_v56, 16  ;;  %v2598_v35 = vshll.u32 %v5608_v56, 16  ;;  %v6611_v62 = vpop.f32.mrb[144].mxu0  ;;  %6443 = vmatprep.subr.bf16.mxu0 %v6904_v51 }
 0x24c   : > { %v2588_v28 = vrot.slane %v2586_v44, 7  ;;  %v2571_v3 = vrot.slane %v2569_v50, 7  ;;  %v5611_v61 = vpack.c.bf16 %v2407_v45, %v2407_v45  ;;  %v5609_v27 = vpack.c.bf16 %v2405_v42, %v2405_v42  ;;  %v2255_v4 = vpop.f32.mrb[145].mxu0  ;;  %v2877_v50 = vld [vmem:[#allocation2 + $0x3c] sm:$0xf] }
 0x24d   : > { %v8283_v40 = vrot.slane %v2612_v15, 7  ;;  %v8285_v12 = vrot.slane %v2595_v63, 7  ;;  %v2378_v47 = vadd.f32 %v8195_v34, %v2339_v37  ;;  %v2376_v55 = vadd.f32 %v8195_v34, %v2337_v23  ;;  %v8289_v57 = vpop.f32.mrb[146].mxu0  ;;  %v6913_v23 = vld [vmem:[#allocation3 + $0x190] sm:$0xff]  }
 0x24e   : > { %v2591_v29 = vor.u32 %v2589_v16, %v2588_v28  ;;  %v2593_v26 = vrot.slane %v2588_v28, 4  ;;  %v2574_v56 = vor.u32 %v2572_v48, %v2571_v3  ;;  %v2576_v44 = vrot.slane %v2571_v3, 4  ;;  %v8291_v45 = vpop.f32.mrb[147].mxu0  ;;  %6444 = vmatpush3.bf16.msra.mxu0 %v6905_v20  ;;  %v6914_v63 = vld [vmem:[#allocation3 + $0x170] sm:$0xff]  }
 0x24f   : > { %v2617_v51 = vor.u32 %v2615_v13, %v8283_v40  ;;  %v2618_v42 = vrot.slane %v8283_v40, 4  ;;  %v2600_v15 = vor.u32 %v2598_v35, %v8285_v12  ;;  %v2601_v37 = vrot.slane %v8285_v12, 4  ;;  %6445 = vmatprep.subr.bf16.mxu0 %v6912_v2  ;;  %6341 = vmatprep.subr.bf16.mxu1 %v6914_v63 }
 0x250   : > { %v2592_v16 = vsel %vm8222_vm10, %v2584_v58, %v2591_v29  ;;  %v2875_v48 = vsel %vm8002_vm4, %v2593_v26, %v2874_v33  ;;  %v2575_v13 = vsel %vm8222_vm10, %v2567_v41, %v2574_v56  ;;  %v2868_v35 = vsel %vm8002_vm4, %v2576_v44, %v2867_v60 }
 0x251   : > { %2873 = vst [vmem:[#allocation2 + $0x34] sm:$0xf] %v2592_v16  ;;  %2876 = vst [vmem:[#allocation2 + $0x38] sm:$0x1] %v2875_v48  ;;  %v2885_v5 = vsel %vm8215_vm9, %v2617_v51, %v2884_v21  ;;  %v2878_v58 = vsel %vm8215_vm9, %v2600_v15, %v2877_v50  ;;  %v2620_v33 = vshrl.u32 %v5611_v61, 16  ;;  %v2623_v20 = vshll.u32 %v5611_v61, 16 }
 0x252   : > { %2866 = vst [vmem:[#allocation2 + $0x28] sm:$0xf] %v2575_v13  ;;  %2869 = vst [vmem:[#allocation2 + $0x2c] sm:$0x1] %v2868_v35  ;;  %v2603_v32 = vshrl.u32 %v5609_v27, 16  ;;  %v2606_v41 = vshll.u32 %v5609_v27, 16  ;;  %v2251_v40 = vadd.f32 %v8266_v14, %v8112_v53  ;;  %v2243_v12 = vadd.f32 %v8270_v10, %v8102_v7  ;;  %6446 = vmatpush3.bf16.msra.mxu0 %v6913_v23 }
 0x253   : > { %2886 = vst [vmem:[#allocation2 + $0x48] sm:$0xf] %v2885_v5  ;;  %2879 = vst [vmem:[#allocation2 + $0x3c] sm:$0xf] %v2878_v58  ;;  %v2410_v28 = vmax.f32 %v2378_v47, 0.0  ;;  %v2408_v60 = vmax.f32 %v2376_v55, 0.0  ;;  %v2264_v21 = vadd.f32 %v6611_v62, %v8124_v18  ;;  %v2256_v27 = vadd.f32 %v2255_v4, %v8116_v59 }
 0x254   : > { %v2622_v3 = vrot.slane %v2620_v33, 7  ;;  %v8318_v2 = vpop.f32.mrb[148].mxu0  ;;  %v2888_v61 = vld [vmem:[#allocation2 + $0x50] sm:$0x1]  ;;  %v2605_v29 = vrot.slane %v2603_v32, 7  ;;  %v6916_v55 = vld [vmem:[#allocation3 + $0x130] sm:$0xff]   ;;  %v2340_v14 = vmul.f32 %v8187_v6, %v2251_v40  ;;  %v2338_v7 = vmul.f32 %v8187_v6, %v2243_v12 }
 0x255   : > { %v5614_v26 = vpack.c.bf16 %v2410_v28, %v2410_v28  ;;  %v5612_v56 = vpack.c.bf16 %v2408_v60, %v2408_v60  ;;  %v8321_v47 = vpop.f32.mrb[149].mxu0  ;;  %v2881_v53 = vld [vmem:[#allocation2 + $0x44] sm:$0x1]  ;;  %6342 = vmatpush3.bf16.msra.mxu1 %v6916_v55  ;;  %v2341_v32 = vmul.f32 %v8187_v6, %v2256_v27  ;;  %v2891_v28 = vld [vmem:[#allocation2 + $0x54] sm:$0xf] }
 0x256   : > { %v2625_v44 = vor.u32 %v2623_v20, %v2622_v3  ;;  %v2627_v50 = vrot.slane %v2622_v3, 4  ;;  %v8325_v18 = vpop.f32.mrb[150].mxu0  ;;  %v2608_v10 = vor.u32 %v2606_v41, %v2605_v29  ;;  %v2610_v62 = vrot.slane %v2605_v29, 4 }
 0x257   : > { %v2646_v51 = vshrl.u32 %v5614_v26, 16  ;;  %v2649_v15 = vshll.u32 %v5614_v26, 16  ;;  %v8327_v23 = vpop.f32.mrb[151].mxu0  ;;  %v2629_v63 = vshrl.u32 %v5612_v56, 16  ;;  %v2632_v16 = vshll.u32 %v5612_v56, 16 }
 0x258   : > { %v2626_v59 = vsel %vm8222_vm10, %v2618_v42, %v2625_v44  ;;  %v2889_v4 = vsel %vm8002_vm4, %v2627_v50, %v2888_v61  ;;  %v2609_v48 = vsel %vm8222_vm10, %v2601_v37, %v2608_v10  ;;  %v2882_v13 = vsel %vm8002_vm4, %v2610_v62, %v2881_v53  ;;  %v2898_v42 = vld [vmem:[#allocation2 + $0x60] sm:$0xf]  ;;  %v6921_v10 = vld [vmem:[#allocation3 + $0x198] sm:$0xff]  }
 0x259   : > { %2887 = vst [vmem:[#allocation2 + $0x4c] sm:$0xf] %v2626_v59  ;;  %2890 = vst [vmem:[#allocation2 + $0x50] sm:$0x1] %v2889_v4  ;;  %v8337_v35 = vrot.slane %v2646_v51, 7  ;;  %v2379_v5 = vadd.f32 %v8195_v34, %v2340_v14  ;;  %v8340_v58 = vrot.slane %v2629_v63, 7  ;;  %v2377_v33 = vadd.f32 %v8195_v34, %v2338_v7 }
 0x25a   : > { %2880 = vst [vmem:[#allocation2 + $0x40] sm:$0xf] %v2609_v48  ;;  %2883 = vst [vmem:[#allocation2 + $0x44] sm:$0x1] %v2882_v13  ;;  %v2343_v20 = vmul.f32 %v8187_v6, %v2264_v21  ;;  %v2267_v3 = vadd.f32 %v8289_v57, %v8128_v46  ;;  %v2380_v27 = vadd.f32 %v8195_v34, %v2341_v32  ;;  %v6920_v7 = vld [vmem:[#allocation3 + $0x1d8] sm:$0xff]  }
 0x25b   : > { %v2651_v37 = vor.u32 %v2649_v15, %v8337_v35  ;;  %v2652_v41 = vrot.slane %v8337_v35, 4  ;;  %v2411_v60 = vmax.f32 %v2379_v5, 0.0  ;;  %v2634_v40 = vor.u32 %v2632_v16, %v8340_v58  ;;  %v8352_v26 = vpop.f32.mrb[152].mxu0  ;;  %v2902_v63 = vld [vmem:[#allocation2 + $0x68] sm:$0x1]  ;;  %6447 = vmatprep.subr.bf16.mxu0 %v6920_v7 }
 0x25c   : > { %v2635_v12 = vrot.slane %v8340_v58, 4  ;;  %v2409_v61 = vmax.f32 %v2377_v33, 0.0  ;;  %v2382_v29 = vadd.f32 %v8195_v34, %v2343_v20  ;;  %v2344_v55 = vmul.f32 %v8187_v6, %v2267_v3  ;;  %v8358_v44 = vpop.f32.mrb[153].mxu0  ;;  %v2895_v5 = vld [vmem:[#allocation2 + $0x5c] sm:$0x1]  ;;  %6448 = vmatpush3.bf16.msra.mxu0 %v6921_v10 }
 0x25d   : > { %v2899_v21 = vsel %vm8215_vm9, %v2651_v37, %v2898_v42  ;;  %v5615_v56 = vpack.c.bf16 %v2411_v60, %v2411_v60  ;;  %v2892_v46 = vsel %vm8215_vm9, %v2634_v40, %v2891_v28  ;;  %v2259_v53 = vadd.f32 %v8291_v45, %v8120_v49  ;;  %v8364_v14 = vpop.f32.mrb[154].mxu0  ;;  %v6922_v49 = vld [vmem:[#allocation3 + $0x178] sm:$0xff]   ;;  %v2912_v40 = vld [vmem:[#allocation2 + $0x78] sm:$0xf]  ;;  %v2905_v10 = vld [vmem:[#allocation2 + $0x6c] sm:$0xf] }
 0x25e   : > { %2900 = vst [vmem:[#allocation2 + $0x60] sm:$0xf] %v2899_v21  ;;  %v5613_v57 = vpack.c.bf16 %v2409_v61, %v2409_v61  ;;  %v2414_v50 = vmax.f32 %v2382_v29, 0.0  ;;  %2893 = vst [vmem:[#allocation2 + $0x54] sm:$0xf] %v2892_v46  ;;  %v2412_v15 = vmax.f32 %v2380_v27, 0.0  ;;  %v2383_v59 = vadd.f32 %v8195_v34, %v2344_v55  ;;  %6343 = vmatprep.subr.bf16.mxu1 %v6922_v49 }
 0x25f   : > { %v2654_v62 = vshrl.u32 %v5615_v56, 16  ;;  %v2657_v51 = vshll.u32 %v5615_v56, 16  ;;  %v8367_v4 = vpop.f32.mrb[155].mxu0  ;;  %v2342_v35 = vmul.f32 %v8187_v6, %v2259_v53  ;;  %v3172_v33 = vshrl.u32 %v8274_v17, 16 }
 0x260   : > { %v2637_v16 = vshrl.u32 %v5613_v57, 16  ;;  %v2640_v48 = vshll.u32 %v5613_v57, 16  ;;  %v5618_v13 = vpack.c.bf16 %v2414_v50, %v2414_v50  ;;  %v5616_v42 = vpack.c.bf16 %v2412_v15, %v2412_v15  ;;  %v8372_v21 = vld [vmem:[#allocation2 + $0x14] ss:$0 sps:$4 sm:$0x11]  }
 0x261   : > { %v2656_v45 = vrot.slane %v2654_v62, 7  ;;  %v2415_v58 = vmax.f32 %v2383_v59, 0.0  ;;  %v2381_v28 = vadd.f32 %v8195_v34, %v2342_v35 }
 0x262   : > { %v2639_v20 = vrot.slane %v2637_v16, 7  ;;  %v2680_v32 = vshrl.u32 %v5618_v13, 16  ;;  %v2683_v37 = vshll.u32 %v5618_v13, 16  ;;  %v2663_v61 = vshrl.u32 %v5616_v42, 16 }
 0x263   : > { %v2659_v60 = vor.u32 %v2657_v51, %v2656_v45  ;;  %v2661_v3 = vrot.slane %v2656_v45, 4  ;;  %v2666_v29 = vshll.u32 %v5616_v42, 16  ;;  %v5619_v46 = vpack.c.bf16 %v2415_v58, %v2415_v58  ;;  %v8374_v57 = vpop.f32.mrb[156].mxu0  ;;  %v6925_v58 = vld [vmem:[#allocation3 + $0x1e0] sm:$0xff]  }
 0x264   : > { %v2642_v56 = vor.u32 %v2640_v48, %v2639_v20  ;;  %v2644_v27 = vrot.slane %v2639_v20, 4  ;;  %v2682_v55 = vrot.slane %v2680_v32, 7  ;;  %v8380_v7 = vrot.slane %v2663_v61, 7  ;;  %v8382_v51 = vpop.f32.mrb[157].mxu0  ;;  %6449 = vmatprep.subr.bf16.mxu0 %v6925_v58 }
 0x265   : > { %v2660_v50 = vsel %vm8222_vm10, %v2652_v41, %v2659_v60  ;;  %v2903_v53 = vsel %vm8002_vm4, %v2661_v3, %v2902_v63  ;;  %v2413_v62 = vmax.f32 %v2381_v28, 0.0  ;;  %v8388_v41 = vld [vmem:[#allocation2 + $0x20] ss:$0 sps:$4 sm:$0x11]   ;;  %v8390_v13 = vpop.f32.mrb[158].mxu0  ;;  %v2688_v49 = vshrl.u32 %v5619_v46, 16 }
 0x266   : > { %2901 = vst [vmem:[#allocation2 + $0x64] sm:$0xf] %v2660_v50  ;;  %2904 = vst [vmem:[#allocation2 + $0x68] sm:$0x1] %v2903_v53  ;;  %v2643_v15 = vsel %vm8222_vm10, %v2635_v12, %v2642_v56  ;;  %v2896_v59 = vsel %vm8002_vm4, %v2644_v27, %v2895_v5  ;;  %v2685_v16 = vor.u32 %v2683_v37, %v2682_v55  ;;  %v2686_v48 = vrot.slane %v2682_v55, 4  ;;  %v8394_v42 = vpop.f32.mrb[159].mxu0 }
 0x267   : > { %2894 = vst [vmem:[#allocation2 + $0x58] sm:$0xf] %v2643_v15  ;;  %2897 = vst [vmem:[#allocation2 + $0x5c] sm:$0x1] %v2896_v59  ;;  %v2668_v63 = vor.u32 %v2666_v29, %v8380_v7  ;;  %v2669_v35 = vrot.slane %v8380_v7, 4  ;;  %v2691_v45 = vshll.u32 %v5619_v46, 16  ;;  %v5617_v20 = vpack.c.bf16 %v2413_v62, %v2413_v62 }
 0x268   : > { %v6924_v12 = vld [vmem:[#allocation3 + $0x138] sm:$0xff]   ;;  %v2913_v5 = vsel %vm8215_vm9, %v2685_v16, %v2912_v40  ;;  %v3174_v32 = vshll.u32 %v8274_v17, 16  ;;  %v3179_v37 = vshll.u32 %v8372_v21, 16  ;;  %v6927_v28 = vld [vmem:[#allocation3 + $0x1a0] sm:$0xff]   ;;  %v6928_v60 = vld [vmem:[#allocation3 + $0x1e8] sm:$0xff]   ;;  %v2690_v61 = vrot.slane %v2688_v49, 7 }
 0x269   : > { %2914 = vst [vmem:[#allocation2 + $0x78] sm:$0xf] %v2913_v5  ;;  %v2906_v3 = vsel %vm8215_vm9, %v2668_v63, %v2905_v10  ;;  %v2916_v29 = vld [vmem:[#allocation2 + $0x80] sm:$0x1]  ;;  %v2280_v56 = vadd.f32 %v8318_v2, %v8146_v19  ;;  %v3184_v27 = vshrl.u32 %v8279_v25, 16  ;;  %6344 = vmatpush3.bf16.msra.mxu1 %v6924_v12  ;;  %v2671_v40 = vshrl.u32 %v5617_v20, 16  ;;  %6450 = vmatpush3.bf16.msra.mxu0 %v6927_v28 }
 0x26a   : > { %2907 = vst [vmem:[#allocation2 + $0x6c] sm:$0xf] %v2906_v3  ;;  %v2674_v55 = vshll.u32 %v5617_v20, 16  ;;  %v3176_v46 = vrot.slane %v3174_v32, 1  ;;  %v3181_v50 = vrot.slane %v3179_v37, 1  ;;  %v6929_v53 = vld [vmem:[#allocation3 + $0x1a8] sm:$0xff]   ;;  %v2693_v7 = vor.u32 %v2691_v45, %v2690_v61  ;;  %6451 = vmatprep.subr.bf16.mxu0 %v6928_v60 }
 0x26b   : > { %v2695_v62 = vrot.slane %v2690_v61, 4  ;;  %v2347_v10 = vmul.f32 %v8187_v6, %v2280_v56  ;;  %v3186_v15 = vshll.u32 %v8279_v25, 16  ;;  %v2673_v59 = vrot.slane %v2671_v40, 7  ;;  %v2909_v19 = vld [vmem:[#allocation2 + $0x74] sm:$0x1]  ;;  %v8419_v37 = vld [vmem:[#allocation2 + $0x24] sm:$0xff]  }
 0x26c   : > { %v3177_v2 = vor.u32 %v3176_v46, %v3172_v33  ;;  %v3191_v16 = vshll.u32 %v8388_v41, 16  ;;  %v3370_v63 = vrot.slane %v8274_v17, 1  ;;  %v2694_v49 = vsel %vm8222_vm10, %v2686_v48, %v2693_v7  ;;  %v6930_v28 = vld [vmem:[#allocation3 + $0x1f0] sm:$0xff]  }
 0x26d   : > { %v2917_v45 = vsel %vm8002_vm4, %v2695_v62, %v2916_v29  ;;  %v2386_v12 = vadd.f32 %v8195_v34, %v2347_v10  ;;  %v3188_v58 = vrot.slane %v3186_v15, 1  ;;  %2915 = vst [vmem:[#allocation2 + $0x7c] sm:$0xf] %v2694_v49  ;;  %v2676_v5 = vor.u32 %v2674_v55, %v2673_v59  ;;  %6452 = vmatpush3.bf16.msra.mxu0 %v6929_v53  ;;  %v6931_v29 = vld [vmem:[#allocation3 + $0x1b0] sm:$0xff]   ;;  %v6933_v15 = vld [vmem:[#allocation3 + $0x1b8] sm:$0xff]  }
 0x26e   : > { %2918 = vst [vmem:[#allocation2 + $0x80] sm:$0x1] %v2917_v45  ;;  %v2678_v20 = vrot.slane %v2673_v59, 4  ;;  %v8417_v32 = vsel %vm611_vm0, %v3177_v2, %v3181_v50  ;;  %v3193_v33 = vrot.slane %v3191_v16, 1  ;;  %v3371_v3 = vrot.slane %v8372_v21, 1  ;;  %v6932_v21 = vld [vmem:[#allocation3 + $0x1f8] sm:$0xff]   ;;  %6453 = vmatprep.subr.bf16.mxu0 %v6930_v28 }
 0x26f   : > { %4099 = vmatprep.mubr.bf16.mxu1 %v8417_v32  ;;  %v2418_v48 = vmax.f32 %v2386_v12, 0.0  ;;  %v3189_v60 = vor.u32 %v3188_v58, %v3184_v27  ;;  %v2272_v61 = vadd.f32 %v8321_v47, %v8134_v22  ;;  %v2677_v56 = vsel %vm8222_vm10, %v2669_v35, %v2676_v5  ;;  %v8434_v46 = vld [vmem:[#allocation2 + $0x2c] ss:$0 sps:$4 sm:$0x11]   ;;  %v8450_v50 = vld [vmem:[#allocation3 + $0x200] sm:$0xff]  }
 0x270   : > { %v2910_v40 = vsel %vm8002_vm4, %v2678_v20, %v2909_v19  ;;  %4100 = vmatmul.mubr.bf16.gmra.mrb[132].mxu1 %v8274_v17  ;;  %v2283_v55 = vadd.f32 %v8325_v18, %v8148_v8  ;;  %v2275_v27 = vadd.f32 %v8327_v23, %v8140_v54  ;;  %2908 = vst [vmem:[#allocation2 + $0x70] sm:$0xf] %v2677_v56  ;;  %v3196_v23 = vshrl.u32 %v8419_v37, 16  ;;  %v2926_v59 = vld [vmem:[#allocation2 + $0x90] sm:$0xf] }
 0x271   : > { %2911 = vst [vmem:[#allocation2 + $0x74] sm:$0x1] %v2910_v40  ;;  %v5622_v22 = vpack.c.bf16 %v2418_v48, %v2418_v48  ;;  %v8437_v47 = vsel %vm611_vm0, %v3189_v60, %v3193_v33  ;;  %v8440_v35 = vsel %vm820_vm1, %v3370_v63, %v3371_v3  ;;  %v2345_v17 = vmul.f32 %v8187_v6, %v2272_v61 }
 0x272   : > { %4107 = vmatprep.mubr.bf16.mxu1 %v8437_v47  ;;  %4261 = vmatmul.mubr.bf16.gmra.mrb[164].mxu0 %v8440_v35  ;;  %v2348_v54 = vmul.f32 %v8187_v6, %v2283_v55  ;;  %v2346_v8 = vmul.f32 %v8187_v6, %v2275_v27  ;;  %v2296_v18 = vadd.f32 %v8352_v26, %v8166_v38  ;;  %v3198_v10 = vshll.u32 %v8419_v37, 16 }
 0x273   : > { %v2714_v53 = vshrl.u32 %v5622_v22, 16  ;;  %v2717_v7 = vshll.u32 %v5622_v22, 16  ;;  %v2384_v62 = vadd.f32 %v8195_v34, %v2345_v17  ;;  %4268 = vmatprep.mubr.bf16.mxu0 %v8419_v37  ;;  %6454 = vmatpush3.bf16.msra.mxu0 %v6931_v29  ;;  %v3203_v26 = vshll.u32 %v8434_v46, 16 }
 0x274   : > { %v2387_v19 = vadd.f32 %v8195_v34, %v2348_v54  ;;  %v2385_v2 = vadd.f32 %v8195_v34, %v2346_v8  ;;  %v2351_v38 = vmul.f32 %v8187_v6, %v2296_v18  ;;  %6455 = vmatprep.subr.bf16.mxu0 %v6932_v21  ;;  %6625 = vmatprep.subr.bf16.mxu1 %v8450_v50  ;;  %v3200_v49 = vrot.slane %v3198_v10, 1 }
 0x275   : > { %v2716_v16 = vrot.slane %v2714_v53, 7  ;;  %v2416_v63 = vmax.f32 %v2384_v62, 0.0  ;;  %v3373_v45 = vrot.slane %v8279_v25, 1  ;;  %v3205_v20 = vrot.slane %v3203_v26, 1  ;;  %v2919_v53 = vld [vmem:[#allocation2 + $0x84] sm:$0xf] }
 0x276   : > { %v2419_v12 = vmax.f32 %v2387_v19, 0.0  ;;  %v2417_v58 = vmax.f32 %v2385_v2, 0.0  ;;  %v2390_v5 = vadd.f32 %v8195_v34, %v2351_v38  ;;  %v3201_v60 = vor.u32 %v3200_v49, %v3196_v23  ;;  %v8475_v23 = vld [vmem:[#allocation2 + $0x30] sm:$0xff]   ;;  %v2930_v62 = vld [vmem:[#allocation2 + $0x98] sm:$0x1] }
 0x277   : > { %v2719_v33 = vor.u32 %v2717_v7, %v2716_v16  ;;  %v2720_v28 = vrot.slane %v2716_v16, 4  ;;  %v5620_v48 = vpack.c.bf16 %v2416_v63, %v2416_v63  ;;  %6456 = vmatpush3.bf16.msra.mxu0 %v6933_v15  ;;  %v3374_v56 = vrot.slane %v8388_v41, 1  ;;  %v2923_v38 = vld [vmem:[#allocation2 + $0x8c] sm:$0x1] }
 0x278   : > { %v5623_v3 = vpack.c.bf16 %v2419_v12, %v2419_v12  ;;  %v5621_v61 = vpack.c.bf16 %v2417_v58, %v2417_v58  ;;  %4108 = vmatmul.mubr.bf16.gmra.mrb[136].mxu1 %v8279_v25  ;;  %v2422_v29 = vmax.f32 %v2390_v5, 0.0  ;;  %v8467_v34 = vsel %vm611_vm0, %v3201_v60, %v3205_v20 }
 0x279   : > { %v2927_v40 = vsel %vm8215_vm9, %v2719_v33, %v2926_v59  ;;  %v2697_v55 = vshrl.u32 %v5620_v48, 16  ;;  %v2700_v27 = vshll.u32 %v5620_v48, 16  ;;  %4115 = vmatprep.mubr.bf16.mxu1 %v8467_v34  ;;  %v8471_v18 = vsel %vm820_vm1, %v3373_v45, %v3374_v56  ;;  %v2940_v33 = vld [vmem:[#allocation2 + $0xa8] sm:$0xf]  ;;  %v8505_v48 = vld [vmem:[%s9334_s4] ss:$0 sm:$0xff] }
 0x27a   : > { %2928 = vst [vmem:[#allocation2 + $0x90] sm:$0xf] %v2927_v40  ;;  %v2722_v21 = vshrl.u32 %v5623_v3, 16  ;;  %v2725_v22 = vshll.u32 %v5623_v3, 16  ;;  %v2705_v17 = vshrl.u32 %v5621_v61, 16  ;;  %v2708_v54 = vshll.u32 %v5621_v61, 16  ;;  %4269 = vmatmul.mubr.bf16.gmra.mrb[168].mxu0 %v8471_v18 }
 0x27b   : > { %v2699_v8 = vrot.slane %v2697_v55, 7  ;;  %v5626_v25 = vpack.c.bf16 %v2422_v29, %v2422_v29  ;;  %v2288_v41 = vadd.f32 %v8358_v44, %v8156_v39  ;;  %v2299_v15 = vadd.f32 %v8364_v14, %v8170_v52  ;;  %4276 = vmatprep.mubr.bf16.mxu0 %v8475_v23  ;;  %v8489_v14 = vld [vmem:[#allocation2 + $0x38] ss:$0 sps:$4 sm:$0x11]   ;;  %v8512_v61 = vld [vmem:[%s9333_s3] ss:$0 sm:$0xff] }
 0x27c   : > { %v2724_v7 = vrot.slane %v2722_v21, 7  ;;  %v2707_v10 = vrot.slane %v2705_v17, 7  ;;  %v2291_v59 = vadd.f32 %v8367_v4, %v8160_v0  ;;  %v2312_v56 = vadd.f32 %v8374_v57, %v8182_v30 }
 0x27d   : > { %v2702_v19 = vor.u32 %v2700_v27, %v2699_v8  ;;  %v2703_v2 = vrot.slane %v2699_v8, 4  ;;  %v2748_v26 = vshrl.u32 %v5626_v25, 16  ;;  %v2751_v16 = vshll.u32 %v5626_v25, 16 }
 0x27e   : > { %v2727_v39 = vor.u32 %v2725_v22, %v2724_v7  ;;  %v2729_v44 = vrot.slane %v2724_v7, 4  ;;  %v2710_v63 = vor.u32 %v2708_v54, %v2707_v10  ;;  %v2712_v49 = vrot.slane %v2707_v10, 4 }
 0x27f   : > { %v2920_v45 = vsel %vm8215_vm9, %v2702_v19, %v2919_v53  ;;  %v8485_v12 = vrot.slane %v2748_v26, 7  ;;  %v2349_v52 = vmul.f32 %v8187_v6, %v2288_v41  ;;  %v2352_v0 = vmul.f32 %v8187_v6, %v2299_v15 }
 0x280   : > { %2921 = vst [vmem:[#allocation2 + $0x84] sm:$0xf] %v2920_v45  ;;  %v2728_v4 = vsel %vm8222_vm10, %v2720_v28, %v2727_v39  ;;  %v2931_v58 = vsel %vm8002_vm4, %v2729_v44, %v2930_v62  ;;  %v2711_v5 = vsel %vm8222_vm10, %v2703_v2, %v2710_v63  ;;  %v2924_v20 = vsel %vm8002_vm4, %v2712_v49, %v2923_v38  ;;  %v2933_v45 = vld [vmem:[#allocation2 + $0x9c] sm:$0xf] }
 0x281   : > { %4116 = vmatmul.mubr.bf16.gmra.mrb[140].mxu1 %v8419_v37  ;;  %2929 = vst [vmem:[#allocation2 + $0x94] sm:$0xf] %v2728_v4  ;;  %2932 = vst [vmem:[#allocation2 + $0x98] sm:$0x1] %v2931_v58  ;;  %v2753_v6 = vor.u32 %v2751_v16, %v8485_v12  ;;  %v2754_v28 = vrot.slane %v8485_v12, 4  ;;  %v2388_v60 = vadd.f32 %v8505_v48, %v2349_v52  ;;  %v3208_v40 = vshrl.u32 %v8475_v23, 16 }
 0x282   : > { %2922 = vst [vmem:[#allocation2 + $0x88] sm:$0xf] %v2711_v5  ;;  %2925 = vst [vmem:[#allocation2 + $0x8c] sm:$0x1] %v2924_v20  ;;  %v2391_v3 = vadd.f32 %v8505_v48, %v2352_v0  ;;  %v2350_v29 = vmul.f32 %v8512_v61, %v2291_v59  ;;  %v3210_v55 = vshll.u32 %v8475_v23, 16  ;;  %v3215_v17 = vshll.u32 %v8489_v14, 16 }
 0x283   : > { %v2941_v27 = vsel %vm8215_vm9, %v2753_v6, %v2940_v33  ;;  %v2420_v21 = vmax.f32 %v2388_v60, 0.0  ;;  %v2355_v8 = vmul.f32 %v8512_v61, %v2312_v56  ;;  %v3376_v41 = vrot.slane %v8419_v37, 1  ;;  %v2944_v52 = vld [vmem:[#allocation2 + $0xb0] sm:$0x1] }
 0x284   : > { %v2423_v22 = vmax.f32 %v2391_v3, 0.0  ;;  %2942 = vst [vmem:[#allocation2 + $0xa8] sm:$0xf] %v2941_v27  ;;  %v2389_v54 = vadd.f32 %v8505_v48, %v2350_v29  ;;  %v3212_v25 = vrot.slane %v3210_v55, 1  ;;  %v3217_v53 = vrot.slane %v3215_v17, 1 }
 0x285   : > { %v5624_v30 = vpack.c.bf16 %v2420_v21, %v2420_v21  ;;  %v3377_v7 = vrot.slane %v8434_v46, 1  ;;  %v2394_v10 = vadd.f32 %v8505_v48, %v2355_v8  ;;  %v2304_v59 = vadd.f32 %v8382_v51, %v8176_v1  ;;  %v8535_v46 = vld [vmem:[#allocation2 + $0x3c] sm:$0xff]  }
 0x286   : > { %v5627_v57 = vpack.c.bf16 %v2423_v22, %v2423_v22  ;;  %v2421_v62 = vmax.f32 %v2389_v54, 0.0  ;;  %v3213_v15 = vor.u32 %v3212_v25, %v3208_v40  ;;  %v2315_v51 = vadd.f32 %v8390_v13, %v8189_v24  ;;  %v8556_v54 = vld [vmem:[#allocation2 + $0x44] ss:$0 sps:$4 sm:$0x11]   ;;  %v2954_v8 = vld [vmem:[#allocation2 + $0xc0] sm:$0xf] }
 0x287   : > { %v2731_v19 = vshrl.u32 %v5624_v30, 16  ;;  %v2734_v2 = vshll.u32 %v5624_v30, 16  ;;  %v2426_v39 = vmax.f32 %v2394_v10, 0.0  ;;  %v8533_v63 = vsel %vm820_vm1, %v3376_v41, %v3377_v7 }
 0x288   : > { %v2756_v38 = vshrl.u32 %v5627_v57, 16  ;;  %v2759_v26 = vshll.u32 %v5627_v57, 16  ;;  %v5625_v16 = vpack.c.bf16 %v2421_v62, %v2421_v62  ;;  %v8530_v44 = vsel %vm611_vm0, %v3213_v15, %v3217_v53  ;;  %4277 = vmatmul.mubr.bf16.gmra.mrb[172].mxu0 %v8533_v63 }
 0x289   : > { %v2733_v49 = vrot.slane %v2731_v19, 7  ;;  %4123 = vmatprep.mubr.bf16.mxu1 %v8530_v44  ;;  %v2353_v1 = vmul.f32 %v8512_v61, %v2304_v59  ;;  %v5630_v58 = vpack.c.bf16 %v2426_v39, %v2426_v39  ;;  %4284 = vmatprep.mubr.bf16.mxu0 %v8535_v46  ;;  %v2307_v5 = vadd.f32 %v8394_v42, %v8178_v9  ;;  %v2937_v42 = vld [vmem:[#allocation2 + $0xa4] sm:$0x1] }
 0x28a   : > { %v2758_v12 = vrot.slane %v2756_v38, 7  ;;  %v2739_v0 = vshrl.u32 %v5625_v16, 16  ;;  %v2742_v4 = vshll.u32 %v5625_v16, 16  ;;  %4124 = vmatmul.mubr.bf16.gmra.mrb[144].mxu1 %v8475_v23  ;;  %v2356_v55 = vmul.f32 %v8512_v61, %v2315_v51  ;;  %v8575_v16 = vld [vmem:[#allocation2 + $0x50] ss:$0 sps:$4 sm:$0x11]  }
 0x28b   : > { %v2736_v20 = vor.u32 %v2734_v2, %v2733_v49  ;;  %v2737_v33 = vrot.slane %v2733_v49, 4  ;;  %v2782_v29 = vshrl.u32 %v5630_v58, 16  ;;  %v2785_v56 = vshll.u32 %v5630_v58, 16 }
 0x28c   : > { %v2761_v6 = vor.u32 %v2759_v26, %v2758_v12  ;;  %v2763_v60 = vrot.slane %v2758_v12, 4  ;;  %v2741_v3 = vrot.slane %v2739_v0, 7  ;;  %v2392_v40 = vadd.f32 %v8505_v48, %v2353_v1 }
 0x28d   : > { %v2934_v24 = vsel %vm8215_vm9, %v2736_v20, %v2933_v45  ;;  %v8554_v22 = vrot.slane %v2782_v29, 7  ;;  %v2395_v25 = vadd.f32 %v8505_v48, %v2356_v55  ;;  %v3222_v41 = vshll.u32 %v8535_v46, 16  ;;  %v2958_v20 = vld [vmem:[#allocation2 + $0xc8] sm:$0x1]  ;;  %v8590_v29 = vld [vmem:[#allocation2 + $0x54] sm:$0xff]  }
 0x28e   : > { %v2762_v13 = vsel %vm8222_vm10, %v2754_v28, %v2761_v6  ;;  %v2945_v9 = vsel %vm8002_vm4, %v2763_v60, %v2944_v52  ;;  %2935 = vst [vmem:[#allocation2 + $0x9c] sm:$0xf] %v2934_v24  ;;  %v2744_v27 = vor.u32 %v2742_v4, %v2741_v3  ;;  %v2746_v21 = vrot.slane %v2741_v3, 4  ;;  %v2947_v52 = vld [vmem:[#allocation2 + $0xb4] sm:$0xf] }
 0x28f   : > { %2943 = vst [vmem:[#allocation2 + $0xac] sm:$0xf] %v2762_v13  ;;  %2946 = vst [vmem:[#allocation2 + $0xb0] sm:$0x1] %v2945_v9  ;;  %v2424_v17 = vmax.f32 %v2392_v40, 0.0  ;;  %v2354_v28 = vmul.f32 %v8512_v61, %v2307_v5  ;;  %v2787_v53 = vor.u32 %v2785_v56, %v8554_v22  ;;  %v3220_v7 = vshrl.u32 %v8535_v46, 16 }
 0x290   : > { %v2745_v30 = vsel %vm8222_vm10, %v2737_v33, %v2744_v27  ;;  %v2938_v57 = vsel %vm8002_vm4, %v2746_v21, %v2937_v42  ;;  %v2427_v10 = vmax.f32 %v2395_v25, 0.0  ;;  %v3224_v59 = vrot.slane %v3222_v41, 1  ;;  %v8568_v61 = vld [vmem:[#allocation2 + $0x48] sm:$0xff]   ;;  %v8592_v56 = vld [vmem:[#allocation2 + $0x5c] ss:$0 sps:$4 sm:$0x11]  }
 0x291   : > { %2936 = vst [vmem:[#allocation2 + $0xa0] sm:$0xf] %v2745_v30  ;;  %2939 = vst [vmem:[#allocation2 + $0xa4] sm:$0x1] %v2938_v57  ;;  %v5628_v62 = vpack.c.bf16 %v2424_v17, %v2424_v17  ;;  %v2393_v15 = vadd.f32 %v8505_v48, %v2354_v28  ;;  %v2955_v19 = vsel %vm8215_vm9, %v2787_v53, %v2954_v8  ;;  %v3227_v2 = vshll.u32 %v8556_v54, 16 }
 0x292   : > { %v3379_v38 = vrot.slane %v8475_v23, 1  ;;  %v3380_v26 = vrot.slane %v8489_v14, 1  ;;  %v2788_v39 = vrot.slane %v8554_v22, 4  ;;  %2956 = vst [vmem:[#allocation2 + $0xc0] sm:$0xf] %v2955_v19  ;;  %v5631_v45 = vpack.c.bf16 %v2427_v10, %v2427_v10 }
 0x293   : > { %v2765_v49 = vshrl.u32 %v5628_v62, 16  ;;  %v2425_v48 = vmax.f32 %v2393_v15, 0.0  ;;  %v2768_v12 = vshll.u32 %v5628_v62, 16  ;;  %v3225_v1 = vor.u32 %v3224_v59, %v3220_v7  ;;  %v2951_v28 = vld [vmem:[#allocation2 + $0xbc] sm:$0x1]  ;;  %v8603_v7 = vld [vmem:[#allocation2 + $0x60] sm:$0xff]  }
 0x294   : > { %v3229_v51 = vrot.slane %v3227_v2, 1  ;;  %v8579_v0 = vsel %vm820_vm1, %v3379_v38, %v3380_v26  ;;  %v2790_v58 = vshrl.u32 %v5631_v45, 16  ;;  %v3232_v14 = vshrl.u32 %v8568_v61, 16 }
 0x295   : > { %v2767_v4 = vrot.slane %v2765_v49, 7  ;;  %v5629_v5 = vpack.c.bf16 %v2425_v48, %v2425_v48  ;;  %4285 = vmatmul.mubr.bf16.gmra.mrb[176].mxu0 %v8579_v0  ;;  %v3234_v6 = vshll.u32 %v8568_v61, 16  ;;  %v3239_v60 = vshll.u32 %v8575_v16, 16 }
 0x296   : > { %v8584_v33 = vsel %vm611_vm0, %v3225_v1, %v3229_v51  ;;  %4292 = vmatprep.mubr.bf16.mxu0 %v8568_v61  ;;  %v3382_v3 = vrot.slane %v8535_v46, 1  ;;  %v2792_v24 = vrot.slane %v2790_v58, 7  ;;  %v2793_v13 = vshll.u32 %v5631_v45, 16  ;;  %v6894_v45 = vld [vmem:[#allocation2 + $0x68] ss:$0 sps:$4 sm:$0x11]  }
 0x297   : > { %v2770_v40 = vor.u32 %v2768_v12, %v2767_v4  ;;  %v2773_v9 = vshrl.u32 %v5629_v5, 16  ;;  %4131 = vmatprep.mubr.bf16.mxu1 %v8584_v33  ;;  %v2771_v42 = vrot.slane %v2767_v4, 4  ;;  %v2776_v55 = vshll.u32 %v5629_v5, 16  ;;  %v8628_v51 = vld [vmem:[#allocation2 + $0x6c] sm:$0xff]  }
 0x298   : > { %4132 = vmatmul.mubr.bf16.gmra.mrb[148].mxu1 %v8535_v46  ;;  %v3236_v27 = vrot.slane %v3234_v6, 1  ;;  %v3383_v21 = vrot.slane %v8556_v54, 1  ;;  %v2795_v17 = vor.u32 %v2793_v13, %v2792_v24  ;;  %v2797_v8 = vrot.slane %v2792_v24, 4  ;;  %v8644_v13 = vld [vmem:[#allocation2 + $0x78] sm:$0xff]  }
 0x299   : > { %v2948_v22 = vsel %vm8215_vm9, %v2770_v40, %v2947_v52  ;;  %v2775_v25 = vrot.slane %v2773_v9, 7  ;;  %v3241_v30 = vrot.slane %v3239_v60, 1  ;;  %v3246_v53 = vshll.u32 %v8590_v29, 16 }
 0x29a   : > { %2949 = vst [vmem:[#allocation2 + $0xb4] sm:$0xf] %v2948_v22  ;;  %v3237_v41 = vor.u32 %v3236_v27, %v3232_v14  ;;  %v8600_v57 = vsel %vm820_vm1, %v3382_v3, %v3383_v21  ;;  %v2796_v54 = vsel %vm8222_vm10, %v2788_v39, %v2795_v17  ;;  %v2959_v36 = vsel %vm8002_vm4, %v2797_v8, %v2958_v20 }
 0x29b   : > { %v2778_v62 = vor.u32 %v2776_v55, %v2775_v25  ;;  %v2780_v10 = vrot.slane %v2775_v25, 4  ;;  %2957 = vst [vmem:[#allocation2 + $0xc4] sm:$0xf] %v2796_v54  ;;  %2960 = vst [vmem:[#allocation2 + $0xc8] sm:$0x1] %v2959_v36  ;;  %v3244_v59 = vshrl.u32 %v8590_v29, 16 }
 0x29c   : > { %v8610_v15 = vsel %vm611_vm0, %v3237_v41, %v3241_v30  ;;  %v3248_v19 = vrot.slane %v3246_v53, 1  ;;  %v3251_v2 = vshll.u32 %v8592_v56, 16  ;;  %v3258_v48 = vshll.u32 %v8603_v7, 16  ;;  %v8659_v41 = vld [vmem:[#allocation2 + $0x84] sm:$0xff]  }
 0x29d   : > { %v2779_v38 = vsel %vm8222_vm10, %v2771_v42, %v2778_v62  ;;  %v2952_v26 = vsel %vm8002_vm4, %v2780_v10, %v2951_v28  ;;  %4139 = vmatprep.mubr.bf16.mxu1 %v8610_v15  ;;  %4293 = vmatmul.mubr.bf16.gmra.mrb[180].mxu0 %v8600_v57  ;;  %v3385_v12 = vrot.slane %v8568_v61, 1  ;;  %v3386_v52 = vrot.slane %v8575_v16, 1  ;;  %v6899_v16 = vld [vmem:[#allocation2 + $0x74] ss:$0 sps:$4 sm:$0x11]  }
 0x29e   : > { %2950 = vst [vmem:[#allocation2 + $0xb8] sm:$0xf] %v2779_v38  ;;  %2953 = vst [vmem:[#allocation2 + $0xbc] sm:$0x1] %v2952_v26  ;;  %4300 = vmatprep.mubr.bf16.mxu0 %v8590_v29  ;;  %v3249_v39 = vor.u32 %v3248_v19, %v3244_v59  ;;  %v3253_v49 = vrot.slane %v3251_v2, 1  ;;  %v3260_v1 = vrot.slane %v3258_v48, 1 }
 0x29f   : > { %v3256_v4 = vshrl.u32 %v8603_v7, 16  ;;  %v3263_v58 = vshll.u32 %v6894_v45, 16  ;;  %v8633_v5 = vsel %vm820_vm1, %v3385_v12, %v3386_v52  ;;  %v3270_v20 = vshll.u32 %v8628_v51, 16  ;;  %v6907_v59 = vld [vmem:[#allocation2 + $0x8c] ss:$0 sps:$4 sm:$0x11]  }
 0x2a0   : > { %4140 = vmatmul.mubr.bf16.gmra.mrb[152].mxu1 %v8568_v61  ;;  %v8624_v43 = vsel %vm611_vm0, %v3249_v39, %v3253_v49  ;;  %v3388_v3 = vrot.slane %v8590_v29, 1  ;;  %v3389_v40 = vrot.slane %v8592_v56, 1  ;;  %v3268_v9 = vshrl.u32 %v8628_v51, 16  ;;  %v6902_v56 = vld [vmem:[#allocation2 + $0x80] ss:$0 sps:$4 sm:$0x11]  }
 0x2a1   : > { %4147 = vmatprep.mubr.bf16.mxu1 %v8624_v43  ;;  %v3261_v14 = vor.u32 %v3260_v1, %v3256_v4  ;;  %v3265_v6 = vrot.slane %v3263_v58, 1  ;;  %v3272_v24 = vrot.slane %v3270_v20, 1  ;;  %v3275_v42 = vshll.u32 %v6899_v16, 16  ;;  %v8674_v39 = vld [vmem:[#allocation2 + $0x90] sm:$0xff]  }
 0x2a2   : > { %v8649_v55 = vsel %vm820_vm1, %v3388_v3, %v3389_v40  ;;  %v3282_v21 = vshll.u32 %v8644_v13, 16  ;;  %v3391_v8 = vrot.slane %v8603_v7, 1  ;;  %v3392_v25 = vrot.slane %v6894_v45, 1  ;;  %v6910_v4 = vld [vmem:[#allocation2 + $0x98] ss:$0 sps:$4 sm:$0x11]  }
 0x2a3   : > { %v8640_v60 = vsel %vm611_vm0, %v3261_v14, %v3265_v6  ;;  %v3273_v27 = vor.u32 %v3272_v24, %v3268_v9  ;;  %v3277_v22 = vrot.slane %v3275_v42, 1  ;;  %v3280_v30 = vshrl.u32 %v8644_v13, 16 }
 0x2a4   : > { %v3284_v28 = vrot.slane %v3282_v21, 1  ;;  %v3287_v53 = vshll.u32 %v6902_v56, 16  ;;  %v8664_v54 = vsel %vm820_vm1, %v3391_v8, %v3392_v25  ;;  %v3294_v62 = vshll.u32 %v8659_v41, 16 }
 0x2a5   : > { %4301 = vmatmul.mubr.bf16.gmra.mrb[184].mxu0 %v8633_v5  ;;  %v8656_v17 = vsel %vm611_vm0, %v3273_v27, %v3277_v22  ;;  %v3394_v2 = vrot.slane %v8628_v51, 1  ;;  %v3395_v38 = vrot.slane %v6899_v16, 1  ;;  %v3292_v49 = vshrl.u32 %v8659_v41, 16  ;;  %v8689_v16 = vld [vmem:[#allocation2 + $0x9c] sm:$0xff]  }
 0x2a6   : > { %4308 = vmatprep.mubr.bf16.mxu0 %v8603_v7  ;;  %v3285_v36 = vor.u32 %v3284_v28, %v3280_v30  ;;  %v3289_v10 = vrot.slane %v3287_v53, 1  ;;  %v3296_v26 = vrot.slane %v3294_v62, 1  ;;  %v3299_v45 = vshll.u32 %v6907_v59, 16 }
 0x2a7   : > { %v8679_v48 = vsel %vm820_vm1, %v3394_v2, %v3395_v38  ;;  %v3306_v52 = vshll.u32 %v8674_v39, 16  ;;  %v3397_v14 = vrot.slane %v8644_v13, 1  ;;  %v3398_v20 = vrot.slane %v6902_v56, 1  ;;  %v6915_v56 = vld [vmem:[#allocation2 + $0xa4] ss:$0 sps:$4 sm:$0x11]  }
 0x2a8   : > { %4148 = vmatmul.mubr.bf16.gmra.mrb[156].mxu1 %v8590_v29  ;;  %v8671_v19 = vsel %vm611_vm0, %v3285_v36, %v3289_v10  ;;  %v3297_v12 = vor.u32 %v3296_v26, %v3292_v49  ;;  %v3301_v1 = vrot.slane %v3299_v45, 1  ;;  %v3304_v40 = vshrl.u32 %v8674_v39, 16  ;;  %v8706_v10 = vld [vmem:[#allocation2 + $0xa8] sm:$0xff]  }
 0x2a9   : > { %4155 = vmatprep.mubr.bf16.mxu1 %v8640_v60  ;;  %v3308_v6 = vrot.slane %v3306_v52, 1  ;;  %v3311_v24 = vshll.u32 %v6910_v4, 16  ;;  %v8694_v9 = vsel %vm820_vm1, %v3397_v14, %v3398_v20  ;;  %v3318_v27 = vshll.u32 %v8689_v16, 16  ;;  %v6918_v52 = vld [vmem:[#allocation2 + $0xb0] ss:$0 sps:$4 sm:$0x11]  }
 0x2aa   : > { %v8686_v58 = vsel %vm611_vm0, %v3297_v12, %v3301_v1  ;;  %v3400_v28 = vrot.slane %v8659_v41, 1  ;;  %v3401_v36 = vrot.slane %v6907_v59, 1  ;;  %v3316_v38 = vshrl.u32 %v8689_v16, 16 }
 0x2ab   : > { %v3309_v42 = vor.u32 %v3308_v6, %v3304_v40  ;;  %v3313_v22 = vrot.slane %v3311_v24, 1  ;;  %v3320_v62 = vrot.slane %v3318_v27, 1  ;;  %v3323_v26 = vshll.u32 %v6915_v56, 16 }
 0x2ac   : > { %v6121_v3 = vpop.f32.mrb[128].mxu1  ;;  %v8713_v49 = vsel %vm820_vm1, %v3400_v28, %v3401_v36  ;;  %v3330_v12 = vshll.u32 %v8706_v10, 16  ;;  %v3403_v14 = vrot.slane %v8674_v39, 1  ;;  %v3404_v20 = vrot.slane %v6910_v4, 1 }
 0x2ad   : > { %4309 = vmatmul.mubr.bf16.gmra.mrb[188].mxu0 %v8649_v55  ;;  %v6122_v21 = vpop.f32.mrb[129].mxu1  ;;  %v8704_v53 = vsel %vm611_vm0, %v3309_v42, %v3313_v22  ;;  %v3321_v45 = vor.u32 %v3320_v62, %v3316_v38  ;;  %v3325_v59 = vrot.slane %v3323_v26, 1  ;;  %v3328_v40 = vshrl.u32 %v8706_v10, 16  ;;  %v6923_v4 = vld [vmem:[#allocation2 + $0xbc] ss:$0 sps:$4 sm:$0x11]  }
 0x2ae   : > { %4316 = vmatprep.mubr.bf16.mxu0 %v8628_v51  ;;  %v8699_v8 = vadd.f32 %v6122_v21, %v6121_v3  ;;  %v6124_v25 = vpop.f32.mrb[130].mxu1  ;;  %v3332_v6 = vrot.slane %v3330_v12, 1  ;;  %v8723_v3 = vld [vmem:[#allocation2 + $0xb4] sm:$0xff]   ;;  %v3335_v24 = vshll.u32 %v6918_v52, 16  ;;  %v8728_v42 = vsel %vm820_vm1, %v3403_v14, %v3404_v20 }
 0x2af   : > { %v6125_v30 = vpop.f32.mrb[131].mxu1  ;;  %v8720_v1 = vsel %vm611_vm0, %v3321_v45, %v3325_v59  ;;  %v3342_v21 = vshll.u32 %v8723_v3, 16  ;;  %v3406_v28 = vrot.slane %v8689_v16, 1  ;;  %v3340_v62 = vshrl.u32 %v8723_v3, 16 }
 0x2b0   : > { %4156 = vmatmul.mubr.bf16.gmra.mrb[160].mxu1 %v8603_v7  ;;  %v8708_v2 = vadd.f32 %v6125_v30, %v6124_v25  ;;  %v3333_v27 = vor.u32 %v3332_v6, %v3328_v40  ;;  %v3337_v22 = vrot.slane %v3335_v24, 1  ;;  %v3407_v30 = vrot.slane %v6915_v56, 1  ;;  %v8754_v6 = vld [vmem:[#allocation2 + $0xc0] sm:$0xff]  }
 0x2b1   : > { %4163 = vmatprep.mubr.bf16.mxu1 %v8656_v17  ;;  %v3344_v36 = vrot.slane %v3342_v21, 1  ;;  %v3347_v38 = vshll.u32 %v6923_v4, 16  ;;  %v3409_v56 = vrot.slane %v8706_v10, 1  ;;  %v3410_v14 = vrot.slane %v6918_v52, 1  ;;  %v354_v21 = vld [vmem:[#allocation2 + $0xcc] sm:$0x1] }
 0x2b2   : > { %v8735_v25 = vsel %vm611_vm0, %v3333_v27, %v3337_v22  ;;  %v8741_v26 = vsel %vm820_vm1, %v3406_v28, %v3407_v30  ;;  %v3412_v40 = vrot.slane %v8723_v3, 1  ;;  %v3413_v24 = vrot.slane %v6923_v4, 1  ;;  %v6935_v27 = vld [vmem:[#allocation3 + $0x208] sm:$0xff]   ;;  %v410_v22 = vld [vmem:[#allocation2 + $0xd4] sm:$0x1]  ;;  %v6963_v4 = vld [vmem:[#allocation2 + $0x18] sm:$0xff]  }
 0x2b3   : > { %v3345_v45 = vor.u32 %v3344_v36, %v3340_v62  ;;  %v3349_v12 = vrot.slane %v3347_v38, 1  ;;  %v8752_v20 = vsel %vm820_vm1, %v3409_v56, %v3410_v14  ;;  %v355_v28 = vsel %vm8002_vm4, 0, %v354_v21 }
 0x2b4   : > { %v8762_v52 = vsel %vm820_vm1, %v3412_v40, %v3413_v24  ;;  %v411_v30 = vsel %vm8014_vm6, 0, %v410_v22  ;;  %356 = vst [vmem:[#allocation2 + $0xcc] sm:$0x1] %v355_v28  ;;  %v3443_v21 = vshll.u32 %v8754_v6, 16 }
 0x2b5   : > { %4317 = vmatmul.mubr.bf16.gmra.mrb[192].mxu0 %v8664_v54  ;;  %v8747_v59 = vsel %vm611_vm0, %v3345_v45, %v3349_v12  ;;  %412 = vst [vmem:[#allocation2 + $0xd4] sm:$0x1] %v411_v30  ;;  %v6941_v30 = vld [vmem:[#allocation2 + $0xc8] ss:$0 sps:$4 sm:$0x11]  }
 0x2b6   : > { %4324 = vmatprep.mubr.bf16.mxu0 %v8644_v13 }
 0x2b8   : > { %4164 = vmatmul.mubr.bf16.gmra.mrb[164].mxu1 %v8628_v51 }
 0x2b9   : > { %4171 = vmatprep.mubr.bf16.mxu1 %v8671_v19 }
 0x2bd   : > { %4325 = vmatmul.mubr.bf16.gmra.mrb[196].mxu0 %v8679_v48 }
 0x2be   : > { %4332 = vmatprep.mubr.bf16.mxu0 %v8659_v41 }
 0x2c0   : > { %4172 = vmatmul.mubr.bf16.gmra.mrb[168].mxu1 %v8644_v13 }
 0x2c1   : > { %4179 = vmatprep.mubr.bf16.mxu1 %v8686_v58 }
 0x2c5   : > { %4333 = vmatmul.mubr.bf16.gmra.mrb[200].mxu0 %v8694_v9 }
 0x2c6   : > { %4340 = vmatprep.mubr.bf16.mxu0 %v8674_v39 }
 0x2c8   : > { %4180 = vmatmul.mubr.bf16.gmra.mrb[172].mxu1 %v8659_v41 }
 0x2c9   : > { %4187 = vmatprep.mubr.bf16.mxu1 %v8704_v53 }
 0x2cd   : > { %4341 = vmatmul.mubr.bf16.gmra.mrb[204].mxu0 %v8713_v49 }
 0x2ce   : > { %4348 = vmatprep.mubr.bf16.mxu0 %v8689_v16 }
 0x2d0   : > { %4188 = vmatmul.mubr.bf16.gmra.mrb[176].mxu1 %v8674_v39 }
 0x2d1   : > { %4195 = vmatprep.mubr.bf16.mxu1 %v8720_v1 }
 0x2d5   : > { %4349 = vmatmul.mubr.bf16.gmra.mrb[208].mxu0 %v8728_v42 }
 0x2d6   : > { %4356 = vmatprep.mubr.bf16.mxu0 %v8706_v10 }
 0x2d8   : > { %4196 = vmatmul.mubr.bf16.gmra.mrb[180].mxu1 %v8689_v16 }
 0x2d9   : > { %4203 = vmatprep.mubr.bf16.mxu1 %v8735_v25 }
 0x2dd   : > { %4357 = vmatmul.mubr.bf16.gmra.mrb[212].mxu0 %v8741_v26 }
 0x2de   : > { %4364 = vmatprep.mubr.bf16.mxu0 %v8723_v3 }
 0x2e0   : > { %4204 = vmatmul.mubr.bf16.gmra.mrb[184].mxu1 %v8706_v10 }
 0x2e1   : > { %4211 = vmatprep.mubr.bf16.mxu1 %v8747_v59 }
 0x2e5   : > { %4365 = vmatmul.mubr.bf16.gmra.mrb[216].mxu0 %v8752_v20 }
 0x2e6   : > { %4372 = vmatprep.mubr.bf16.mxu0 %v8754_v6 }
 0x2e8   : > { %4212 = vmatmul.mubr.bf16.gmra.mrb[188].mxu1 %v8723_v3 }
 0x2e9   : > { %4413 = vmatprep.mubr.bf16.mxu1 %v8440_v35  ;;  %v6936_v35 = vld [vmem:[#allocation3 + $0x210] sm:$0xff]  }
 0x2ed   : > { %4373 = vmatmul.mubr.bf16.gmra.mrb[220].mxu0 %v8762_v52 }
 0x2ee   : > { %4574 = vmatprep.mubr.bf16.mxu0 %v8437_v47 }
 0x2f0   : > { %4414 = vmatmul.mubr.bf16.vlgmr.msra.gmra.mrb[192].mxu1 %v8417_v32  ;;  %v6939_v32 = vld [vmem:[#allocation3 + $0x228] sm:$0xff]  }
 0x2f1   : > { %4421 = vmatprep.mubr.bf16.mxu1 %v8471_v18  ;;  %6626 = vmatpush3.bf16.msra.mxu1 %v8450_v50  ;;  %v6940_v50 = vld [vmem:[#allocation3 + $0x230] sm:$0xff]  }
 0x2f2   : > { %6627 = vmatprep.subr.bf16.mxu1 %v6935_v27 }
 0x2f5   : > { %4575 = vmatmul.mubr.bf16.vlgmr.msra.gmra.mrb[224].mxu0 %v6963_v4  ;;  %6628 = vmatpush3.bf16.msra.mxu1 %v6935_v27  ;;  %v8833_v4 = vld [vmem:[#allocation2 + $0xcc] sm:$0xff]  }
 0x2f6   : > { %4582 = vmatprep.mubr.bf16.mxu0 %v8467_v34  ;;  %6629 = vmatprep.subr.bf16.mxu1 %v6936_v35 }
 0x2f8   : > { %4422 = vmatmul.mubr.bf16.gmra.mrb[196].mxu1 %v8437_v47  ;;  %v6942_v47 = vld [vmem:[#allocation3 + $0x238] sm:$0xff]  }
 0x2f9   : > { %4429 = vmatprep.mubr.bf16.mxu1 %v8533_v63  ;;  %6630 = vmatpush3.bf16.msra.mxu1 %v6936_v35 }
 0x2fa   : > { %6631 = vmatprep.subr.bf16.mxu1 %v6937_v11 }
 0x2fd   : > { %4583 = vmatmul.mubr.bf16.gmra.mrb[228].mxu0 %v8419_v37  ;;  %6632 = vmatpush3.bf16.msra.mxu1 %v6937_v11 }
 0x2fe   : > { %4590 = vmatprep.mubr.bf16.mxu0 %v8530_v44  ;;  %6633 = vmatprep.subr.bf16.mxu1 %v6938_v31 }
 0x300   : > { %4430 = vmatmul.mubr.bf16.gmra.mrb[200].mxu1 %v8467_v34 }
 0x301   : > { %4437 = vmatprep.mubr.bf16.mxu1 %v8579_v0  ;;  %6634 = vmatpush3.bf16.msra.mxu1 %v6938_v31 }
 0x302   : > { %6635 = vmatprep.subr.bf16.mxu1 %v6939_v32 }
 0x305   : > { %4591 = vmatmul.mubr.bf16.gmra.mrb[232].mxu0 %v8475_v23  ;;  %6636 = vmatpush3.bf16.msra.mxu1 %v6939_v32 }
 0x306   : > { %4598 = vmatprep.mubr.bf16.mxu0 %v8584_v33  ;;  %6637 = vmatprep.subr.bf16.mxu1 %v6940_v50 }
 0x308   : > { %4438 = vmatmul.mubr.bf16.gmra.mrb[204].mxu1 %v8530_v44 }
 0x309   : > { %4445 = vmatprep.mubr.bf16.mxu1 %v8600_v57  ;;  %6638 = vmatpush3.bf16.msra.mxu1 %v6940_v50 }
 0x30a   : > { %6639 = vmatprep.subr.bf16.mxu1 %v6942_v47 }
 0x30d   : > { %4599 = vmatmul.mubr.bf16.gmra.mrb[236].mxu0 %v8535_v46  ;;  %6640 = vmatpush3.bf16.msra.mxu1 %v6942_v47 }
 0x30e   : > { %4606 = vmatprep.mubr.bf16.mxu0 %v8610_v15 }
 0x310   : > { %4446 = vmatmul.mubr.bf16.gmra.mrb[208].mxu1 %v8584_v33 }
 0x311   : > { %4453 = vmatprep.mubr.bf16.mxu1 %v8633_v5 }
 0x315   : > { %4607 = vmatmul.mubr.bf16.gmra.mrb[240].mxu0 %v8568_v61 }
 0x316   : > { %4614 = vmatprep.mubr.bf16.mxu0 %v8624_v43 }
 0x318   : > { %4454 = vmatmul.mubr.bf16.gmra.mrb[212].mxu1 %v8610_v15 }
 0x319   : > { %4461 = vmatprep.mubr.bf16.mxu1 %v8649_v55 }
 0x31c   : > { %v6233_v37 = vpop.f32.mrb[160].mxu0 }
 0x31d   : > { %4615 = vmatmul.mubr.bf16.gmra.mrb[244].mxu0 %v8590_v29  ;;  %v6234_v34 = vpop.f32.mrb[161].mxu0 }
 0x31e   : > { %4622 = vmatprep.mubr.bf16.mxu0 %v8640_v60  ;;  %v6235_v23 = vadd.f32 %v6234_v34, %v6233_v37  ;;  %v6236_v44 = vpop.f32.mrb[162].mxu0  ;;  %v3441_v37 = vshrl.u32 %v8754_v6, 16  ;;  %v3448_v34 = vshll.u32 %v6941_v30, 16 }
 0x31f   : > { %v6237_v46 = vpop.f32.mrb[163].mxu0 }
 0x320   : > { %4462 = vmatmul.mubr.bf16.gmra.mrb[216].mxu1 %v8624_v43  ;;  %v8797_v61 = vadd.f32 %v6235_v23, %v8699_v8  ;;  %v6238_v33 = vadd.f32 %v6237_v46, %v6236_v44  ;;  %v8840_v44 = vld [vmem:[#allocation2 + $0xd4] ss:$0 sps:$4 sm:$0x11]   ;;  %v3469_v46 = vshll.u32 %v8833_v4, 16 }
 0x321   : > { %4469 = vmatprep.mubr.bf16.mxu1 %v8664_v54 }
 0x322   : > { %v8800_v15 = vadd.f32 %v6238_v33, %v8708_v2  ;;  %v3450_v33 = vrot.slane %v3448_v34, 1 }
 0x325   : > { %4623 = vmatmul.mubr.bf16.gmra.mrb[248].mxu0 %v8603_v7 }
 0x326   : > { %4630 = vmatprep.mubr.bf16.mxu0 %v8656_v17 }
 0x328   : > { %4470 = vmatmul.mubr.bf16.gmra.mrb[220].mxu1 %v8640_v60 }
 0x329   : > { %4477 = vmatprep.mubr.bf16.mxu1 %v8679_v48 }
 0x32d   : > { %4631 = vmatmul.mubr.bf16.gmra.mrb[252].mxu0 %v8628_v51 }
 0x32e   : > { %4638 = vmatprep.mubr.bf16.mxu0 %v8671_v19 }
 0x330   : > { %4478 = vmatmul.mubr.bf16.gmra.mrb[224].mxu1 %v8656_v17 }
 0x331   : > { %4485 = vmatprep.mubr.bf16.mxu1 %v8694_v9 }
 0x335   : > { %4639 = vmatmul.mubr.bf16.gmra.mrb[0].mxu0 %v8644_v13 }
 0x336   : > { %4646 = vmatprep.mubr.bf16.mxu0 %v8686_v58 }
 0x338   : > { %4486 = vmatmul.mubr.bf16.gmra.mrb[228].mxu1 %v8671_v19 }
 0x339   : > { %4493 = vmatprep.mubr.bf16.mxu1 %v8713_v49 }
 0x33d   : > { %4647 = vmatmul.mubr.bf16.gmra.mrb[4].mxu0 %v8659_v41 }
 0x33e   : > { %4654 = vmatprep.mubr.bf16.mxu0 %v8704_v53 }
 0x340   : > { %4494 = vmatmul.mubr.bf16.gmra.mrb[232].mxu1 %v8686_v58 }
 0x341   : > { %4501 = vmatprep.mubr.bf16.mxu1 %v8728_v42 }
 0x343   : > { %v6127_v29 = vpop.f32.mrb[132].mxu1 }
 0x344   : > { %v6128_v7 = vpop.f32.mrb[133].mxu1 }
 0x345   : > { %4655 = vmatmul.mubr.bf16.gmra.mrb[8].mxu0 %v8674_v39  ;;  %v6129_v43 = vadd.f32 %v6128_v7, %v6127_v29  ;;  %v6239_v51 = vpop.f32.mrb[164].mxu0  ;;  %v6130_v60 = vpop.f32.mrb[134].mxu1  ;;  %v3467_v29 = vshrl.u32 %v8833_v4, 16  ;;  %v3471_v7 = vrot.slane %v3469_v46, 1 }
 0x346   : > { %4662 = vmatprep.mubr.bf16.mxu0 %v8720_v1  ;;  %v6240_v13 = vpop.f32.mrb[165].mxu0  ;;  %v6131_v17 = vpop.f32.mrb[135].mxu1 }
 0x347   : > { %v6241_v19 = vadd.f32 %v6240_v13, %v6239_v51  ;;  %v6132_v8 = vadd.f32 %v6131_v17, %v6130_v60  ;;  %v6242_v41 = vpop.f32.mrb[166].mxu0  ;;  %v3453_v60 = vrot.slane %v8754_v6, 1  ;;  %v3454_v13 = vrot.slane %v6941_v30, 1 }
 0x348   : > { %4502 = vmatmul.mubr.bf16.gmra.mrb[236].mxu1 %v8704_v53  ;;  %v6243_v2 = vpop.f32.mrb[167].mxu0 }
 0x349   : > { %4509 = vmatprep.mubr.bf16.mxu1 %v8741_v26  ;;  %v8822_v58 = vadd.f32 %v6241_v19, %v6129_v43  ;;  %v6244_v36 = vadd.f32 %v6243_v2, %v6242_v41  ;;  %v3474_v43 = vshll.u32 %v8840_v44, 16 }
 0x34b   : > { %v8824_v62 = vadd.f32 %v6244_v36, %v6132_v8  ;;  %v6133_v39 = vpop.f32.mrb[136].mxu1 }
 0x34c   : > { %v6134_v38 = vpop.f32.mrb[137].mxu1 }
 0x34d   : > { %4663 = vmatmul.mubr.bf16.gmra.mrb[12].mxu0 %v8689_v16  ;;  %v6135_v45 = vadd.f32 %v6134_v38, %v6133_v39  ;;  %v6136_v12 = vpop.f32.mrb[138].mxu1  ;;  %v6245_v14 = vpop.f32.mrb[168].mxu0 }
 0x34e   : > { %4670 = vmatprep.mubr.bf16.mxu0 %v8735_v25  ;;  %v6137_v56 = vpop.f32.mrb[139].mxu1  ;;  %v6246_v53 = vpop.f32.mrb[169].mxu0 }
 0x34f   : > { %v6138_v40 = vadd.f32 %v6137_v56, %v6136_v12  ;;  %v6247_v24 = vadd.f32 %v6246_v53, %v6245_v14  ;;  %v6248_v27 = vpop.f32.mrb[170].mxu0  ;;  %v3476_v12 = vrot.slane %v3474_v43, 1 }
 0x350   : > { %4510 = vmatmul.mubr.bf16.gmra.mrb[240].mxu1 %v8720_v1  ;;  %v6249_v22 = vpop.f32.mrb[171].mxu0  ;;  %v3445_v1 = vrot.slane %v3443_v21, 1 }
 0x351   : > { %4517 = vmatprep.mubr.bf16.mxu1 %v8752_v20  ;;  %v8831_v28 = vadd.f32 %v6247_v24, %v6135_v45  ;;  %v6250_v16 = vadd.f32 %v6249_v22, %v6248_v27  ;;  %v3472_v45 = vor.u32 %v3471_v7, %v3467_v29 }
 0x353   : > { %v8836_v31 = vadd.f32 %v6250_v16, %v6138_v40  ;;  %v3477_v27 = vsel %vm611_vm0, %v3472_v45, %v3476_v12 }
 0x354   : > { %v6139_v35 = vpop.f32.mrb[140].mxu1 }
 0x355   : > { %v6140_v11 = vpop.f32.mrb[141].mxu1  ;;  %4671 = vmatmul.mubr.bf16.gmra.mrb[16].mxu0 %v8706_v10  ;;  %v3446_v10 = vor.u32 %v3445_v1, %v3441_v37 }
 0x356   : > { %v6141_v32 = vadd.f32 %v6140_v11, %v6139_v35  ;;  %v6142_v50 = vpop.f32.mrb[142].mxu1  ;;  %4678 = vmatprep.mubr.bf16.mxu0 %v8747_v59 }
 0x357   : > { %v6143_v47 = vpop.f32.mrb[143].mxu1  ;;  %v3451_v17 = vsel %vm611_vm0, %v3446_v10, %v3450_v33 }
 0x358   : > { %v6144_v23 = vadd.f32 %v6143_v47, %v6142_v50  ;;  %4518 = vmatmul.mubr.bf16.gmra.mrb[244].mxu1 %v8735_v25 }
 0x359   : > { %4525 = vmatprep.mubr.bf16.mxu1 %v8762_v52 }
 0x35b   : > { %v6251_v51 = vpop.f32.mrb[172].mxu0 }
 0x35c   : > { %v6252_v19 = vpop.f32.mrb[173].mxu0 }
 0x35d   : > { %4679 = vmatmul.mubr.bf16.gmra.mrb[20].mxu0 %v8723_v3  ;;  %v6145_v8 = vpop.f32.mrb[144].mxu1  ;;  %v6253_v25 = vadd.f32 %v6252_v19, %v6251_v51  ;;  %v6254_v41 = vpop.f32.mrb[174].mxu0  ;;  %v8854_v3 = vsel %vm820_vm1, %v3453_v60, %v3454_v13 }
 0x35e   : > { %4686 = vmatprep.mubr.bf16.mxu0 %v3451_v17  ;;  %v6146_v2 = vpop.f32.mrb[145].mxu1  ;;  %v6255_v36 = vpop.f32.mrb[175].mxu0 }
 0x35f   : > { %v6147_v39 = vadd.f32 %v6146_v2, %v6145_v8  ;;  %v6148_v38 = vpop.f32.mrb[146].mxu1  ;;  %v8850_v56 = vadd.f32 %v6253_v25, %v6141_v32  ;;  %v6256_v14 = vadd.f32 %v6255_v36, %v6254_v41 }
 0x360   : > { %4526 = vmatmul.mubr.bf16.gmra.mrb[248].mxu1 %v8747_v59  ;;  %v6149_v40 = vpop.f32.mrb[147].mxu1 }
 0x361   : > { %4533 = vmatprep.mubr.bf16.mxu1 %v8854_v3  ;;  %v6150_v53 = vadd.f32 %v6149_v40, %v6148_v38  ;;  %v8857_v24 = vadd.f32 %v6256_v14, %v6144_v23 }
 0x365   : > { %4687 = vmatmul.mubr.bf16.gmra.mrb[24].mxu0 %v8754_v6 }
 0x366   : > { %4694 = vmatprep.mubr.bf16.mxu0 %v3477_v27 }
 0x368   : > { %v6257_v21 = vpop.f32.mrb[176].mxu0  ;;  %4534 = vmatmul.mubr.bf16.gmra.mrb[252].mxu1 %v3451_v17 }
 0x369   : > { %v6258_v22 = vpop.f32.mrb[177].mxu0  ;;  %6641 = vmatprep.mubr.bf16.mxu1 %v8471_v18 }
 0x36a   : > { %v6259_v59 = vadd.f32 %v6258_v22, %v6257_v21  ;;  %v6260_v16 = vpop.f32.mrb[178].mxu0 }
 0x36b   : > { %v6261_v30 = vpop.f32.mrb[179].mxu0  ;;  %v6151_v35 = vpop.f32.mrb[148].mxu1 }
 0x36c   : > { %v8862_v11 = vadd.f32 %v6259_v59, %v6147_v39  ;;  %v6262_v1 = vadd.f32 %v6261_v30, %v6260_v16  ;;  %v6152_v32 = vpop.f32.mrb[149].mxu1 }
 0x36d   : > { %4695 = vmatmul.mubr.bf16.gmra.mrb[28].mxu0 %v8833_v4  ;;  %v6153_v50 = vadd.f32 %v6152_v32, %v6151_v35  ;;  %v6154_v47 = vpop.f32.mrb[150].mxu1 }
 0x36e   : > { %v8865_v37 = vadd.f32 %v6262_v1, %v6150_v53  ;;  %v6155_v6 = vpop.f32.mrb[151].mxu1 }
 0x36f   : > { %v6156_v34 = vadd.f32 %v6155_v6, %v6154_v47 }
 0x370   : > { %v6263_v23 = vpop.f32.mrb[180].mxu0  ;;  %6642 = vmatmul.mubr.bf16.vlgmr.msra.gmra.mrb[0].mxu1 %v8533_v63 }
 0x371   : > { %v6264_v18 = vpop.f32.mrb[181].mxu0  ;;  %6645 = vmatprep.mubr.bf16.mxu1 %v8579_v0 }
 0x372   : > { %v6265_v46 = vadd.f32 %v6264_v18, %v6263_v23  ;;  %v6266_v10 = vpop.f32.mrb[182].mxu0 }
 0x373   : > { %v6267_v33 = vpop.f32.mrb[183].mxu0  ;;  %v6157_v29 = vpop.f32.mrb[152].mxu1 }
 0x374   : > { %v8869_v7 = vadd.f32 %v6265_v46, %v6153_v50  ;;  %v6268_v43 = vadd.f32 %v6267_v33, %v6266_v10  ;;  %v6158_v51 = vpop.f32.mrb[153].mxu1 }
 0x375   : > { %v6159_v60 = vadd.f32 %v6158_v51, %v6157_v29  ;;  %v6160_v13 = vpop.f32.mrb[154].mxu1 }
 0x376   : > { %v8871_v17 = vadd.f32 %v6268_v43, %v6156_v34  ;;  %v6161_v19 = vpop.f32.mrb[155].mxu1 }
 0x377   : > { %v6162_v8 = vadd.f32 %v6161_v19, %v6160_v13 }
 0x378   : > { %v6269_v25 = vpop.f32.mrb[184].mxu0  ;;  %6646 = vmatmul.mubr.bf16.gmra.mrb[4].mxu1 %v8600_v57 }
 0x379   : > { %v6270_v63 = vpop.f32.mrb[185].mxu0  ;;  %6649 = vmatprep.mubr.bf16.mxu1 %v8633_v5 }
 0x37a   : > { %v6271_v0 = vadd.f32 %v6270_v63, %v6269_v25  ;;  %v6272_v41 = vpop.f32.mrb[186].mxu0 }
 0x37b   : > { %v6273_v2 = vpop.f32.mrb[187].mxu0  ;;  %v6163_v36 = vpop.f32.mrb[156].mxu1 }
 0x37c   : > { %v8875_v39 = vadd.f32 %v6271_v0, %v6159_v60  ;;  %v6274_v38 = vadd.f32 %v6273_v2, %v6272_v41  ;;  %v6164_v45 = vpop.f32.mrb[157].mxu1 }
 0x37d   : > { %v6165_v12 = vadd.f32 %v6164_v45, %v6163_v36  ;;  %v6166_v14 = vpop.f32.mrb[158].mxu1 }
 0x37e   : > { %v8877_v40 = vadd.f32 %v6274_v38, %v6162_v8  ;;  %v6167_v53 = vpop.f32.mrb[159].mxu1 }
 0x37f   : > { %v6168_v27 = vadd.f32 %v6167_v53, %v6166_v14 }
 0x380   : > { %v6275_v21 = vpop.f32.mrb[188].mxu0  ;;  %6650 = vmatmul.mubr.bf16.gmra.mrb[8].mxu1 %v8649_v55 }
 0x381   : > { %v6276_v57 = vpop.f32.mrb[189].mxu0  ;;  %6653 = vmatprep.mubr.bf16.mxu1 %v8664_v54 }
 0x382   : > { %v6277_v5 = vadd.f32 %v6276_v57, %v6275_v21  ;;  %v6278_v22 = vpop.f32.mrb[190].mxu0 }
 0x383   : > { %v6279_v59 = vpop.f32.mrb[191].mxu0  ;;  %v6169_v16 = vpop.f32.mrb[160].mxu1 }
 0x384   : > { %v8881_v30 = vadd.f32 %v6277_v5, %v6165_v12  ;;  %v6280_v35 = vadd.f32 %v6279_v59, %v6278_v22  ;;  %v6170_v1 = vpop.f32.mrb[161].mxu1 }
 0x385   : > { %v6171_v32 = vadd.f32 %v6170_v1, %v6169_v16  ;;  %v6172_v50 = vpop.f32.mrb[162].mxu1 }
 0x386   : > { %v8883_v47 = vadd.f32 %v6280_v35, %v6168_v27  ;;  %v6173_v6 = vpop.f32.mrb[163].mxu1 }
 0x387   : > { %v6174_v34 = vadd.f32 %v6173_v6, %v6172_v50 }
 0x388   : > { %v6281_v23 = vpop.f32.mrb[192].mxu0  ;;  %6654 = vmatmul.mubr.bf16.gmra.mrb[12].mxu1 %v8679_v48 }
 0x389   : > { %v6282_v55 = vpop.f32.mrb[193].mxu0  ;;  %6657 = vmatprep.mubr.bf16.mxu1 %v8694_v9 }
 0x38a   : > { %v6283_v54 = vadd.f32 %v6282_v55, %v6281_v23  ;;  %v6284_v18 = vpop.f32.mrb[194].mxu0  ;;  %v3479_v55 = vrot.slane %v8833_v4, 1 }
 0x38b   : > { %v6285_v46 = vpop.f32.mrb[195].mxu0  ;;  %v6175_v10 = vpop.f32.mrb[164].mxu1 }
 0x38c   : > { %v8887_v33 = vadd.f32 %v6283_v54, %v6171_v32  ;;  %v6286_v29 = vadd.f32 %v6285_v46, %v6284_v18  ;;  %v6176_v43 = vpop.f32.mrb[165].mxu1 }
 0x38d   : > { %v6177_v51 = vadd.f32 %v6176_v43, %v6175_v10  ;;  %v6178_v60 = vpop.f32.mrb[166].mxu1 }
 0x38e   : > { %v8889_v13 = vadd.f32 %v6286_v29, %v6174_v34  ;;  %v6179_v19 = vpop.f32.mrb[167].mxu1 }
 0x38f   : > { %v6180_v8 = vadd.f32 %v6179_v19, %v6178_v60 }
 0x390   : > { %v6287_v25 = vpop.f32.mrb[196].mxu0  ;;  %6658 = vmatmul.mubr.bf16.gmra.mrb[16].mxu1 %v8713_v49 }
 0x391   : > { %v6288_v48 = vpop.f32.mrb[197].mxu0  ;;  %6661 = vmatprep.mubr.bf16.mxu1 %v8728_v42 }
 0x392   : > { %v6289_v9 = vadd.f32 %v6288_v48, %v6287_v25  ;;  %v6290_v63 = vpop.f32.mrb[198].mxu0 }
 0x393   : > { %v6291_v0 = vpop.f32.mrb[199].mxu0  ;;  %v6181_v41 = vpop.f32.mrb[168].mxu1 }
 0x394   : > { %v8893_v2 = vadd.f32 %v6289_v9, %v6177_v51  ;;  %v6292_v36 = vadd.f32 %v6291_v0, %v6290_v63  ;;  %v6182_v38 = vpop.f32.mrb[169].mxu1 }
 0x395   : > { %v6183_v45 = vadd.f32 %v6182_v38, %v6181_v41  ;;  %v6184_v12 = vpop.f32.mrb[170].mxu1 }
 0x396   : > { %v8895_v14 = vadd.f32 %v6292_v36, %v6180_v8  ;;  %v6185_v53 = vpop.f32.mrb[171].mxu1 }
 0x397   : > { %v6186_v27 = vadd.f32 %v6185_v53, %v6184_v12 }
 0x398   : > { %v6293_v21 = vpop.f32.mrb[200].mxu0  ;;  %6662 = vmatmul.mubr.bf16.gmra.mrb[20].mxu1 %v8741_v26  ;;  %v3480_v26 = vrot.slane %v8840_v44, 1 }
 0x399   : > { %v6294_v49 = vpop.f32.mrb[201].mxu0  ;;  %6665 = vmatprep.mubr.bf16.mxu1 %v8752_v20 }
 0x39a   : > { %v6295_v42 = vadd.f32 %v6294_v49, %v6293_v21  ;;  %v6296_v57 = vpop.f32.mrb[202].mxu0  ;;  %v3481_v8 = vsel %vm820_vm1, %v3479_v55, %v3480_v26 }
 0x39b   : > { %v6297_v5 = vpop.f32.mrb[203].mxu0  ;;  %v6187_v22 = vpop.f32.mrb[172].mxu1 }
 0x39c   : > { %v8899_v59 = vadd.f32 %v6295_v42, %v6183_v45  ;;  %v6298_v16 = vadd.f32 %v6297_v5, %v6296_v57  ;;  %v6188_v35 = vpop.f32.mrb[173].mxu1 }
 0x39d   : > { %v6189_v1 = vadd.f32 %v6188_v35, %v6187_v22  ;;  %v6190_v32 = vpop.f32.mrb[174].mxu1 }
 0x39e   : > { %v8901_v50 = vadd.f32 %v6298_v16, %v6186_v27  ;;  %v6191_v6 = vpop.f32.mrb[175].mxu1 }
 0x39f   : > { %v6192_v34 = vadd.f32 %v6191_v6, %v6190_v32 }
 0x3a0   : > { %v6299_v23 = vpop.f32.mrb[204].mxu0  ;;  %6666 = vmatmul.mubr.bf16.gmra.mrb[24].mxu1 %v8762_v52 }
 0x3a1   : > { %v6300_v20 = vpop.f32.mrb[205].mxu0  ;;  %6669 = vmatprep.mubr.bf16.mxu1 %v8854_v3 }
 0x3a2   : > { %v6301_v54 = vadd.f32 %v6300_v20, %v6299_v23  ;;  %v6302_v18 = vpop.f32.mrb[206].mxu0 }
 0x3a3   : > { %v6303_v46 = vpop.f32.mrb[207].mxu0  ;;  %v6193_v10 = vpop.f32.mrb[176].mxu1 }
 0x3a4   : > { %v8907_v29 = vadd.f32 %v6301_v54, %v6189_v1  ;;  %v6304_v43 = vadd.f32 %v6303_v46, %v6302_v18  ;;  %v6194_v51 = vpop.f32.mrb[177].mxu1 }
 0x3a5   : > { %v6195_v60 = vadd.f32 %v6194_v51, %v6193_v10  ;;  %v6196_v19 = vpop.f32.mrb[178].mxu1 }
 0x3a6   : > { %v8910_v52 = vadd.f32 %v6304_v43, %v6192_v34  ;;  %v6197_v44 = vpop.f32.mrb[179].mxu1 }
 0x3a7   : > { %v6198_v25 = vadd.f32 %v6197_v44, %v6196_v19 }
 0x3a8   : > { %v6305_v48 = vpop.f32.mrb[208].mxu0  ;;  %6670 = vmatmul.mubr.bf16.gmra.mrb[28].mxu1 %v3481_v8 }
 0x3a9   : > { %v6306_v3 = vpop.f32.mrb[209].mxu0 }
 0x3aa   : > { %v6307_v4 = vadd.f32 %v6306_v3, %v6305_v48  ;;  %v6308_v9 = vpop.f32.mrb[210].mxu0 }
 0x3ab   : > { %v6309_v63 = vpop.f32.mrb[211].mxu0  ;;  %v6199_v0 = vpop.f32.mrb[180].mxu1 }
 0x3ac   : > { %v8912_v41 = vadd.f32 %v6307_v4, %v6195_v60  ;;  %v6310_v36 = vadd.f32 %v6309_v63, %v6308_v9  ;;  %v6200_v38 = vpop.f32.mrb[181].mxu1 }
 0x3ad   : > { %v6201_v45 = vadd.f32 %v6200_v38, %v6199_v0  ;;  %v6202_v12 = vpop.f32.mrb[182].mxu1 }
 0x3ae   : > { %v8914_v53 = vadd.f32 %v6310_v36, %v6198_v25  ;;  %v6203_v27 = vpop.f32.mrb[183].mxu1 }
 0x3af   : > { %v6204_v21 = vadd.f32 %v6203_v27, %v6202_v12 }
 0x3b0   : > { %v6311_v49 = vpop.f32.mrb[212].mxu0 }
 0x3b1   : > { %v6312_v42 = vpop.f32.mrb[213].mxu0 }
 0x3b2   : > { %v6313_v57 = vadd.f32 %v6312_v42, %v6311_v49  ;;  %v6314_v5 = vpop.f32.mrb[214].mxu0 }
 0x3b3   : > { %v6315_v22 = vpop.f32.mrb[215].mxu0  ;;  %v6205_v16 = vpop.f32.mrb[184].mxu1 }
 0x3b4   : > { %v8916_v35 = vadd.f32 %v6313_v57, %v6201_v45  ;;  %v6316_v1 = vadd.f32 %v6315_v22, %v6314_v5  ;;  %v6206_v32 = vpop.f32.mrb[185].mxu1 }
 0x3b5   : > { %v6207_v6 = vadd.f32 %v6206_v32, %v6205_v16  ;;  %v6208_v34 = vpop.f32.mrb[186].mxu1 }
 0x3b6   : > { %v8918_v23 = vadd.f32 %v6316_v1, %v6204_v21  ;;  %v6209_v26 = vpop.f32.mrb[187].mxu1 }
 0x3b7   : > { %v6210_v20 = vadd.f32 %v6209_v26, %v6208_v34 }
 0x3b8   : > { %v6317_v55 = vpop.f32.mrb[216].mxu0 }
 0x3b9   : > { %v6318_v54 = vpop.f32.mrb[217].mxu0 }
 0x3ba   : > { %v6319_v18 = vadd.f32 %v6318_v54, %v6317_v55  ;;  %v6320_v46 = vpop.f32.mrb[218].mxu0 }
 0x3bb   : > { %v6321_v10 = vpop.f32.mrb[219].mxu0  ;;  %v6211_v43 = vpop.f32.mrb[188].mxu1 }
 0x3bc   : > { %v8920_v51 = vadd.f32 %v6319_v18, %v6207_v6  ;;  %v6322_v60 = vadd.f32 %v6321_v10, %v6320_v46  ;;  %v6212_v19 = vpop.f32.mrb[189].mxu1 }
 0x3bd   : > { %v6213_v8 = vadd.f32 %v6212_v19, %v6211_v43  ;;  %v6214_v44 = vpop.f32.mrb[190].mxu1 }
 0x3be   : > { %v8922_v25 = vadd.f32 %v6322_v60, %v6210_v20  ;;  %v6215_v48 = vpop.f32.mrb[191].mxu1 }
 0x3bf   : > { %v6216_v3 = vadd.f32 %v6215_v48, %v6214_v44 }
 0x3c0   : > { %v6323_v4 = vpop.f32.mrb[220].mxu0 }
 0x3c1   : > { %v6324_v9 = vpop.f32.mrb[221].mxu0 }
 0x3c2   : > { %v6325_v63 = vadd.f32 %v6324_v9, %v6323_v4  ;;  %v6326_v0 = vpop.f32.mrb[222].mxu0 }
 0x3c3   : > { %v6327_v36 = vpop.f32.mrb[223].mxu0  ;;  %v6345_v38 = vpop.f32.mrb[192].mxu1 }
 0x3c4   : > { %v8924_v45 = vadd.f32 %v6325_v63, %v6213_v8  ;;  %v6328_v12 = vadd.f32 %v6327_v36, %v6326_v0  ;;  %v6346_v27 = vpop.f32.mrb[193].mxu1 }
 0x3c5   : > { %v6347_v21 = vadd.f32 %v6346_v27, %v6345_v38  ;;  %v6348_v49 = vpop.f32.mrb[194].mxu1 }
 0x3c6   : > { %v8926_v42 = vadd.f32 %v6328_v12, %v6216_v3  ;;  %v6349_v57 = vpop.f32.mrb[195].mxu1 }
 0x3c7   : > { %v4416_v5 = vadd.f32 %v6347_v21, %v8797_v61  ;;  %v6350_v22 = vadd.f32 %v6349_v57, %v6348_v49 }
 0x3c8   : > { %v6457_v16 = vpop.f32.mrb[224].mxu0 }
 0x3c9   : > { %v6458_v1 = vpop.f32.mrb[225].mxu0  ;;  %v4419_v32 = vadd.f32 %v6350_v22, %v8800_v15 }
 0x3ca   : > { %v6459_v6 = vadd.f32 %v6458_v1, %v6457_v16  ;;  %v6460_v34 = vpop.f32.mrb[226].mxu0 }
 0x3cb   : > { %v6461_v26 = vpop.f32.mrb[227].mxu0  ;;  %v6351_v20 = vpop.f32.mrb[196].mxu1 }
 0x3cc   : > { %v6462_v55 = vadd.f32 %v6461_v26, %v6460_v34  ;;  %v6352_v54 = vpop.f32.mrb[197].mxu1  ;;  %v8930_v18 = vadd.f32 %v6459_v6, %v4416_v5 }
 0x3cd   : > { %v6353_v46 = vadd.f32 %v6352_v54, %v6351_v20  ;;  %v6354_v10 = vpop.f32.mrb[198].mxu1 }
 0x3ce   : > { %v6355_v43 = vpop.f32.mrb[199].mxu1  ;;  %v8932_v60 = vadd.f32 %v6462_v55, %v4419_v32 }
 0x3cf   : > { %v4424_v61 = vadd.f32 %v6353_v46, %v8822_v58  ;;  %v6356_v19 = vadd.f32 %v6355_v43, %v6354_v10 }
 0x3d0   : > { %v6463_v8 = vpop.f32.mrb[228].mxu0 }
 0x3d1   : > { %v6464_v44 = vpop.f32.mrb[229].mxu0  ;;  %v4427_v15 = vadd.f32 %v6356_v19, %v8824_v62 }
 0x3d2   : > { %v6465_v48 = vadd.f32 %v6464_v44, %v6463_v8  ;;  %v6466_v3 = vpop.f32.mrb[230].mxu0 }
 0x3d3   : > { %v6467_v4 = vpop.f32.mrb[231].mxu0  ;;  %v6357_v9 = vpop.f32.mrb[200].mxu1 }
 0x3d4   : > { %v6468_v63 = vadd.f32 %v6467_v4, %v6466_v3  ;;  %v6358_v0 = vpop.f32.mrb[201].mxu1  ;;  %v8936_v36 = vadd.f32 %v6465_v48, %v4424_v61 }
 0x3d5   : > { %v6359_v38 = vadd.f32 %v6358_v0, %v6357_v9  ;;  %v6360_v12 = vpop.f32.mrb[202].mxu1 }
 0x3d6   : > { %v6361_v27 = vpop.f32.mrb[203].mxu1  ;;  %v8938_v21 = vadd.f32 %v6468_v63, %v4427_v15 }
 0x3d7   : > { %v4432_v58 = vadd.f32 %v6359_v38, %v8831_v28  ;;  %v6362_v49 = vadd.f32 %v6361_v27, %v6360_v12 }
 0x3d8   : > { %v6469_v57 = vpop.f32.mrb[232].mxu0 }
 0x3d9   : > { %v6470_v5 = vpop.f32.mrb[233].mxu0  ;;  %v4435_v62 = vadd.f32 %v6362_v49, %v8836_v31 }
 0x3da   : > { %v6471_v22 = vadd.f32 %v6470_v5, %v6469_v57  ;;  %v6472_v16 = vpop.f32.mrb[234].mxu0 }
 0x3db   : > { %v6473_v1 = vpop.f32.mrb[235].mxu0  ;;  %v6363_v32 = vpop.f32.mrb[204].mxu1 }
 0x3dc   : > { %v6474_v6 = vadd.f32 %v6473_v1, %v6472_v16  ;;  %v6364_v34 = vpop.f32.mrb[205].mxu1  ;;  %v8942_v26 = vadd.f32 %v6471_v22, %v4432_v58 }
 0x3dd   : > { %v6365_v20 = vadd.f32 %v6364_v34, %v6363_v32  ;;  %v6366_v55 = vpop.f32.mrb[206].mxu1 }
 0x3de   : > { %v6367_v54 = vpop.f32.mrb[207].mxu1  ;;  %v8944_v46 = vadd.f32 %v6474_v6, %v4435_v62 }
 0x3df   : > { %v4440_v28 = vadd.f32 %v6365_v20, %v8850_v56  ;;  %v6368_v10 = vadd.f32 %v6367_v54, %v6366_v55 }
 0x3e0   : > { %v6475_v43 = vpop.f32.mrb[236].mxu0 }
 0x3e1   : > { %v6476_v61 = vpop.f32.mrb[237].mxu0  ;;  %v4443_v31 = vadd.f32 %v6368_v10, %v8857_v24 }
 0x3e2   : > { %v6477_v19 = vadd.f32 %v6476_v61, %v6475_v43  ;;  %v6478_v8 = vpop.f32.mrb[238].mxu0 }
 0x3e3   : > { %v6479_v44 = vpop.f32.mrb[239].mxu0  ;;  %v6369_v15 = vpop.f32.mrb[208].mxu1 }
 0x3e4   : > { %v6480_v48 = vadd.f32 %v6479_v44, %v6478_v8  ;;  %v6370_v3 = vpop.f32.mrb[209].mxu1  ;;  %v8948_v4 = vadd.f32 %v6477_v19, %v4440_v28 }
 0x3e5   : > { %v6371_v9 = vadd.f32 %v6370_v3, %v6369_v15  ;;  %v6372_v63 = vpop.f32.mrb[210].mxu1 }
 0x3e6   : > { %v6373_v0 = vpop.f32.mrb[211].mxu1  ;;  %v8950_v38 = vadd.f32 %v6480_v48, %v4443_v31 }
 0x3e7   : > { %v4448_v56 = vadd.f32 %v6371_v9, %v8862_v11  ;;  %v6374_v12 = vadd.f32 %v6373_v0, %v6372_v63 }
 0x3e8   : > { %v6481_v27 = vpop.f32.mrb[240].mxu0 }
 0x3e9   : > { %v6482_v58 = vpop.f32.mrb[241].mxu0  ;;  %v4451_v24 = vadd.f32 %v6374_v12, %v8865_v37 }
 0x3ea   : > { %v6483_v49 = vadd.f32 %v6482_v58, %v6481_v27  ;;  %v6484_v57 = vpop.f32.mrb[242].mxu0 }
 0x3eb   : > { %v6485_v5 = vpop.f32.mrb[243].mxu0  ;;  %v6375_v62 = vpop.f32.mrb[212].mxu1 }
 0x3ec   : > { %v6486_v22 = vadd.f32 %v6485_v5, %v6484_v57  ;;  %v6376_v16 = vpop.f32.mrb[213].mxu1  ;;  %v8954_v1 = vadd.f32 %v6483_v49, %v4448_v56 }
 0x3ed   : > { %v6377_v32 = vadd.f32 %v6376_v16, %v6375_v62  ;;  %v6378_v6 = vpop.f32.mrb[214].mxu1 }
 0x3ee   : > { %v6379_v34 = vpop.f32.mrb[215].mxu1  ;;  %v8956_v20 = vadd.f32 %v6486_v22, %v4451_v24 }
 0x3ef   : > { %v4456_v11 = vadd.f32 %v6377_v32, %v8869_v7  ;;  %v6380_v55 = vadd.f32 %v6379_v34, %v6378_v6 }
 0x3f0   : > { %v6487_v54 = vpop.f32.mrb[244].mxu0 }
 0x3f1   : > { %v6488_v28 = vpop.f32.mrb[245].mxu0  ;;  %v4459_v37 = vadd.f32 %v6380_v55, %v8871_v17 }
 0x3f2   : > { %v6489_v10 = vadd.f32 %v6488_v28, %v6487_v54  ;;  %v6490_v43 = vpop.f32.mrb[246].mxu0 }
 0x3f3   : > { %v6491_v61 = vpop.f32.mrb[247].mxu0  ;;  %v6381_v31 = vpop.f32.mrb[216].mxu1 }
 0x3f4   : > { %v6492_v19 = vadd.f32 %v6491_v61, %v6490_v43  ;;  %v6382_v8 = vpop.f32.mrb[217].mxu1  ;;  %v8960_v44 = vadd.f32 %v6489_v10, %v4456_v11 }
 0x3f5   : > { %v6383_v15 = vadd.f32 %v6382_v8, %v6381_v31  ;;  %v6384_v48 = vpop.f32.mrb[218].mxu1 }
 0x3f6   : > { %v6385_v3 = vpop.f32.mrb[219].mxu1  ;;  %v8962_v9 = vadd.f32 %v6492_v19, %v4459_v37 }
 0x3f7   : > { %v4464_v7 = vadd.f32 %v6383_v15, %v8875_v39  ;;  %v6386_v63 = vadd.f32 %v6385_v3, %v6384_v48 }
 0x3f8   : > { %v6493_v0 = vpop.f32.mrb[248].mxu0 }
 0x3f9   : > { %v6494_v56 = vpop.f32.mrb[249].mxu0  ;;  %v4467_v17 = vadd.f32 %v6386_v63, %v8877_v40 }
 0x3fa   : > { %v6495_v12 = vadd.f32 %v6494_v56, %v6493_v0  ;;  %v6496_v27 = vpop.f32.mrb[250].mxu0 }
 0x3fb   : > { %v6497_v58 = vpop.f32.mrb[251].mxu0  ;;  %v6387_v24 = vpop.f32.mrb[220].mxu1 }
 0x3fc   : > { %v6498_v49 = vadd.f32 %v6497_v58, %v6496_v27  ;;  %v6388_v57 = vpop.f32.mrb[221].mxu1  ;;  %v8966_v5 = vadd.f32 %v6495_v12, %v4464_v7 }
 0x3fd   : > { %v6389_v62 = vadd.f32 %v6388_v57, %v6387_v24  ;;  %v6390_v22 = vpop.f32.mrb[222].mxu1 }
 0x3fe   : > { %v6391_v16 = vpop.f32.mrb[223].mxu1  ;;  %v8968_v32 = vadd.f32 %v6498_v49, %v4467_v17 }
 0x3ff   : > { %v4472_v39 = vadd.f32 %v6389_v62, %v8881_v30  ;;  %v6392_v6 = vadd.f32 %v6391_v16, %v6390_v22 }
 0x400   : > { %v6499_v34 = vpop.f32.mrb[252].mxu0 }
 0x401   : > { %v6500_v11 = vpop.f32.mrb[253].mxu0  ;;  %v4475_v40 = vadd.f32 %v6392_v6, %v8883_v47 }
 0x402   : > { %v6501_v55 = vadd.f32 %v6500_v11, %v6499_v34  ;;  %v6502_v54 = vpop.f32.mrb[254].mxu0 }
 0x403   : > { %v6503_v28 = vpop.f32.mrb[255].mxu0  ;;  %v6393_v37 = vpop.f32.mrb[224].mxu1 }
 0x404   : > { %v6504_v10 = vadd.f32 %v6503_v28, %v6502_v54  ;;  %v6394_v43 = vpop.f32.mrb[225].mxu1  ;;  %v8972_v61 = vadd.f32 %v6501_v55, %v4472_v39 }
 0x405   : > { %v6395_v31 = vadd.f32 %v6394_v43, %v6393_v37  ;;  %v6396_v19 = vpop.f32.mrb[226].mxu1 }
 0x406   : > { %v6397_v8 = vpop.f32.mrb[227].mxu1  ;;  %v8974_v15 = vadd.f32 %v6504_v10, %v4475_v40 }
 0x407   : > { %v4480_v30 = vadd.f32 %v6395_v31, %v8887_v33  ;;  %v6398_v48 = vadd.f32 %v6397_v8, %v6396_v19 }
 0x408   : > { %v6505_v3 = vpop.f32.mrb[0].mxu0 }
 0x409   : > { %v6506_v7 = vpop.f32.mrb[1].mxu0  ;;  %v4483_v47 = vadd.f32 %v6398_v48, %v8889_v13 }
 0x40a   : > { %v6507_v63 = vadd.f32 %v6506_v7, %v6505_v3  ;;  %v6508_v0 = vpop.f32.mrb[2].mxu0 }
 0x40b   : > { %v6509_v56 = vpop.f32.mrb[3].mxu0  ;;  %v6399_v17 = vpop.f32.mrb[228].mxu1 }
 0x40c   : > { %v6510_v12 = vadd.f32 %v6509_v56, %v6508_v0  ;;  %v6400_v27 = vpop.f32.mrb[229].mxu1  ;;  %v8978_v58 = vadd.f32 %v6507_v63, %v4480_v30 }
 0x40d   : > { %v6401_v24 = vadd.f32 %v6400_v27, %v6399_v17  ;;  %v6402_v49 = vpop.f32.mrb[230].mxu1 }
 0x40e   : > { %v6403_v57 = vpop.f32.mrb[231].mxu1  ;;  %v8980_v62 = vadd.f32 %v6510_v12, %v4483_v47 }
 0x40f   : > { %v4488_v33 = vadd.f32 %v6401_v24, %v8893_v2  ;;  %v6404_v22 = vadd.f32 %v6403_v57, %v6402_v49 }
 0x410   : > { %v6511_v16 = vpop.f32.mrb[4].mxu0 }
 0x411   : > { %v6512_v39 = vpop.f32.mrb[5].mxu0  ;;  %v4491_v13 = vadd.f32 %v6404_v22, %v8895_v14 }
 0x412   : > { %v6513_v6 = vadd.f32 %v6512_v39, %v6511_v16  ;;  %v6514_v34 = vpop.f32.mrb[6].mxu0 }
 0x413   : > { %v6515_v11 = vpop.f32.mrb[7].mxu0  ;;  %v6405_v40 = vpop.f32.mrb[232].mxu1 }
 0x414   : > { %v6516_v55 = vadd.f32 %v6515_v11, %v6514_v34  ;;  %v6406_v54 = vpop.f32.mrb[233].mxu1  ;;  %v8984_v28 = vadd.f32 %v6513_v6, %v4488_v33 }
 0x415   : > { %v6407_v37 = vadd.f32 %v6406_v54, %v6405_v40  ;;  %v6408_v10 = vpop.f32.mrb[234].mxu1 }
 0x416   : > { %v6409_v43 = vpop.f32.mrb[235].mxu1  ;;  %v8986_v31 = vadd.f32 %v6516_v55, %v4491_v13 }
 0x417   : > { %v4496_v2 = vadd.f32 %v6407_v37, %v8899_v59  ;;  %v6410_v19 = vadd.f32 %v6409_v43, %v6408_v10 }
 0x418   : > { %v6517_v8 = vpop.f32.mrb[8].mxu0 }
 0x419   : > { %v6518_v30 = vpop.f32.mrb[9].mxu0  ;;  %v4499_v14 = vadd.f32 %v6410_v19, %v8901_v50 }
 0x41a   : > { %v6519_v48 = vadd.f32 %v6518_v30, %v6517_v8  ;;  %v6520_v3 = vpop.f32.mrb[10].mxu0 }
 0x41b   : > { %v6521_v7 = vpop.f32.mrb[11].mxu0  ;;  %v6411_v47 = vpop.f32.mrb[236].mxu1 }
 0x41c   : > { %v6522_v63 = vadd.f32 %v6521_v7, %v6520_v3  ;;  %v6412_v0 = vpop.f32.mrb[237].mxu1  ;;  %v8990_v56 = vadd.f32 %v6519_v48, %v4496_v2 }
 0x41d   : > { %v6413_v17 = vadd.f32 %v6412_v0, %v6411_v47  ;;  %v6414_v12 = vpop.f32.mrb[238].mxu1 }
 0x41e   : > { %v6415_v27 = vpop.f32.mrb[239].mxu1  ;;  %v8992_v24 = vadd.f32 %v6522_v63, %v4499_v14 }
 0x41f   : > { %v4504_v59 = vadd.f32 %v6413_v17, %v8907_v29  ;;  %v6416_v49 = vadd.f32 %v6415_v27, %v6414_v12 }
 0x420   : > { %v6523_v57 = vpop.f32.mrb[12].mxu0 }
 0x421   : > { %v6524_v33 = vpop.f32.mrb[13].mxu0  ;;  %v4507_v50 = vadd.f32 %v6416_v49, %v8910_v52 }
 0x422   : > { %v6525_v22 = vadd.f32 %v6524_v33, %v6523_v57  ;;  %v6526_v16 = vpop.f32.mrb[14].mxu0 }
 0x423   : > { %v6527_v39 = vpop.f32.mrb[15].mxu0  ;;  %v6417_v13 = vpop.f32.mrb[240].mxu1 }
 0x424   : > { %v6528_v6 = vadd.f32 %v6527_v39, %v6526_v16  ;;  %v6418_v34 = vpop.f32.mrb[241].mxu1  ;;  %v8996_v11 = vadd.f32 %v6525_v22, %v4504_v59 }
 0x425   : > { %v6419_v40 = vadd.f32 %v6418_v34, %v6417_v13  ;;  %v6420_v55 = vpop.f32.mrb[242].mxu1 }
 0x426   : > { %v6421_v54 = vpop.f32.mrb[243].mxu1  ;;  %v8998_v37 = vadd.f32 %v6528_v6, %v4507_v50 }
 0x427   : > { %v4512_v29 = vadd.f32 %v6419_v40, %v8912_v41  ;;  %v6422_v10 = vadd.f32 %v6421_v54, %v6420_v55  ;;  %v6965_v40 = vld [vmem:[%s7320_s8 + $0x20] sm:$0x1] }
 0x428   : > { %v6529_v43 = vpop.f32.mrb[16].mxu0  ;;  %v4869_v55 = vunpack.c.l.bf16 %v6965_v40 }
 0x429   : > { %v6530_v2 = vpop.f32.mrb[17].mxu0  ;;  %v4515_v52 = vadd.f32 %v6422_v10, %v8914_v53 }
 0x42a   : > { %v6531_v19 = vadd.f32 %v6530_v2, %v6529_v43  ;;  %v6532_v8 = vpop.f32.mrb[18].mxu0  ;;  %v6967_v43 = vld [vmem:[%s7320_s8 + $0x38] sm:$0x1] }
 0x42b   : > { %v6533_v30 = vpop.f32.mrb[19].mxu0  ;;  %v6423_v14 = vpop.f32.mrb[244].mxu1  ;;  %v4875_v2 = vunpack.c.l.bf16 %v6967_v43 }
 0x42c   : > { %v6534_v48 = vadd.f32 %v6533_v30, %v6532_v8  ;;  %v6424_v3 = vpop.f32.mrb[245].mxu1  ;;  %v9002_v7 = vadd.f32 %v6531_v19, %v4512_v29  ;;  %v6966_v29 = vld [vmem:[%s7320_s8 + $0x2c] sm:$0x1]  ;;  %v6968_v30 = vld [vmem:[%s7320_s8 + $0x44] sm:$0x1] }
 0x42d   : > { %v6425_v47 = vadd.f32 %v6424_v3, %v6423_v14  ;;  %v6426_v63 = vpop.f32.mrb[246].mxu1  ;;  %v4872_v10 = vunpack.c.l.bf16 %v6966_v29  ;;  %v4878_v14 = vunpack.c.l.bf16 %v6968_v30 }
 0x42e   : > { %v6427_v0 = vpop.f32.mrb[247].mxu1  ;;  %v9004_v17 = vadd.f32 %v6534_v48, %v4515_v52 }
 0x42f   : > { %v4520_v41 = vadd.f32 %v6425_v47, %v8916_v35  ;;  %v6428_v12 = vadd.f32 %v6427_v0, %v6426_v63  ;;  %v6964_v35 = vld [vmem:[%s7320_s8 + $0x14] sm:$0x1]  ;;  %v6969_v63 = vld [vmem:[%s7320_s8 + $0x50] sm:$0x1] }
 0x430   : > { %9367 = vst [vmem:[#allocation9_spill] sm:$0xff] %v9004_v17  ;;  %v6535_v27 = vpop.f32.mrb[20].mxu0  ;;  %v4866_v34 = vunpack.c.l.bf16 %v6964_v35  ;;  %v4881_v0 = vunpack.c.l.bf16 %v6969_v63 }
 0x431   : > { %v6536_v53 = vpop.f32.mrb[21].mxu0  ;;  %v4523_v59 = vadd.f32 %v6428_v12, %v8918_v23 }
 0x432   : > { %v6537_v49 = vadd.f32 %v6536_v53, %v6535_v27  ;;  %v6538_v57 = vpop.f32.mrb[22].mxu0  ;;  %v9019_v47 = vrot.slane %v4866_v34, 1  ;;  %v9022_v27 = vrot.slane %v4869_v55, 1  ;;  %v9024_v53 = vrot.slane %v4872_v10, 1 }
 0x433   : > { %v6539_v33 = vpop.f32.mrb[23].mxu0  ;;  %v6429_v50 = vpop.f32.mrb[248].mxu1  ;;  %v9033_v34 = vrot.slane %v4878_v14, 1  ;;  %v9036_v43 = vrot.slane %v4881_v0, 1 }
 0x434   : > { %v6540_v22 = vadd.f32 %v6539_v33, %v6538_v57  ;;  %v6430_v16 = vpop.f32.mrb[249].mxu1  ;;  %v9008_v39 = vadd.f32 %v6537_v49, %v4520_v41 }
 0x435   : > { %v6431_v13 = vadd.f32 %v6430_v16, %v6429_v50  ;;  %v6432_v6 = vpop.f32.mrb[250].mxu1  ;;  %v6971_v50 = vld [vmem:[%s7320_s8 + $0x68] sm:$0x1] }
 0x436   : > { %v6433_v54 = vpop.f32.mrb[251].mxu1  ;;  %v9012_v23 = vadd.f32 %v6540_v22, %v4523_v59  ;;  %v6970_v59 = vld [vmem:[%s7320_s8 + $0x5c] sm:$0x1]  ;;  %v6972_v22 = vld [vmem:[%s7320_s8 + $0x74] sm:$0x1] }
 0x437   : > { %v4528_v52 = vadd.f32 %v6431_v13, %v8920_v51  ;;  %v6434_v19 = vadd.f32 %v6433_v54, %v6432_v6  ;;  %v9026_v51 = vrot.slane %v4875_v2, 1  ;;  %v4884_v49 = vunpack.c.l.bf16 %v6970_v59  ;;  %v6973_v54 = vld [vmem:[%s7320_s8 + $0x18] sm:$0xff]   ;;  %v6974_v2 = vld [vmem:[%s7320_s8 + $0x80] sm:$0x1]  ;;  %v6977_v59 = vld [vmem:[%s7320_s8 + $0xc] sm:$0xff]  }
 0x438   : > { %9368 = vst [vmem:[#allocation10_spill] sm:$0xff] %v9012_v23  ;;  %v6541_v8 = vpop.f32.mrb[24].mxu0  ;;  %v4890_v16 = vunpack.c.l.bf16 %v6972_v22  ;;  %v4867_v29 = vunpack.c.l.bf16 %v6973_v54  ;;  %v4868_v10 = vunpack.c.h.bf16 %v6973_v54  ;;  %v6978_v54 = vld [vmem:[%s7320_s8 + $0xa4] sm:$0x1] }
 0x439   : > { %v6542_v48 = vpop.f32.mrb[25].mxu0  ;;  %v4531_v3 = vadd.f32 %v6434_v19, %v8922_v25  ;;  %v4887_v25 = vunpack.c.l.bf16 %v6971_v50  ;;  %v4893_v19 = vunpack.c.l.bf16 %v6974_v2  ;;  %v4902_v2 = vunpack.c.l.bf16 %v6978_v54 }
 0x43a   : > { %v6543_v41 = vadd.f32 %v6542_v48, %v6541_v8  ;;  %v6544_v12 = vpop.f32.mrb[26].mxu0  ;;  %v6975_v8 = vld [vmem:[%s7320_s8 + $0x8c] sm:$0x1]  ;;  %v9049_v50 = vrot.slane %v4890_v16, 1 }
 0x43b   : > { %v6545_v57 = vpop.f32.mrb[27].mxu0  ;;  %v6435_v33 = vpop.f32.mrb[252].mxu1  ;;  %v4896_v30 = vunpack.c.l.bf16 %v6975_v8  ;;  %v9047_v0 = vrot.slane %v4887_v25, 1  ;;  %v4966_v8 = vrot.slane %v4867_v29, 1  ;;  %v6979_v25 = vld [vmem:[%s7320_s8 + $0x30] sm:$0xff]  }
 0x43c   : > { %v6546_v13 = vadd.f32 %v6545_v57, %v6544_v12  ;;  %v6436_v6 = vpop.f32.mrb[253].mxu1  ;;  %v9031_v35 = vadd.f32 %v6543_v41, %v4528_v52  ;;  %v6976_v52 = vld [vmem:[%s7320_s8 + $0x98] sm:$0x1]  ;;  %v4864_v57 = vunpack.c.l.bf16 %v6977_v59  ;;  %v4873_v16 = vunpack.c.l.bf16 %v6979_v25 }
 0x43d   : > { %v6437_v40 = vadd.f32 %v6436_v6, %v6435_v33  ;;  %v6438_v55 = vpop.f32.mrb[254].mxu1  ;;  %v4899_v41 = vunpack.c.l.bf16 %v6976_v52  ;;  %v9045_v33 = vrot.slane %v4884_v49, 1  ;;  %v4865_v6 = vunpack.c.h.bf16 %v6977_v59 }
 0x43e   : > { %9369 = vst [vmem:[#allocation11_spill] sm:$0xff] %v9031_v35  ;;  %v6439_v48 = vpop.f32.mrb[255].mxu1  ;;  %v9040_v63 = vadd.f32 %v6546_v13, %v4531_v3  ;;  %v4967_v52 = vrot.slane %v4868_v10, 1  ;;  %v4961_v29 = vrot.slane %v4864_v57, 1  ;;  %v4874_v10 = vunpack.c.h.bf16 %v6979_v25  ;;  %v9079_v57 = vld [vmem:[%s9336_s6] ss:$0 sm:$0xff] }
 0x43f   : > { %v4536_v14 = vadd.f32 %v6437_v40, %v8924_v45  ;;  %v6440_v12 = vadd.f32 %v6439_v48, %v6438_v55  ;;  %v9053_v45 = vrot.slane %v4893_v19, 1  ;;  %v9055_v40 = vrot.slane %v4896_v30, 1  ;;  %v6981_v35 = vld [vmem:[%s7320_s8 + $0x24] sm:$0xff]  }
 0x440   : > { %9370 = vst [vmem:[#allocation12_spill] sm:$0xff] %v9040_v63  ;;  %v6547_v22 = vpop.f32.mrb[28].mxu0  ;;  %v9058_v48 = vrot.slane %v4899_v41, 1  ;;  %v9071_v41 = vld [vmem:[%s7320_s8 + $0xb0] sm:$0x1]  ;;  %v4968_v17 = vsel %vm820_vm1, %v4966_v8, %v4967_v52 }
 0x441   : > { %v4539_v3 = vadd.f32 %v6440_v12, %v8926_v42  ;;  %v6548_v13 = vpop.f32.mrb[29].mxu0  ;;  %v9063_v42 = vld [vmem:[%s9335_s5] ss:$0 sm:$0xff] }
 0x442   : > { %v6549_v55 = vadd.f32 %v6548_v13, %v6547_v22  ;;  %v6550_v49 = vpop.f32.mrb[30].mxu0  ;;  %v4962_v22 = vrot.slane %v4865_v6, 1  ;;  %v9068_v13 = vrot.slane %v4902_v2, 1 }
 0x443   : > { %v6551_v59 = vpop.f32.mrb[31].mxu0  ;;  %v6643_v63 = vpop.f32.mrb[0].mxu1 }
 0x444   : > { %v6552_v19 = vadd.f32 %v6551_v59, %v6550_v49  ;;  %v4746_v30 = vadd.f32 %v6643_v63, %v8936_v36  ;;  %v4737_v12 = vpop.f32.mrb[1].mxu1  ;;  %v9066_v54 = vadd.f32 %v6549_v55, %v4536_v14  ;;  %9372 = vst [vmem:[#allocation14_spill] sm:$0xff] %v9068_v13  ;;  %v4976_v55 = vrot.slane %v4873_v16, 1 }
 0x445   : > { %v4738_v36 = vadd.f32 %v4737_v12, %v8930_v18  ;;  %v6644_v63 = vpop.f32.mrb[2].mxu1  ;;  %v4977_v59 = vrot.slane %v4874_v10, 1  ;;  %v4871_v12 = vunpack.c.h.bf16 %v6981_v35 }
 0x446   : > { %9371 = vst [vmem:[#allocation13_spill] sm:$0xff] %v9066_v54  ;;  %v5082_v14 = vmul.f32 %v9063_v42, %v4746_v30  ;;  %v4749_v6 = vadd.f32 %v6644_v63, %v8938_v21  ;;  %v4740_v2 = vpop.f32.mrb[3].mxu1  ;;  %v9084_v49 = vadd.f32 %v6552_v19, %v4539_v3  ;;  %v4870_v54 = vunpack.c.l.bf16 %v6981_v35 }
 0x447   : > { %v5080_v25 = vmul.f32 %v9063_v42, %v4738_v36  ;;  %v4741_v8 = vadd.f32 %v4740_v2, %v8932_v60  ;;  %v4963_v30 = vsel %vm820_vm1, %v4961_v29, %v4962_v22  ;;  %v4970_v3 = vsel %vm820_vm1, %v4967_v52, %v9022_v27  ;;  %v6982_v60 = vld [vmem:[%s7320_s8 + $0x48] sm:$0xff]  }
 0x448   : > { %9373 = vst [vmem:[#allocation15_spill] sm:$0xff] %v9084_v49  ;;  %v5121_v18 = vadd.f32 %v9079_v57, %v5082_v14  ;;  %v5083_v21 = vmul.f32 %v9063_v42, %v4749_v6  ;;  %v4879_v10 = vunpack.c.l.bf16 %v6982_v60  ;;  %v4965_v14 = vsel %vm820_vm1, %v4962_v22, %v9019_v47 }
 0x449   : > { %v5119_v16 = vadd.f32 %v9079_v57, %v5080_v25  ;;  %v5081_v19 = vmul.f32 %v9063_v42, %v4741_v8  ;;  %v4880_v2 = vunpack.c.h.bf16 %v6982_v60  ;;  %v4978_v25 = vsel %vm820_vm1, %v4976_v55, %v4977_v59 }
 0x44a   : > { %v5153_v36 = vadd.f32 %v5121_v18, %v4968_v17  ;;  %v5122_v63 = vadd.f32 %v9079_v57, %v5083_v21  ;;  %v4971_v49 = vrot.slane %v4870_v54, 1  ;;  %v4972_v23 = vrot.slane %v4871_v12, 1 }
 0x44b   : > { %v5151_v29 = vadd.f32 %v5119_v16, %v4963_v30  ;;  %v5120_v6 = vadd.f32 %v9079_v57, %v5081_v19  ;;  %v6647_v35 = vpop.f32.mrb[4].mxu1  ;;  %v4986_v22 = vrot.slane %v4879_v10, 1  ;;  %v4987_v12 = vrot.slane %v4880_v2, 1  ;;  %v6983_v19 = vld [vmem:[%s7320_s8 + $0x3c] sm:$0xff]  }
 0x44c   : > { %v5185_v13 = vmax.f32 %v5153_v36, 0.0  ;;  %v5154_v27 = vadd.f32 %v5122_v63, %v4970_v3  ;;  %v4762_v52 = vadd.f32 %v6647_v35, %v8948_v4  ;;  %v4753_v8 = vpop.f32.mrb[5].mxu1  ;;  %v4876_v60 = vunpack.c.l.bf16 %v6983_v19 }
 0x44d   : > { %v5183_v17 = vmax.f32 %v5151_v29, 0.0  ;;  %v5152_v18 = vadd.f32 %v5120_v6, %v4965_v14  ;;  %v4754_v21 = vadd.f32 %v4753_v8, %v8942_v26  ;;  %v6648_v47 = vpop.f32.mrb[6].mxu1  ;;  %v4973_v10 = vsel %vm820_vm1, %v4971_v49, %v4972_v23  ;;  %v6984_v29 = vld [vmem:[%s7320_s8 + $0x60] sm:$0xff]  }
 0x44e   : > { %5217 = vst [vmem:[%s9106_s20 + $0x10] sm:$0xff] %v5185_v13  ;;  %v5186_v54 = vmax.f32 %v5154_v27, 0.0  ;;  %v5086_v55 = vmul.f32 %v9063_v42, %v4762_v52  ;;  %v4765_v4 = vadd.f32 %v6648_v47, %v8950_v38  ;;  %v4756_v30 = vpop.f32.mrb[7].mxu1  ;;  %v4877_v63 = vunpack.c.h.bf16 %v6983_v19 }
 0x44f   : > { %5215 = vst [vmem:[%s9106_s20] sm:$0xff] %v5183_v17  ;;  %v5184_v16 = vmax.f32 %v5152_v18, 0.0  ;;  %v5084_v26 = vmul.f32 %v9063_v42, %v4754_v21  ;;  %v4757_v3 = vadd.f32 %v4756_v30, %v8944_v46  ;;  %v4980_v14 = vsel %vm820_vm1, %v4977_v59, %v9026_v51 }
 0x450   : > { %5218 = vst [vmem:[%s9106_s20 + $0x18] sm:$0xff] %v5186_v54  ;;  %v5125_v13 = vadd.f32 %v9079_v57, %v5086_v55  ;;  %v5087_v36 = vmul.f32 %v9063_v42, %v4765_v4  ;;  %v4885_v46 = vunpack.c.l.bf16 %v6984_v29  ;;  %v4975_v27 = vsel %vm820_vm1, %v4972_v23, %v9024_v53 }
 0x451   : > { %5216 = vst [vmem:[%s9106_s20 + $0x8] sm:$0xff] %v5184_v16  ;;  %v5123_v38 = vadd.f32 %v9079_v57, %v5084_v26  ;;  %v5085_v2 = vmul.f32 %v9063_v42, %v4757_v3  ;;  %v4886_v49 = vunpack.c.h.bf16 %v6984_v29  ;;  %v4988_v18 = vsel %vm820_vm1, %v4986_v22, %v4987_v12 }
 0x452   : > { %v5157_v6 = vadd.f32 %v5125_v13, %v4978_v25  ;;  %v5126_v35 = vadd.f32 %v9079_v57, %v5087_v36  ;;  %v4981_v21 = vrot.slane %v4876_v60, 1  ;;  %v4982_v54 = vrot.slane %v4877_v63, 1 }
 0x453   : > { %v5155_v52 = vadd.f32 %v5123_v38, %v4973_v10  ;;  %v5124_v8 = vadd.f32 %v9079_v57, %v5085_v2  ;;  %v6651_v17 = vpop.f32.mrb[8].mxu1  ;;  %v4996_v30 = vrot.slane %v4885_v46, 1  ;;  %v4997_v19 = vrot.slane %v4886_v49, 1  ;;  %v6985_v10 = vld [vmem:[%s7320_s8 + $0x54] sm:$0xff]  }
 0x454   : > { %v5189_v51 = vmax.f32 %v5157_v6, 0.0  ;;  %v5158_v59 = vadd.f32 %v5126_v35, %v4980_v14  ;;  %v4778_v47 = vadd.f32 %v6651_v17, %v8960_v44  ;;  %v4769_v25 = vpop.f32.mrb[9].mxu1  ;;  %v4983_v63 = vsel %vm820_vm1, %v4981_v21, %v4982_v54  ;;  %v6986_v46 = vld [vmem:[%s7320_s8 + $0x78] sm:$0xff]  }
 0x455   : > { %v5187_v55 = vmax.f32 %v5155_v52, 0.0  ;;  %v5156_v4 = vadd.f32 %v5124_v8, %v4975_v27  ;;  %v4770_v23 = vadd.f32 %v4769_v25, %v8954_v1  ;;  %v6652_v53 = vpop.f32.mrb[10].mxu1  ;;  %v4882_v1 = vunpack.c.l.bf16 %v6985_v10 }
 0x456   : > { %5221 = vst [vmem:[%s9106_s20 + $0x30] sm:$0xff] %v5189_v51  ;;  %v5190_v16 = vmax.f32 %v5158_v59, 0.0  ;;  %v5090_v22 = vmul.f32 %v9063_v42, %v4778_v47  ;;  %v4781_v26 = vadd.f32 %v6652_v53, %v8962_v9  ;;  %v4772_v3 = vpop.f32.mrb[11].mxu1  ;;  %v4883_v14 = vunpack.c.h.bf16 %v6985_v10 }
 0x457   : > { %5219 = vst [vmem:[%s9106_s20 + $0x20] sm:$0xff] %v5187_v55  ;;  %v5188_v44 = vmax.f32 %v5156_v4, 0.0  ;;  %v5088_v60 = vmul.f32 %v9063_v42, %v4770_v23  ;;  %v4773_v13 = vadd.f32 %v4772_v3, %v8956_v20  ;;  %v4990_v2 = vsel %vm820_vm1, %v4987_v12, %v9036_v43 }
 0x458   : > { %5222 = vst [vmem:[%s9106_s20 + $0x38] sm:$0xff] %v5190_v16  ;;  %v5129_v36 = vadd.f32 %v9079_v57, %v5090_v22  ;;  %v5091_v38 = vmul.f32 %v9063_v42, %v4781_v26  ;;  %v4891_v20 = vunpack.c.l.bf16 %v6986_v46  ;;  %v4985_v27 = vsel %vm820_vm1, %v4982_v54, %v9033_v34 }
 0x459   : > { %5220 = vst [vmem:[%s9106_s20 + $0x28] sm:$0xff] %v5188_v44  ;;  %v5127_v9 = vadd.f32 %v9079_v57, %v5088_v60  ;;  %v5089_v29 = vmul.f32 %v9063_v42, %v4773_v13  ;;  %v4892_v49 = vunpack.c.h.bf16 %v6986_v46  ;;  %v4998_v21 = vsel %vm820_vm1, %v4996_v30, %v4997_v19  ;;  %v6987_v44 = vld [vmem:[%s7320_s8 + $0x6c] sm:$0xff]  }
 0x45a   : > { %v5161_v6 = vadd.f32 %v5129_v36, %v4988_v18  ;;  %v5130_v35 = vadd.f32 %v9079_v57, %v5091_v38  ;;  %v4991_v51 = vrot.slane %v4882_v1, 1  ;;  %v4992_v47 = vrot.slane %v4883_v14, 1  ;;  %v6988_v38 = vld [vmem:[%s7320_s8 + $0x90] sm:$0xff]  }
 0x45b   : > { %v5159_v52 = vadd.f32 %v5127_v9, %v4983_v63  ;;  %v5128_v8 = vadd.f32 %v9079_v57, %v5089_v29  ;;  %v6655_v17 = vpop.f32.mrb[12].mxu1  ;;  %v5006_v4 = vrot.slane %v4891_v20, 1  ;;  %v5007_v22 = vrot.slane %v4892_v49, 1 }
 0x45c   : > { %v5193_v43 = vmax.f32 %v5161_v6, 0.0  ;;  %v5162_v12 = vadd.f32 %v5130_v35, %v4990_v2  ;;  %v4794_v59 = vadd.f32 %v6655_v17, %v8972_v61  ;;  %v4785_v18 = vpop.f32.mrb[13].mxu1  ;;  %v4993_v13 = vsel %vm820_vm1, %v4991_v51, %v4992_v47 }
 0x45d   : > { %v5191_v25 = vmax.f32 %v5159_v52, 0.0  ;;  %v5160_v55 = vadd.f32 %v5128_v8, %v4985_v27  ;;  %v4786_v34 = vadd.f32 %v4785_v18, %v8966_v5  ;;  %v6656_v54 = vpop.f32.mrb[14].mxu1  ;;  %v4888_v5 = vunpack.c.l.bf16 %v6987_v44 }
 0x45e   : > { %5225 = vst [vmem:[%s9106_s20 + $0x50] sm:$0xff] %v5193_v43  ;;  %v5194_v23 = vmax.f32 %v5162_v12, 0.0  ;;  %v5094_v53 = vmul.f32 %v9063_v42, %v4794_v59  ;;  %v4797_v30 = vadd.f32 %v6656_v54, %v8974_v15  ;;  %v4788_v16 = vpop.f32.mrb[15].mxu1  ;;  %v4889_v1 = vunpack.c.h.bf16 %v6987_v44  ;;  %v6989_v54 = vld [vmem:[%s7320_s8 + $0x84] sm:$0xff]  }
 0x45f   : > { %5223 = vst [vmem:[%s9106_s20 + $0x40] sm:$0xff] %v5191_v25  ;;  %v5192_v61 = vmax.f32 %v5160_v55, 0.0  ;;  %v5092_v26 = vmul.f32 %v9063_v42, %v4786_v34  ;;  %v4789_v3 = vadd.f32 %v4788_v16, %v8968_v32  ;;  %v5000_v36 = vsel %vm820_vm1, %v4997_v19, %v9047_v0 }
 0x460   : > { %5226 = vst [vmem:[%s9106_s20 + $0x58] sm:$0xff] %v5194_v23  ;;  %v5133_v60 = vadd.f32 %v9079_v57, %v5094_v53  ;;  %v5095_v10 = vmul.f32 %v9063_v42, %v4797_v30  ;;  %v4897_v32 = vunpack.c.l.bf16 %v6988_v38  ;;  %v4995_v2 = vsel %vm820_vm1, %v4992_v47, %v9045_v33 }
 0x461   : > { %5224 = vst [vmem:[%s9106_s20 + $0x48] sm:$0xff] %v5192_v61  ;;  %v5131_v15 = vadd.f32 %v9079_v57, %v5092_v26  ;;  %v5093_v63 = vmul.f32 %v9063_v42, %v4789_v3  ;;  %v4898_v29 = vunpack.c.h.bf16 %v6988_v38  ;;  %v5008_v35 = vsel %vm820_vm1, %v5006_v4, %v5007_v22  ;;  %v6990_v26 = vld [vmem:[%s7320_s8 + $0xa8] sm:$0xff]  }
 0x462   : > { %v5165_v14 = vadd.f32 %v5133_v60, %v4998_v21  ;;  %v5134_v9 = vadd.f32 %v9079_v57, %v5095_v10  ;;  %v5001_v27 = vrot.slane %v4888_v5, 1  ;;  %v5002_v8 = vrot.slane %v4889_v1, 1 }
 0x463   : > { %v5163_v46 = vadd.f32 %v5131_v15, %v4993_v13  ;;  %v5132_v20 = vadd.f32 %v9079_v57, %v5093_v63  ;;  %v6659_v6 = vpop.f32.mrb[16].mxu1  ;;  %v5016_v43 = vrot.slane %v4897_v32, 1  ;;  %v5017_v25 = vrot.slane %v4898_v29, 1 }
 0x464   : > { %v5197_v0 = vmax.f32 %v5165_v14, 0.0  ;;  %v5166_v19 = vadd.f32 %v5134_v9, %v5000_v36  ;;  %v4810_v49 = vadd.f32 %v6659_v6, %v8984_v28  ;;  %v4801_v52 = vpop.f32.mrb[17].mxu1  ;;  %v5003_v23 = vsel %vm820_vm1, %v5001_v27, %v5002_v8 }
 0x465   : > { %v5195_v17 = vmax.f32 %v5163_v46, 0.0  ;;  %v5164_v21 = vadd.f32 %v5132_v20, %v4995_v2  ;;  %v4802_v33 = vadd.f32 %v4801_v52, %v8978_v58  ;;  %v6660_v51 = vpop.f32.mrb[18].mxu1  ;;  %v4894_v58 = vunpack.c.l.bf16 %v6989_v54 }
 0x466   : > { %5229 = vst [vmem:[%s9106_s20 + $0x70] sm:$0xff] %v5197_v0  ;;  %v5198_v12 = vmax.f32 %v5166_v19, 0.0  ;;  %v5098_v59 = vmul.f32 %v9063_v42, %v4810_v49  ;;  %v4813_v18 = vadd.f32 %v6660_v51, %v8986_v31  ;;  %v4804_v47 = vpop.f32.mrb[19].mxu1  ;;  %v4895_v30 = vunpack.c.h.bf16 %v6989_v54  ;;  %v6991_v49 = vld [vmem:[%s7320_s8 + $0x9c] sm:$0xff]  }
 0x467   : > { %5227 = vst [vmem:[%s9106_s20 + $0x60] sm:$0xff] %v5195_v17  ;;  %v5196_v28 = vmax.f32 %v5164_v21, 0.0  ;;  %v5096_v55 = vmul.f32 %v9063_v42, %v4802_v33  ;;  %v4805_v34 = vadd.f32 %v4804_v47, %v8980_v62  ;;  %v5010_v16 = vsel %vm820_vm1, %v5007_v22, %v9053_v45 }
 0x468   : > { %5230 = vst [vmem:[%s9106_s20 + $0x78] sm:$0xff] %v5198_v12  ;;  %v5137_v4 = vadd.f32 %v9079_v57, %v5098_v59  ;;  %v5099_v53 = vmul.f32 %v9063_v42, %v4813_v18  ;;  %v4903_v62 = vunpack.c.l.bf16 %v6990_v26  ;;  %v5005_v5 = vsel %vm820_vm1, %v5002_v8, %v9049_v50  ;;  %v9223_v12 = vld [vmem:[%s7320_s8 + $0xbc] sm:$0x1] }
 0x469   : > { %5228 = vst [vmem:[%s9106_s20 + $0x68] sm:$0xff] %v5196_v28  ;;  %v5135_v31 = vadd.f32 %v9079_v57, %v5096_v55  ;;  %v5097_v61 = vmul.f32 %v9063_v42, %v4805_v34  ;;  %v4904_v60 = vunpack.c.h.bf16 %v6990_v26  ;;  %v5018_v15 = vsel %vm820_vm1, %v5016_v43, %v5017_v25 }
 0x46a   : > { %v5169_v3 = vadd.f32 %v5137_v4, %v5008_v35  ;;  %v5138_v44 = vadd.f32 %v9079_v57, %v5099_v53  ;;  %v5011_v36 = vrot.slane %v4894_v58, 1  ;;  %v5012_v32 = vrot.slane %v4895_v30, 1 }
 0x46b   : > { %v5167_v13 = vadd.f32 %v5135_v31, %v5003_v23  ;;  %v5136_v10 = vadd.f32 %v9079_v57, %v5097_v61  ;;  %v6663_v1 = vpop.f32.mrb[20].mxu1  ;;  %v5026_v29 = vrot.slane %v4903_v62, 1  ;;  %v5027_v27 = vrot.slane %v4904_v60, 1  ;;  %v6993_v61 = vld [vmem:[%s7320_s8 + $0xc0] sm:$0xff]  }
 0x46c   : > { %v5201_v45 = vmax.f32 %v5169_v3, 0.0  ;;  %v5170_v22 = vadd.f32 %v5138_v44, %v5010_v16  ;;  %v4826_v63 = vadd.f32 %v6663_v1, %v8996_v11  ;;  %v4817_v38 = vpop.f32.mrb[21].mxu1  ;;  %v5013_v8 = vsel %vm820_vm1, %v5011_v36, %v5012_v32  ;;  %v9375_v44 = vld [vmem:[#allocation10_spill] sm:$0xff]  ;;  %v9376_v1 = vld [vmem:[#allocation9_spill] sm:$0xff] }
 0x46d   : > { %v5199_v14 = vmax.f32 %v5167_v13, 0.0  ;;  %v5168_v9 = vadd.f32 %v5136_v10, %v5005_v5  ;;  %v4818_v50 = vadd.f32 %v4817_v38, %v8990_v56  ;;  %v6664_v2 = vpop.f32.mrb[22].mxu1  ;;  %v4900_v56 = vunpack.c.l.bf16 %v6991_v49 }
 0x46e   : > { %5233 = vst [vmem:[%s9106_s20 + $0x90] sm:$0xff] %v5201_v45  ;;  %v5202_v46 = vmax.f32 %v5170_v22, 0.0  ;;  %v5102_v20 = vmul.f32 %v9063_v42, %v4826_v63  ;;  %v4829_v6 = vadd.f32 %v6664_v2, %v8998_v37  ;;  %v4820_v35 = vpop.f32.mrb[23].mxu1  ;;  %v4901_v21 = vunpack.c.h.bf16 %v6991_v49 }
 0x46f   : > { %5231 = vst [vmem:[%s9106_s20 + $0x80] sm:$0xff] %v5199_v14  ;;  %v5200_v11 = vmax.f32 %v5168_v9, 0.0  ;;  %v5100_v0 = vmul.f32 %v9063_v42, %v4818_v50  ;;  %v4821_v19 = vadd.f32 %v4820_v35, %v8992_v24  ;;  %v9374_v37 = vunpack.c.l.bf16 %v9071_v41 }
 0x470   : > { %5234 = vst [vmem:[%s9106_s20 + $0x98] sm:$0xff] %v5202_v46  ;;  %v5141_v52 = vadd.f32 %v9079_v57, %v5102_v20  ;;  %v5103_v17 = vmul.f32 %v9063_v42, %v4829_v6  ;;  %v5020_v43 = vsel %vm820_vm1, %v5017_v25, %v9058_v48  ;;  %v4908_v59 = vunpack.c.l.bf16 %v9223_v12  ;;  %v9377_v20 = vld [vmem:[#allocation14_spill] sm:$0xff] }
 0x471   : > { %v5029_v33 = vrot.slane %v9374_v37, 1  ;;  %5232 = vst [vmem:[%s9106_s20 + $0x88] sm:$0xff] %v5200_v11  ;;  %v5139_v51 = vadd.f32 %v9079_v57, %v5100_v0  ;;  %v5101_v24 = vmul.f32 %v9063_v42, %v4821_v19  ;;  %v5015_v41 = vsel %vm820_vm1, %v5012_v32, %v9055_v40  ;;  %v6995_v32 = vld [vmem:[%s7320_s8 + $0xc8] sm:$0x1] }
 0x472   : > { %v5173_v18 = vadd.f32 %v5141_v52, %v5018_v15  ;;  %v5142_v47 = vadd.f32 %v9079_v57, %v5103_v17  ;;  %v5028_v48 = vsel %vm820_vm1, %v5026_v29, %v5027_v27  ;;  %v5021_v25 = vrot.slane %v4900_v56, 1  ;;  %v6994_v15 = vld [vmem:[%s7320_s8 + $0xb4] sm:$0xff]   ;;  %s5632_s8 = sshll.u32 %s7160_s28, 12  ;;  %s9289_s28 = scalar_lea.sflag [#allocation5], %s284_s14 }
 0x473   : > { %v5171_v28 = vadd.f32 %v5139_v51, %v5013_v8  ;;  %v5140_v55 = vadd.f32 %v9079_v57, %v5101_v24  ;;  %v6667_v34 = vpop.f32.mrb[24].mxu1  ;;  %v5022_v53 = vrot.slane %v4901_v21, 1  ;;  %v4909_v26 = vunpack.c.l.bf16 %v6993_v61  ;;  %v9379_v24 = vld [vmem:[#allocation11_spill] sm:$0xff]  ;;  %s9280_s22 = scalar_lea.hbm %s9337_s7, %s5632_s8 }
 0x474   : > { %v5205_v54 = vmax.f32 %v5173_v18, 0.0  ;;  %v5174_v58 = vadd.f32 %v5142_v47, %v5020_v43  ;;  %v4842_v4 = vadd.f32 %v6667_v34, %v9008_v39  ;;  %v4833_v23 = vpop.f32.mrb[25].mxu1  ;;  %v4910_v60 = vunpack.c.h.bf16 %v6993_v61 }
 0x475   : > { %v5203_v30 = vmax.f32 %v5171_v28, 0.0  ;;  %v5172_v31 = vadd.f32 %v5140_v55, %v5015_v41  ;;  %v4834_v40 = vadd.f32 %v4833_v23, %v9002_v7  ;;  %v6668_v16 = vpop.f32.mrb[26].mxu1  ;;  %v4906_v36 = vunpack.c.l.bf16 %v6994_v15  ;;  %v9380_v55 = vld [vmem:[#allocation15_spill] sm:$0xff] }
 0x476   : > { %5237 = vst [vmem:[%s9106_s20 + $0xb0] sm:$0xff] %v5205_v54  ;;  %v5206_v62 = vmax.f32 %v5174_v58, 0.0  ;;  %v5106_v3 = vmul.f32 %v9063_v42, %v4842_v4  ;;  %v4845_v5 = vadd.f32 %v6668_v16, %v9375_v44  ;;  %v4836_v39 = vpop.f32.mrb[27].mxu1  ;;  %v5023_v22 = vsel %vm820_vm1, %v5021_v25, %v5022_v53  ;;  %v9381_v4 = vld [vmem:[#allocation12_spill] sm:$0xff] }
 0x477   : > { %5235 = vst [vmem:[%s9106_s20 + $0xa0] sm:$0xff] %v5203_v30  ;;  %v5204_v13 = vmax.f32 %v5172_v31, 0.0  ;;  %v5104_v10 = vmul.f32 %v9063_v42, %v4834_v40  ;;  %v4837_v7 = vadd.f32 %v4836_v39, %v9376_v1  ;;  %v4907_v38 = vunpack.c.h.bf16 %v6994_v15 }
 0x478   : > { %5238 = vst [vmem:[%s9106_s20 + $0xb8] sm:$0xff] %v5206_v62  ;;  %v5145_v45 = vadd.f32 %v9079_v57, %v5106_v3  ;;  %v5107_v63 = vmul.f32 %v9063_v42, %v4845_v5  ;;  %v4911_v14 = vunpack.c.l.bf16 %v6995_v32  ;;  %v5030_v50 = vsel %vm820_vm1, %v5027_v27, %v5029_v33  ;;  %v9378_v27 = vld [vmem:[#allocation13_spill] sm:$0xff] }
 0x479   : > { %5236 = vst [vmem:[%s9106_s20 + $0xa8] sm:$0xff] %v5204_v13  ;;  %v5143_v9 = vadd.f32 %v9079_v57, %v5104_v10  ;;  %v5105_v2 = vmul.f32 %v9063_v42, %v4837_v7  ;;  %v5025_v6 = vsel %vm820_vm1, %v5022_v53, %v9377_v20  ;;  %v5036_v35 = vrot.slane %v4909_v26, 1 }
 0x47a   : > { %v5177_v29 = vadd.f32 %v5145_v45, %v5028_v48  ;;  %v5146_v46 = vadd.f32 %v9079_v57, %v5107_v63  ;;  %v5037_v49 = vrot.slane %v4910_v60, 1  ;;  %v5031_v56 = vrot.slane %v4906_v36, 1 }
 0x47b   : > { %v5175_v11 = vadd.f32 %v5143_v9, %v5023_v22  ;;  %v5144_v0 = vadd.f32 %v9079_v57, %v5105_v2  ;;  %v6671_v19 = vpop.f32.mrb[28].mxu1  ;;  %v5032_v37 = vrot.slane %v4907_v38, 1  ;;  %v5039_v33 = vrot.slane %v4911_v14, 1 }
 0x47c   : > { %v5209_v52 = vmax.f32 %v5177_v29, 0.0  ;;  %v5178_v8 = vadd.f32 %v5146_v46, %v5030_v50  ;;  %v4858_v17 = vadd.f32 %v6671_v19, %v9378_v27  ;;  %v4849_v21 = vpop.f32.mrb[29].mxu1  ;;  %v5034_v47 = vrot.slane %v4908_v59, 1 }
 0x47d   : > { %v5207_v51 = vmax.f32 %v5175_v11, 0.0  ;;  %v5176_v43 = vadd.f32 %v5144_v0, %v5025_v6  ;;  %v4850_v12 = vadd.f32 %v4849_v21, %v9379_v24  ;;  %v6672_v18 = vpop.f32.mrb[30].mxu1  ;;  %v5038_v54 = vsel %vm820_vm1, %v5036_v35, %v5037_v49 }
 0x47e   : > { %5241 = vst [vmem:[%s9106_s20 + $0xd0] sm:$0xff] %v5209_v52  ;;  %v5210_v41 = vmax.f32 %v5178_v8, 0.0  ;;  %v5110_v28 = vmul.f32 %v9063_v42, %v4858_v17  ;;  %v4861_v34 = vadd.f32 %v6672_v18, %v9380_v55  ;;  %v4852_v48 = vpop.f32.mrb[31].mxu1  ;;  %v5033_v53 = vsel %vm820_vm1, %v5031_v56, %v5032_v37 }
 0x47f   : > { %5239 = vst [vmem:[%s9106_s20 + $0xc0] sm:$0xff] %v5207_v51  ;;  %v5208_v25 = vmax.f32 %v5176_v43, 0.0  ;;  %v5108_v58 = vmul.f32 %v9063_v42, %v4850_v12  ;;  %v4853_v23 = vadd.f32 %v4852_v48, %v9381_v4  ;;  %v5040_v40 = vsel %vm820_vm1, %v5037_v49, %v5039_v33 }
 0x480   : > { %5242 = vst [vmem:[%s9106_s20 + $0xd8] sm:$0xff] %v5210_v41  ;;  %v5149_v59 = vadd.f32 %v9079_v57, %v5110_v28  ;;  %v5111_v30 = vmul.f32 %v9063_v42, %v4861_v34  ;;  %v5035_v62 = vsel %vm820_vm1, %v5032_v37, %v5034_v47 }
 0x481   : > { %5240 = vst [vmem:[%s9106_s20 + $0xc8] sm:$0xff] %v5208_v25  ;;  %v5147_v31 = vadd.f32 %v9079_v57, %v5108_v58  ;;  %v5109_v16 = vmul.f32 %v9063_v42, %v4853_v23 }
 0x482   : > { %v5181_v61 = vadd.f32 %v5149_v59, %v5038_v54  ;;  %v5150_v26 = vadd.f32 %v9079_v57, %v5111_v30 }
 0x483   : > { %v5179_v3 = vadd.f32 %v5147_v31, %v5033_v53  ;;  %v5148_v44 = vadd.f32 %v9079_v57, %v5109_v16 }
 0x484   : > { %v5213_v5 = vmax.f32 %v5181_v61, 0.0  ;;  %v5182_v39 = vadd.f32 %v5150_v26, %v5040_v40 }
 0x485   : > { %v5211_v60 = vmax.f32 %v5179_v3, 0.0  ;;  %v5180_v13 = vadd.f32 %v5148_v44, %v5035_v62 }
 0x486   : > { %5245 = vst [vmem:[%s9106_s20 + $0xf0] sm:$0xff] %v5213_v5  ;;  %v5214_v42 = vmax.f32 %v5182_v39, 0.0 }
 0x487   : > { %5243 = vst [vmem:[%s9106_s20 + $0xe0] sm:$0xff] %v5211_v60  ;;  %v5212_v57 = vmax.f32 %v5180_v13, 0.0 }
 0x488   : > { %5246 = vst [vmem:[%s9106_s20 + $0xf8] sm:$0xff] %v5214_v42 }
 0x489   : > { %5244 = vst [vmem:[%s9106_s20 + $0xe8] sm:$0xff] %v5212_v57 }
 0x48a   : > { %7037 = shalt.err (!%p7034_p7)
}
 0x48b   : > { %s7038_s14 = scalar_lea.hbm %s9280_s22, 4096  ;;  %s7042_s19 = scalar_lea.hbm %s9337_s7, 8192 }
 0x48c   : > { %p7039_p8 = scmp.ne.s32.totalorder %s9280_s22, %s7038_s14  ;;  %p7043_p1 = scmp.lt.u32.totalorder %s9280_s22, %s9337_s7 }
 0x48d   : > { %p7044_p0 = scmp.lt.u32.totalorder %s7042_s19, %s7038_s14  ;;  %p7046_p6 = scmp.lt.u32.totalorder %s7038_s14, %s9280_s22 }
 0x48e   : > { %p7040_p11 = pnand %p7039_p8, %p9382_p9 }
 0x48f   : > { %p7045_p5 = por %p7044_p0, %p7043_p1 }
 0x490   : > { %p7041_p13 = pneg %p7040_p11 }
 0x491   : > { %p7047_p10 = por %p7046_p6, %p7045_p5 }
 0x493   : > { %p7048_p12 = pnand %p7047_p10, %p7041_p13 }
 0x495   : > { %7051 = shalt.err (!%p7048_p12)
}
 0x496   : > { %s7097_s15 = smov 128   ;;  %s7098_s13 = smov 8  }
 0x497   : > { %6678 = dma.vmem_to_hbm [thread:$0]  (%p9382_p9), %s9282_s21, 4096, %s9280_s22, %s9289_s28, %s7097_s15, %s7097_s15, %s7098_s13  }
 0x498 PF: > { %p6690_p2 = scmp.ge.s32.totalorder %s7090_s27, 2  ;;  %s5276_s23 = sand.u32 1, %s7078_s24  }
 0x499   : > { %p9383_p3 = scmp.ne.s32.totalorder %s9342_s12, 0  ;;  %s5277_s16 = scalar_lea.sflag [#allocation5], %s5276_s23 }
 0x49b   : > { %p6685_p4 = pnand %p6690_p2, %p9383_p3 }
 0x49d   : > { %7073 = dma.done.wait (!%p6685_p4), %s5277_s16, 4096  }
 0x49e   : > { %7075 = vsyncadd (!%p6685_p4), %s5277_s16, 4294963200  ;;  %p18_p7 = scmp.ge.s32.totalorder %s7164_s30, 4   ;;  %s9384_s24 = smov %s7082_s25 }
 0x49f   : > { %s9385_s25 = smov %s7086_s26  ;;  %s9386_s26 = smov %s7175_s10 }
 0x4a0   : > { %s9387_s27 = smov %s7164_s30  ;;  %20 = sbr.rel (!%p18_p7) target bundleno = 4 (0x4), region = 90 }
 0x4a7   :  { %5282 = vsyncpa [#allocation4], 1 }
 0x4a8   :  { %5284 = vsyncpa [#allocation4 + $0x1], 1 }
 0x4a9   :  { %5285 = vsyncpa [#allocation5], 1 }
 0x4aa   :  { %5287 = vsyncpa [#allocation5 + $0x1], 1 }

</bundles_post_ra>
